<compile_context>
chip_gen: v5e
topology: v5e:2x2
jax: 0.10.0
libtpu: 0.0.40
codegen_flags: <defaults>
</compile_context>

<pallas_src>
import jax
import jax.numpy as jnp
from jax.experimental import pallas as pl
from jax.experimental.pallas import tpu as pltpu

LAYER_DIMS = [128, 256, 512, 256, 64, 16, 4, 1]


def mlp_kernel(x_ref,
               w1, b1, w2, b2, w3, b3, w4, b4,
               w5, b5, w6, b6, w7, b7, w8, b8,
               o_ref):
    # x_ref: (D_IN, TM) bf16 activation tile (feature-major, batch on lanes).
    # w1..w7: (out, in) bf16 (PyTorch layout); b1..b7: (out, 1) f32.
    # w8: (4, 1) f32 column; b8: (1, 1) f32.  o_ref: (1, TM) f32 (lane-dense).
    h = x_ref[...]
    for w, b in ((w1, b1), (w2, b2), (w3, b3), (w4, b4),
                 (w5, b5), (w6, b6), (w7, b7)):
        acc = jnp.dot(w[...], h, preferred_element_type=jnp.float32)
        h = jnp.maximum(acc + b[...], 0.0).astype(jnp.bfloat16)
    # Final 4 -> 1 layer: VPU broadcast-multiply + sublane reduction.  Keeps
    # the result lane-major and skips an MXU push/pop for a 1x4xTM matmul.
    z = jnp.sum(h.astype(jnp.float32) * w8[...], axis=0, keepdims=True) + b8[...]
    o_ref[...] = jax.nn.sigmoid(z)


def net4_forward(x, params, *, tm=256):
    """Net4 forward pass.  x: (B, D_IN) f32.  tm: batch tile (multiple of
    128); 256 fills the v6e/v7x MXU, 128 suffices on v5e.  Keep b_pad//tm >= 2
    on v7x so both TensorCores receive grid steps."""
    B, d_in = x.shape
    b_pad = pl.cdiv(B, tm) * tm

    # Feature-major + bf16: batch on the lane axis (lane-dense stores) and
    # half the activation DMA bytes.  Wrapper-side transpose is layout
    # plumbing, not compute-hoisting.
    x_t = x.T.astype(jnp.bfloat16)                        # (D_IN, B)
    if b_pad != B:
        x_t = jnp.pad(x_t, ((0, 0), (0, b_pad - B)))
    grid = (b_pad // tm,)

    # Activation tiles walk the batch (lane axis); parameters use constant
    # index_maps so each is DMA'd once and stays resident across grid steps.
    x_spec = pl.BlockSpec((d_in, tm), lambda i: (0, i))
    out_spec = pl.BlockSpec((1, tm), lambda i: (0, i))
    param_specs = [pl.BlockSpec(p.shape, lambda i: (0, 0)) for p in params]

    flops = 2 * b_pad * sum(
        int(params[2 * i].shape[0] * params[2 * i].shape[1])
        for i in range(len(LAYER_DIMS)))
    bytes_accessed = (
        sum(int(p.size) * p.dtype.itemsize for p in params)   # weights + biases
        + int(x_t.size) * x_t.dtype.itemsize                  # activations in
        + b_pad * 4)                                           # output

    out = pl.pallas_call(
        mlp_kernel,
        out_shape=jax.ShapeDtypeStruct((1, b_pad), jnp.float32),
        grid=grid,
        in_specs=[x_spec] + param_specs,
        out_specs=out_spec,
        compiler_params=pltpu.CompilerParams(
            dimension_semantics=("parallel",)),
        cost_estimate=pl.CostEstimate(
            flops=flops,
            transcendentals=b_pad,          # one exp per sigmoid output
            bytes_accessed=bytes_accessed),
    )(x_t, *params)

    # Back to the module's (B, 1) column in the wrapper.
    return out[0, :B].reshape(B, 1)


def init_params(key, input_shape):
    """Deterministic PyTorch-style (uniform +/- 1/sqrt(fan_in)) init.
    Layers 1-7: weight (out, in) bf16, bias (out, 1) f32.  Layer 8 (4 -> 1)
    is evaluated on the VPU, so its weight is a (4, 1) f32 column and its
    bias is (1, 1) f32."""
    dims = [input_shape] + LAYER_DIMS
    params = []
    for i in range(len(LAYER_DIMS)):
        key, kw, kb = jax.random.split(key, 3)
        fan_in, fan_out = dims[i], dims[i + 1]
        bound = 1.0 / (fan_in ** 0.5)
        w = jax.random.uniform(kw, (fan_out, fan_in), jnp.float32,
                               minval=-bound, maxval=bound)
        b = jax.random.uniform(kb, (fan_out, 1), jnp.float32,
                               minval=-bound, maxval=bound)
        if i == len(LAYER_DIMS) - 1:
            params += [w.T, b]                       # (4, 1) f32, (1, 1) f32
        else:
            params += [w.astype(jnp.bfloat16), b]
    return key, params


if __name__ == "__main__":
    # B=512 with TM=256 -> a 2-step grid: fills the 256-row MXU on v6e/v7x
    # while still giving v7x's two TensorCores one step each; weights stay
    # resident across both steps.  (On v5e, tm=128 is equally good.)
    B, D_IN, TM = 512, 32, 256
    key = jax.random.PRNGKey(0)
    key, params = init_params(key, D_IN)
    key, kx = jax.random.split(key)
    x = jax.random.normal(kx, (B, D_IN), dtype=jnp.float32)

    out = jax.block_until_ready(net4_forward(x, params, tm=TM))

    # Pure-JAX reference with the identical arithmetic: feature-major bf16
    # matmuls with f32 accumulation, f32 bias-add/ReLU, VPU-style 4->1 head,
    # dropout = identity (eval mode).
    h = x.T.astype(jnp.bfloat16)
    for i in range(7):
        h = jnp.maximum(
            jnp.dot(params[2 * i], h, preferred_element_type=jnp.float32)
            + params[2 * i + 1], 0.0).astype(jnp.bfloat16)
    z = jnp.sum(h.astype(jnp.float32) * params[14], axis=0, keepdims=True) + params[15]
    ref = jax.nn.sigmoid(z)[0].reshape(B, 1)

    assert out.shape == (B, 1)
    max_err = float(jnp.max(jnp.abs(out - ref)))
    assert jnp.allclose(out, ref, atol=1e-3), (
        f"Pallas output mismatch vs reference (max abs err {max_err})")
    print("KERNEL_OK")
</pallas_src>

<mosaic_0001>
module attributes {stable_mosaic.version = 11 : i64} {
  func.func @mlp_kernel(%arg0: i32, %arg1: memref<32x256xbf16, #tpu.memory_space<vmem>>, %arg2: memref<128x32xbf16, #tpu.memory_space<vmem>>, %arg3: memref<128x1xf32, #tpu.memory_space<vmem>>, %arg4: memref<256x128xbf16, #tpu.memory_space<vmem>>, %arg5: memref<256x1xf32, #tpu.memory_space<vmem>>, %arg6: memref<512x256xbf16, #tpu.memory_space<vmem>>, %arg7: memref<512x1xf32, #tpu.memory_space<vmem>>, %arg8: memref<256x512xbf16, #tpu.memory_space<vmem>>, %arg9: memref<256x1xf32, #tpu.memory_space<vmem>>, %arg10: memref<64x256xbf16, #tpu.memory_space<vmem>>, %arg11: memref<64x1xf32, #tpu.memory_space<vmem>>, %arg12: memref<16x64xbf16, #tpu.memory_space<vmem>>, %arg13: memref<16x1xf32, #tpu.memory_space<vmem>>, %arg14: memref<4x16xbf16, #tpu.memory_space<vmem>>, %arg15: memref<4x1xf32, #tpu.memory_space<vmem>>, %arg16: memref<4x1xf32, #tpu.memory_space<vmem>>, %arg17: memref<1x1xf32, #tpu.memory_space<vmem>>, %arg18: memref<1x256xf32, #tpu.memory_space<vmem>>) attributes {dimension_semantics = [#tpu.dimension_semantics<parallel>], iteration_bounds = array<i64: 2>, scalar_prefetch = 0 : i64, scratch_operands = 0 : i64, tpu.core_type = #tpu.core_type<tc>, window_params = [{transform_indices = @transform_0, window_bounds = array<i64: 32, 256>}, {pipeline_mode = #tpu.pipeline_mode<synchronous>, transform_indices = @transform_1, window_bounds = array<i64: 128, 32>}, {pipeline_mode = #tpu.pipeline_mode<synchronous>, transform_indices = @transform_2, window_bounds = array<i64: 128, 1>}, {pipeline_mode = #tpu.pipeline_mode<synchronous>, transform_indices = @transform_3, window_bounds = array<i64: 256, 128>}, {pipeline_mode = #tpu.pipeline_mode<synchronous>, transform_indices = @transform_4, window_bounds = array<i64: 256, 1>}, {pipeline_mode = #tpu.pipeline_mode<synchronous>, transform_indices = @transform_5, window_bounds = array<i64: 512, 256>}, {pipeline_mode = #tpu.pipeline_mode<synchronous>, transform_indices = @transform_6, window_bounds = array<i64: 512, 1>}, {pipeline_mode = #tpu.pipeline_mode<synchronous>, transform_indices = @transform_7, window_bounds = array<i64: 256, 512>}, {pipeline_mode = #tpu.pipeline_mode<synchronous>, transform_indices = @transform_8, window_bounds = array<i64: 256, 1>}, {pipeline_mode = #tpu.pipeline_mode<synchronous>, transform_indices = @transform_9, window_bounds = array<i64: 64, 256>}, {pipeline_mode = #tpu.pipeline_mode<synchronous>, transform_indices = @transform_10, window_bounds = array<i64: 64, 1>}, {pipeline_mode = #tpu.pipeline_mode<synchronous>, transform_indices = @transform_11, window_bounds = array<i64: 16, 64>}, {pipeline_mode = #tpu.pipeline_mode<synchronous>, transform_indices = @transform_12, window_bounds = array<i64: 16, 1>}, {pipeline_mode = #tpu.pipeline_mode<synchronous>, transform_indices = @transform_13, window_bounds = array<i64: 4, 16>}, {pipeline_mode = #tpu.pipeline_mode<synchronous>, transform_indices = @transform_14, window_bounds = array<i64: 4, 1>}, {pipeline_mode = #tpu.pipeline_mode<synchronous>, transform_indices = @transform_15, window_bounds = array<i64: 4, 1>}, {pipeline_mode = #tpu.pipeline_mode<synchronous>, transform_indices = @transform_16, window_bounds = array<i64: 1, 1>}, {transform_indices = @transform_17, window_bounds = array<i64: 1, 256>}]} {
    %c0 = arith.constant 0 : index
    %c0_0 = arith.constant 0 : index
    %0 = vector.load %arg1[%c0, %c0_0] : memref<32x256xbf16, #tpu.memory_space<vmem>>, vector<32x256xbf16>
    %c0_1 = arith.constant 0 : index
    %c0_2 = arith.constant 0 : index
    %1 = vector.load %arg2[%c0_1, %c0_2] : memref<128x32xbf16, #tpu.memory_space<vmem>>, vector<128x32xbf16>
    %cst = arith.constant dense<0.000000e+00> : vector<128x256xf32>
    %2 = tpu.matmul %1, %0, %cst {dimension_numbers = #tpu.dot_dimension_numbers<[1], [0], [0], [1], [0, 0, 1, 1], [], []>} : vector<128x32xbf16>, vector<32x256xbf16>, vector<128x256xf32> -> vector<128x256xf32>
    %c0_3 = arith.constant 0 : index
    %c0_4 = arith.constant 0 : index
    %3 = vector.load %arg3[%c0_3, %c0_4] : memref<128x1xf32, #tpu.memory_space<vmem>>, vector<128x1xf32>
    %4 = vector.broadcast %3 : vector<128x1xf32> to vector<128x256xf32>
    %5 = arith.addf %2, %4 : vector<128x256xf32>
    %cst_5 = arith.constant 0.000000e+00 : f32
    %6 = vector.broadcast %cst_5 : f32 to vector<128x256xf32>
    %7 = arith.maximumf %5, %6 : vector<128x256xf32>
    %8 = arith.truncf %7 : vector<128x256xf32> to vector<128x256xbf16>
    %c0_6 = arith.constant 0 : index
    %c0_7 = arith.constant 0 : index
    %9 = vector.load %arg4[%c0_6, %c0_7] : memref<256x128xbf16, #tpu.memory_space<vmem>>, vector<256x128xbf16>
    %cst_8 = arith.constant dense<0.000000e+00> : vector<256x256xf32>
    %10 = tpu.matmul %9, %8, %cst_8 {dimension_numbers = #tpu.dot_dimension_numbers<[1], [0], [0], [1], [0, 0, 1, 1], [], []>} : vector<256x128xbf16>, vector<128x256xbf16>, vector<256x256xf32> -> vector<256x256xf32>
    %c0_9 = arith.constant 0 : index
    %c0_10 = arith.constant 0 : index
    %11 = vector.load %arg5[%c0_9, %c0_10] : memref<256x1xf32, #tpu.memory_space<vmem>>, vector<256x1xf32>
    %12 = vector.broadcast %11 : vector<256x1xf32> to vector<256x256xf32>
    %13 = arith.addf %10, %12 : vector<256x256xf32>
    %cst_11 = arith.constant 0.000000e+00 : f32
    %14 = vector.broadcast %cst_11 : f32 to vector<256x256xf32>
    %15 = arith.maximumf %13, %14 : vector<256x256xf32>
    %16 = arith.truncf %15 : vector<256x256xf32> to vector<256x256xbf16>
    %c0_12 = arith.constant 0 : index
    %c0_13 = arith.constant 0 : index
    %17 = vector.load %arg6[%c0_12, %c0_13] : memref<512x256xbf16, #tpu.memory_space<vmem>>, vector<512x256xbf16>
    %cst_14 = arith.constant dense<0.000000e+00> : vector<512x256xf32>
    %18 = tpu.matmul %17, %16, %cst_14 {dimension_numbers = #tpu.dot_dimension_numbers<[1], [0], [0], [1], [0, 0, 1, 1], [], []>} : vector<512x256xbf16>, vector<256x256xbf16>, vector<512x256xf32> -> vector<512x256xf32>
    %c0_15 = arith.constant 0 : index
    %c0_16 = arith.constant 0 : index
    %19 = vector.load %arg7[%c0_15, %c0_16] : memref<512x1xf32, #tpu.memory_space<vmem>>, vector<512x1xf32>
    %20 = vector.broadcast %19 : vector<512x1xf32> to vector<512x256xf32>
    %21 = arith.addf %18, %20 : vector<512x256xf32>
    %cst_17 = arith.constant 0.000000e+00 : f32
    %22 = vector.broadcast %cst_17 : f32 to vector<512x256xf32>
    %23 = arith.maximumf %21, %22 : vector<512x256xf32>
    %24 = arith.truncf %23 : vector<512x256xf32> to vector<512x256xbf16>
    %c0_18 = arith.constant 0 : index
    %c0_19 = arith.constant 0 : index
    %25 = vector.load %arg8[%c0_18, %c0_19] : memref<256x512xbf16, #tpu.memory_space<vmem>>, vector<256x512xbf16>
    %cst_20 = arith.constant dense<0.000000e+00> : vector<256x256xf32>
    %26 = tpu.matmul %25, %24, %cst_20 {dimension_numbers = #tpu.dot_dimension_numbers<[1], [0], [0], [1], [0, 0, 1, 1], [], []>} : vector<256x512xbf16>, vector<512x256xbf16>, vector<256x256xf32> -> vector<256x256xf32>
    %c0_21 = arith.constant 0 : index
    %c0_22 = arith.constant 0 : index
    %27 = vector.load %arg9[%c0_21, %c0_22] : memref<256x1xf32, #tpu.memory_space<vmem>>, vector<256x1xf32>
    %28 = vector.broadcast %27 : vector<256x1xf32> to vector<256x256xf32>
    %29 = arith.addf %26, %28 : vector<256x256xf32>
    %cst_23 = arith.constant 0.000000e+00 : f32
    %30 = vector.broadcast %cst_23 : f32 to vector<256x256xf32>
    %31 = arith.maximumf %29, %30 : vector<256x256xf32>
    %32 = arith.truncf %31 : vector<256x256xf32> to vector<256x256xbf16>
    %c0_24 = arith.constant 0 : index
    %c0_25 = arith.constant 0 : index
    %33 = vector.load %arg10[%c0_24, %c0_25] : memref<64x256xbf16, #tpu.memory_space<vmem>>, vector<64x256xbf16>
    %cst_26 = arith.constant dense<0.000000e+00> : vector<64x256xf32>
    %34 = tpu.matmul %33, %32, %cst_26 {dimension_numbers = #tpu.dot_dimension_numbers<[1], [0], [0], [1], [0, 0, 1, 1], [], []>} : vector<64x256xbf16>, vector<256x256xbf16>, vector<64x256xf32> -> vector<64x256xf32>
    %c0_27 = arith.constant 0 : index
    %c0_28 = arith.constant 0 : index
    %35 = vector.load %arg11[%c0_27, %c0_28] : memref<64x1xf32, #tpu.memory_space<vmem>>, vector<64x1xf32>
    %36 = vector.broadcast %35 : vector<64x1xf32> to vector<64x256xf32>
    %37 = arith.addf %34, %36 : vector<64x256xf32>
    %cst_29 = arith.constant 0.000000e+00 : f32
    %38 = vector.broadcast %cst_29 : f32 to vector<64x256xf32>
    %39 = arith.maximumf %37, %38 : vector<64x256xf32>
    %40 = arith.truncf %39 : vector<64x256xf32> to vector<64x256xbf16>
    %c0_30 = arith.constant 0 : index
    %c0_31 = arith.constant 0 : index
    %41 = vector.load %arg12[%c0_30, %c0_31] : memref<16x64xbf16, #tpu.memory_space<vmem>>, vector<16x64xbf16>
    %cst_32 = arith.constant dense<0.000000e+00> : vector<16x256xf32>
    %42 = tpu.matmul %41, %40, %cst_32 {dimension_numbers = #tpu.dot_dimension_numbers<[1], [0], [0], [1], [0, 0, 1, 1], [], []>} : vector<16x64xbf16>, vector<64x256xbf16>, vector<16x256xf32> -> vector<16x256xf32>
    %c0_33 = arith.constant 0 : index
    %c0_34 = arith.constant 0 : index
    %43 = vector.load %arg13[%c0_33, %c0_34] : memref<16x1xf32, #tpu.memory_space<vmem>>, vector<16x1xf32>
    %44 = vector.broadcast %43 : vector<16x1xf32> to vector<16x256xf32>
    %45 = arith.addf %42, %44 : vector<16x256xf32>
    %cst_35 = arith.constant 0.000000e+00 : f32
    %46 = vector.broadcast %cst_35 : f32 to vector<16x256xf32>
    %47 = arith.maximumf %45, %46 : vector<16x256xf32>
    %48 = arith.truncf %47 : vector<16x256xf32> to vector<16x256xbf16>
    %c0_36 = arith.constant 0 : index
    %c0_37 = arith.constant 0 : index
    %49 = vector.load %arg14[%c0_36, %c0_37] : memref<4x16xbf16, #tpu.memory_space<vmem>>, vector<4x16xbf16>
    %cst_38 = arith.constant dense<0.000000e+00> : vector<4x256xf32>
    %50 = tpu.matmul %49, %48, %cst_38 {dimension_numbers = #tpu.dot_dimension_numbers<[1], [0], [0], [1], [0, 0, 1, 1], [], []>} : vector<4x16xbf16>, vector<16x256xbf16>, vector<4x256xf32> -> vector<4x256xf32>
    %c0_39 = arith.constant 0 : index
    %c0_40 = arith.constant 0 : index
    %51 = vector.load %arg15[%c0_39, %c0_40] : memref<4x1xf32, #tpu.memory_space<vmem>>, vector<4x1xf32>
    %52 = vector.broadcast %51 : vector<4x1xf32> to vector<4x256xf32>
    %53 = arith.addf %50, %52 : vector<4x256xf32>
    %cst_41 = arith.constant 0.000000e+00 : f32
    %54 = vector.broadcast %cst_41 : f32 to vector<4x256xf32>
    %55 = arith.maximumf %53, %54 : vector<4x256xf32>
    %56 = arith.truncf %55 : vector<4x256xf32> to vector<4x256xbf16>
    %57 = arith.extf %56 : vector<4x256xbf16> to vector<4x256xf32>
    %c0_42 = arith.constant 0 : index
    %c0_43 = arith.constant 0 : index
    %58 = vector.load %arg16[%c0_42, %c0_43] : memref<4x1xf32, #tpu.memory_space<vmem>>, vector<4x1xf32>
    %59 = vector.broadcast %58 : vector<4x1xf32> to vector<4x256xf32>
    %60 = arith.mulf %57, %59 : vector<4x256xf32>
    %cst_44 = arith.constant dense<0.000000e+00> : vector<256xf32>
    %61 = vector.multi_reduction <add>, %60, %cst_44 [0] : vector<4x256xf32> to vector<256xf32>
    %62 = vector.shape_cast %61 : vector<256xf32> to vector<1x256xf32>
    %c0_45 = arith.constant 0 : index
    %c0_46 = arith.constant 0 : index
    %63 = vector.load %arg17[%c0_45, %c0_46] : memref<1x1xf32, #tpu.memory_space<vmem>>, vector<1x1xf32>
    %64 = vector.broadcast %63 : vector<1x1xf32> to vector<1x256xf32>
    %65 = arith.addf %62, %64 : vector<1x256xf32>
    %66 = arith.negf %65 : vector<1x256xf32>
    %67 = math.exp %66 : vector<1x256xf32>
    %cst_47 = arith.constant 1.000000e+00 : f32
    %68 = vector.broadcast %cst_47 : f32 to vector<1x256xf32>
    %69 = arith.addf %68, %67 : vector<1x256xf32>
    %70 = arith.divf %68, %69 : vector<1x256xf32>
    %c0_48 = arith.constant 0 : index
    %c0_49 = arith.constant 0 : index
    %71 = vector.load %arg18[%c0_48, %c0_49] : memref<1x256xf32, #tpu.memory_space<vmem>>, vector<1x256xf32>
    tpu.vector_store %arg18[%c0_48, %c0_49], %70 {strides = array<i32>} : memref<1x256xf32, #tpu.memory_space<vmem>>, vector<1x256xf32>,
    return
  }
  func.func @transform_0(%arg0: i32) -> (i32, i32) {
    %c0_i32 = arith.constant 0 : i32
    %c0_i32_0 = arith.constant 0 : i32
    return %c0_i32, %arg0 : i32, i32
  }
  func.func @transform_1(%arg0: i32) -> (i32, i32) {
    %c0_i32 = arith.constant 0 : i32
    %c0_i32_0 = arith.constant 0 : i32
    %c0_i32_1 = arith.constant 0 : i32
    return %c0_i32, %c0_i32_0 : i32, i32
  }
  func.func @transform_2(%arg0: i32) -> (i32, i32) {
    %c0_i32 = arith.constant 0 : i32
    %c0_i32_0 = arith.constant 0 : i32
    %c0_i32_1 = arith.constant 0 : i32
    return %c0_i32, %c0_i32_0 : i32, i32
  }
  func.func @transform_3(%arg0: i32) -> (i32, i32) {
    %c0_i32 = arith.constant 0 : i32
    %c0_i32_0 = arith.constant 0 : i32
    %c0_i32_1 = arith.constant 0 : i32
    return %c0_i32, %c0_i32_0 : i32, i32
  }
  func.func @transform_4(%arg0: i32) -> (i32, i32) {
    %c0_i32 = arith.constant 0 : i32
    %c0_i32_0 = arith.constant 0 : i32
    %c0_i32_1 = arith.constant 0 : i32
    return %c0_i32, %c0_i32_0 : i32, i32
  }
  func.func @transform_5(%arg0: i32) -> (i32, i32) {
    %c0_i32 = arith.constant 0 : i32
    %c0_i32_0 = arith.constant 0 : i32
    %c0_i32_1 = arith.constant 0 : i32
    return %c0_i32, %c0_i32_0 : i32, i32
  }
  func.func @transform_6(%arg0: i32) -> (i32, i32) {
    %c0_i32 = arith.constant 0 : i32
    %c0_i32_0 = arith.constant 0 : i32
    %c0_i32_1 = arith.constant 0 : i32
    return %c0_i32, %c0_i32_0 : i32, i32
  }
  func.func @transform_7(%arg0: i32) -> (i32, i32) {
    %c0_i32 = arith.constant 0 : i32
    %c0_i32_0 = arith.constant 0 : i32
    %c0_i32_1 = arith.constant 0 : i32
    return %c0_i32, %c0_i32_0 : i32, i32
  }
  func.func @transform_8(%arg0: i32) -> (i32, i32) {
    %c0_i32 = arith.constant 0 : i32
    %c0_i32_0 = arith.constant 0 : i32
    %c0_i32_1 = arith.constant 0 : i32
    return %c0_i32, %c0_i32_0 : i32, i32
  }
  func.func @transform_9(%arg0: i32) -> (i32, i32) {
    %c0_i32 = arith.constant 0 : i32
    %c0_i32_0 = arith.constant 0 : i32
    %c0_i32_1 = arith.constant 0 : i32
    return %c0_i32, %c0_i32_0 : i32, i32
  }
  func.func @transform_10(%arg0: i32) -> (i32, i32) {
    %c0_i32 = arith.constant 0 : i32
    %c0_i32_0 = arith.constant 0 : i32
    %c0_i32_1 = arith.constant 0 : i32
    return %c0_i32, %c0_i32_0 : i32, i32
  }
  func.func @transform_11(%arg0: i32) -> (i32, i32) {
    %c0_i32 = arith.constant 0 : i32
    %c0_i32_0 = arith.constant 0 : i32
    %c0_i32_1 = arith.constant 0 : i32
    return %c0_i32, %c0_i32_0 : i32, i32
  }
  func.func @transform_12(%arg0: i32) -> (i32, i32) {
    %c0_i32 = arith.constant 0 : i32
    %c0_i32_0 = arith.constant 0 : i32
    %c0_i32_1 = arith.constant 0 : i32
    return %c0_i32, %c0_i32_0 : i32, i32
  }
  func.func @transform_13(%arg0: i32) -> (i32, i32) {
    %c0_i32 = arith.constant 0 : i32
    %c0_i32_0 = arith.constant 0 : i32
    %c0_i32_1 = arith.constant 0 : i32
    return %c0_i32, %c0_i32_0 : i32, i32
  }
  func.func @transform_14(%arg0: i32) -> (i32, i32) {
    %c0_i32 = arith.constant 0 : i32
    %c0_i32_0 = arith.constant 0 : i32
    %c0_i32_1 = arith.constant 0 : i32
    return %c0_i32, %c0_i32_0 : i32, i32
  }
  func.func @transform_15(%arg0: i32) -> (i32, i32) {
    %c0_i32 = arith.constant 0 : i32
    %c0_i32_0 = arith.constant 0 : i32
    %c0_i32_1 = arith.constant 0 : i32
    return %c0_i32, %c0_i32_0 : i32, i32
  }
  func.func @transform_16(%arg0: i32) -> (i32, i32) {
    %c0_i32 = arith.constant 0 : i32
    %c0_i32_0 = arith.constant 0 : i32
    %c0_i32_1 = arith.constant 0 : i32
    return %c0_i32, %c0_i32_0 : i32, i32
  }
  func.func @transform_17(%arg0: i32) -> (i32, i32) {
    %c0_i32 = arith.constant 0 : i32
    %c0_i32_0 = arith.constant 0 : i32
    return %c0_i32, %arg0 : i32, i32
  }
}

</mosaic_0001>

<bundles_post_ra>
// kernel: tpu_custom_call.1
= control target key start
LH: loop header
LB: loop body
LE: loop exit
PB: predicated region body
PF: predicated region fallthrough
CT: control target
= control target key end

     0   :  { %s9306_s0 = inlined_call_operand.vmem [shape: bf16[32,512], index: 0, kind: input, shape index: {}]   ;;  %s9307_s1 = inlined_call_operand.vmem [shape: bf16[128,32], index: 1, kind: input, shape index: {}]   ;;  %s9308_s2 = inlined_call_operand.vmem [shape: f32[128,1], index: 2, kind: input, shape index: {}]   ;;  %s9309_s3 = inlined_call_operand.vmem [shape: bf16[256,128], index: 3, kind: input, shape index: {}]   ;;  %s9310_s4 = inlined_call_operand.vmem [shape: f32[256,1], index: 4, kind: input, shape index: {}]   ;;  %s9311_s5 = inlined_call_operand.vmem [shape: bf16[512,256], index: 5, kind: input, shape index: {}]   ;;  %s9312_s6 = inlined_call_operand.vmem [shape: f32[512,1], index: 6, kind: input, shape index: {}]   ;;  %s9313_s7 = inlined_call_operand.hbm [shape: bf16[256,512], index: 7, kind: input, shape index: {}]   ;;  %s9314_s8 = inlined_call_operand.vmem [shape: f32[256,1], index: 8, kind: input, shape index: {}]   ;;  %s9315_s9 = inlined_call_operand.vmem [shape: bf16[64,256], index: 9, kind: input, shape index: {}]   ;;  %s9316_s10 = inlined_call_operand.vmem [shape: f32[64,1], index: 10, kind: input, shape index: {}]   ;;  %s9317_s11 = inlined_call_operand.vmem [shape: bf16[16,64], index: 11, kind: input, shape index: {}]   ;;  %s9318_s12 = inlined_call_operand.vmem [shape: f32[16,1], index: 12, kind: input, shape index: {}]   ;;  %s9319_s13 = inlined_call_operand.vmem [shape: bf16[4,16], index: 13, kind: input, shape index: {}]   ;;  %s9320_s14 = inlined_call_operand.vmem [shape: f32[4,1], index: 14, kind: input, shape index: {}]   ;;  %s9321_s15 = inlined_call_operand.vmem [shape: f32[4,1], index: 15, kind: input, shape index: {}]   ;;  %s9322_s16 = inlined_call_operand.<no memory space> [shape: f32[1,1], index: 16, kind: input, shape index: {}]   ;;  %s9323_s17 = inlined_call_operand.hbm [shape: f32[1,512], index: 17, kind: output, shape index: {}]  }
   0x1   :  { %9464 = sst [smem:[#allocation83_spill]] %s9306_s0  ;;  %v22_v0 = vstv %s9322_s16 }
   0x2   :  { %9465 = sst [smem:[#allocation84_spill]] %s9307_s1  ;;  %23 = vst [vmem:[#allocation2] sm:$0x1] %v22_v0 }
   0x3   :  { %9466 = sst [smem:[#allocation85_spill]] %s9308_s2 }
   0x4   :  { %9467 = sst [smem:[#allocation86_spill]] %s9313_s7 }
   0x5   :  { %24 = vsyncpa [#allocation5], 0 }
   0x6   :  { %25 = vsyncpa [#allocation6], 0 }
   0x7   :  { %27 = vsyncpa [#allocation6 + $0x1], 0  ;;  %s6209_s26 = smov 0   ;;  %s6211_s27 = smov 0  }
   0x8   :  { %s6213_s28 = smov 0   ;;  %s6215_s29 = smov 0  }
   0x9 LB: > { %9468 = sst [smem:[#allocation10_spill]] %s6098_s26  ;;  %s6230_s16 = sadd.s32 4294967295, %s6110_s29   ;;  %s6110_s29 = sphi %s6215_s29, %s9821_s29   ;;  %s6106_s28 = sphi %s6213_s28, %s9825_s28   ;;  %s6102_s27 = sphi %s6211_s27, %s9824_s27   ;;  %s6098_s26 = sphi %s6209_s26, %s9823_s26  }
   0xa   : > { %s5087_s0 = sadd.s32 4294967294, %s6110_s29   ;;  %s6234_s30 = sadd.s32 1, %s6110_s29  }
   0xb   : > { %9469 = sst [smem:[#allocation11_spill]] %s6234_s30  ;;  %s40_s18 = sadd.s32 1, %s6106_s28 }
   0xc   : > { %s37_s19 = ssub.s32 %s6110_s29, %s6234_s30  ;;  %p47_p0 = scmp.ne.s32.totalorder %s6106_s28, %s6102_s27 }
   0xd   : > { %p38_p1 = scmp.eq.s32.totalorder %s37_s19, 0  ;;  %p48_p2 = scmp.eq.s32.totalorder %s6110_s29, 0 }
   0xe   : > { %p413_p3 = scmp.eq.s32.totalorder %s6230_s16, 1  ;;  %p418_p4 = scmp.ne.s32.totalorder %s6102_s27, %s6098_s26 }
   0xf   : > { %s6246_s1 = scalar_select %p38_p1, %s6106_s28, %s40_s18  }
  0x10   : > { %p6248_p5 = por %p48_p2, %p47_p0  ;;  %p6252_p6 = por %p413_p3, %p47_p0 }
  0x11   : > { %9470 = sst [smem:[#allocation12_spill]] %s6246_s1  ;;  %p419_p7 = scmp.eq.s32.totalorder %s5087_s0, 1 }
  0x12   : > { %s9472_s21 = scalar_select %p6252_p6, 1, 0 }
  0x13   : > { %p5088_p8 = scmp.ge.s32.totalorder %s6110_s29, 1  ;;  %p426_p9 = scmp.lt.s32.totalorder %s6110_s29, 3 }
  0x14   : > { %9473 = sst [smem:[#allocation13_spill]] %s9472_s21  ;;  %p6258_p10 = por %p419_p7, %p418_p4 }
  0x15   : > { %p5964_p11 = scmp.eq.s32.totalorder %s6230_s16, 0  ;;  %p6263_p12 = pnand %p5088_p8, %p426_p9 }
  0x16   : > { %s9474_s22 = scalar_select %p6258_p10, 1, 0 }
  0x17   : > { %s9477_s7 = sld [smem:[#allocation86_spill]]  ;;  %p5956_p13 = pneg %p6263_p12 }
  0x18   : > { %9475 = sst [smem:[#allocation14_spill]] %s9474_s22  ;;  %s6112_s0 = smov [#allocation4]  }
  0x19   : > { %s457_s19 = sshll.u32 %s6112_s0, 4  ;;  %p5957_p0 = pnand %p5964_p11, %p5956_p13  ;;  %s458_s19 = int_to_ptr.vmem [resolvable:$true] %s457_s19 }
  0x1a   : > { %s6113_s1 = smov 256   ;;  %s6114_s30 = smov 16  }
  0x1b   : > { %p5090_p1 = scmp.ge.s32.totalorder %s6110_s29, 2 }
  0x1d   : > { %s455_s18 = sshll.u32 %s9477_s7, 4  ;;  %494 = sbr.rel (%p5090_p1) target bundleno = 48 (0x30), region = 80  ;;  %s456_s18 = int_to_ptr.hbm [resolvable:$true] %s455_s18 }
  0x1e   : > { %5959 = dma.hbm_to_vmem [thread:$0]  (!%p5957_p0), %s456_s18, 8192, %s458_s19, [#allocation5], %s6113_s1, %s6113_s1, %s6114_s30  }
  0x22   : > { %497 = sbr.rel (!%p6248_p5) target bundleno = 48 (0x30), region = 84  ;;  %s499_s24 = sand.u32 (%p6248_p5), 1, %s6106_s28  }
  0x23   : > { %s5784_s25 = sshll.u32 (%p6248_p5), %s6110_s29, 3  ;;  %s5091_s7 = sshll.u32 (%p6248_p5), %s499_s24, 5 }
  0x24   : > { %s9478_s26 = sld [smem:[#allocation83_spill]] (%p6248_p5)  ;;  %s501_s30 = scalar_lea.vmem (%p6248_p5), [#allocation3], %s5091_s7 }
  0x2a   : > { %s504_s21 = scalar_lea.vmem %s9478_s26, %s5784_s25 }
  0x2b   : > { %v539_v1 = vld [vmem:[%s504_s21] sm:$0xff]  ;;  %v541_v2 = vld [vmem:[%s504_s21 + $0x10] sm:$0xff] }
  0x2c   : > { %v543_v3 = vld [vmem:[%s504_s21 + $0x20] sm:$0xff]  ;;  %540 = vst [vmem:[%s501_s30] sm:$0xff] %v539_v1  ;;  %v545_v4 = vld [vmem:[%s504_s21 + $0x30] sm:$0xff] }
  0x2d   : > { %542 = vst [vmem:[%s501_s30 + $0x8] sm:$0xff] %v541_v2 }
  0x2e   : > { %544 = vst [vmem:[%s501_s30 + $0x10] sm:$0xff] %v543_v3 }
  0x2f   : > { %546 = vst [vmem:[%s501_s30 + $0x18] sm:$0xff] %v545_v4 }
  0x30 PF: > { %555 = sbr.rel (%p6263_p12) target bundleno = 2642 (0xa52), region = 122 }
  0x35   : > { %s6287_s1 = sand.u32 1, %s6102_s27  }
  0x36   : > { %s5095_s26 = sshll.u32 %s6287_s1, 5 }
  0x37   : > { %s560_s20 = scalar_lea.vmem [#allocation3], %s5095_s26 }
  0x38   : > { %6089 = dma.done.wait (%p5964_p11), [#allocation5], 8192  }
  0x39   : > { %6091 = vsyncadd (%p5964_p11), [#allocation5], 4294959104  ;;  %v6115_v5 = vmov 0   ;;  %s9479_s2 = sld [smem:[#allocation85_spill]]  ;;  %v5140_v9 = vld [vmem:[%s560_s20 + $0x10] sm:$0xf] }
  0x3a   : > { %6005 = vset.pattern.permute.xlu2 %v6115_v5  ;;  %6004 = vset.pattern.permute.xlu1 %v6115_v5  ;;  %v5788_v10 = vld [vmem:[%s560_s20 + $0x14] sm:$0xf0]  ;;  %v5787_v11 = vld [vmem:[%s560_s20 + $0x14] sm:$0xf]  ;;  %v5142_v13 = vld [vmem:[%s560_s20 + $0x18] sm:$0xf0] }
  0x3b   : > { %6003 = vset.pattern.permute.xlu0 %v6115_v5  ;;  %v5141_v12 = vor.u32 %v5788_v10, %v5140_v9  ;;  %v5132_v14 = vld [vmem:[%s560_s20] sm:$0xf]  ;;  %v5786_v15 = vld [vmem:[%s560_s20 + $0x4] sm:$0xf0]  ;;  %v5145_v16 = vor.u32 %v5787_v11, %v5142_v13  ;;  %v5785_v17 = vld [vmem:[%s560_s20 + $0x4] sm:$0xf] }
  0x3c   : > { %v5134_v18 = vld [vmem:[%s560_s20 + $0x8] sm:$0xf0]  ;;  %v5133_v19 = vor.u32 %v5786_v15, %v5132_v14  ;;  %s9480_s23 = sld [smem:[#allocation84_spill]]  ;;  %vm793_vm0 = vcmask 261120   ;;  %v1011_v37 = vld [vmem:[%s9310_s4 + $0x78] sm:$0xff]  ;;  %v1008_v41 = vld [vmem:[%s9310_s4 + $0x60] sm:$0xff] }
  0x3d   : > { %824 = vmatpush.bf16.msra.mxu0 %v5141_v12  ;;  %873 = vmatpush.bf16.msra.mxu1 %v5145_v16  ;;  %v5137_v20 = vor.u32 %v5785_v17, %v5134_v18  ;;  %v1010_v36 = vld [vmem:[%s9310_s4 + $0x70] sm:$0xff]  ;;  %v1027_v40 = vld [vmem:[%s9310_s4 + $0xf8] sm:$0xff]  ;;  %v1009_v42 = vld [vmem:[%s9310_s4 + $0x68] sm:$0xff]  ;;  %vm4833_vm1 = vcmask 523264   ;;  %vm4878_vm2 = vcmask 130048   ;;  %vm4921_vm3 = vcmask 1043456  }
  0x3e   : > { %v1026_v39 = vld [vmem:[%s9310_s4 + $0xf0] sm:$0xff]  ;;  %v1024_v43 = vld [vmem:[%s9310_s4 + $0xe0] sm:$0xff]  ;;  %v1025_v44 = vld [vmem:[%s9310_s4 + $0xe8] sm:$0xff]  ;;  %s5097_s20 = sshll.u32 %s6287_s1, 1  ;;  %s5781_s18 = sshll.u32 %s6230_s16, 1  ;;  %vm4986_vm11 = vcmask 1040384  }
  0x3f   : > { %v651_v6 = vld [vmem:[%s9479_s2 + $0x70] sm:$0xff]  ;;  %v649_v7 = vld [vmem:[%s9479_s2 + $0x60] sm:$0xff]  ;;  %v652_v21 = vld [vmem:[%s9479_s2 + $0x78] sm:$0xff]  ;;  %s5005_s25 = scalar_lea.hbm %s9323_s17, %s5781_s18  ;;  %s613_s16 = scalar_lea.vmem [#allocation7], %s5097_s20 }
  0x40   : > { %v647_v8 = vld [vmem:[%s9479_s2 + $0x50] sm:$0xff]  ;;  %725 = vperm.xlu0 %6003, %v651_v6   ;;  %715 = vperm.xlu1 %6004, %v649_v7   ;;  %v650_v22 = vld [vmem:[%s9479_s2 + $0x68] sm:$0xff]  ;;  %v648_v23 = vld [vmem:[%s9479_s2 + $0x58] sm:$0xff]  ;;  %s5007_s0 = sshll.u32 %s613_s16, 4  ;;  %s5009_s30 = sshll.u32 %s5005_s25, 4  ;;  %s5008_s0 = int_to_ptr.vmem [resolvable:$true] %s5007_s0  ;;  %s5010_s30 = int_to_ptr.hbm [resolvable:$true] %s5009_s30 }
  0x41   : > { %705 = vperm.xlu2 %6005, %v647_v8   ;;  %825 = vmatpush.bf16.msra.mxu0 %v5133_v19  ;;  %v645_v25 = vld [vmem:[%s9479_s2 + $0x40] sm:$0xff]  ;;  %v646_v26 = vld [vmem:[%s9479_s2 + $0x48] sm:$0xff]  ;;  %v643_v27 = vld [vmem:[%s9479_s2 + $0x30] sm:$0xff]  ;;  %s4995_s7 = scalar_lea.sflag [#allocation6], %s6287_s1  ;;  %s6058_s21 = sshra.s32 %s5010_s30, 4  ;;  %s6059_s21 = int_to_ptr.hbm [resolvable:$true] %s6058_s21 }
  0x42   : > { %v5789_v24 = vld [vmem:[%s9480_s23] sm:$0xff]  ;;  %874 = vmatpush.bf16.msra.mxu1 %v5137_v20  ;;  %v644_v28 = vld [vmem:[%s9479_s2 + $0x38] sm:$0xff]  ;;  %v642_v29 = vld [vmem:[%s9479_s2 + $0x28] sm:$0xff]  ;;  %s6060_s22 = scalar_lea.hbm %s6059_s21, 2  ;;  %s6064_s19 = scalar_lea.hbm %s9323_s17, 4 }
  0x43   : > { %v641_v30 = vld [vmem:[%s9479_s2 + $0x20] sm:$0xff]  ;;  %v5790_v31 = vld [vmem:[%s9480_s23 + $0x8] sm:$0xff]  ;;  %v639_v32 = vld [vmem:[%s9479_s2 + $0x10] sm:$0xff]  ;;  %p6061_p2 = scmp.ne.s32.totalorder %s6059_s21, %s6060_s22  ;;  %p6065_p5 = scmp.lt.s32.totalorder %s6059_s21, %s9323_s17 }
  0x44   : > { %5146 = vmatmul.msk.bf16.vlgmr.msra.gmra.mxu0 %vm793_vm0, %v5789_v24  ;;  %v640_v33 = vld [vmem:[%s9479_s2 + $0x18] sm:$0xff]  ;;  %v637_v34 = vld [vmem:[%s9479_s2] sm:$0xff]  ;;  %v638_v35 = vld [vmem:[%s9479_s2 + $0x8] sm:$0xff]  ;;  %p6066_p7 = scmp.lt.s32.totalorder %s6064_s19, %s6060_s22 }
  0x45   : > { %5154 = vmatmul.msk.bf16.vlgmr.msra.gmra.mxu1 %vm793_vm0, %v5789_v24  ;;  %v5791_v38 = vld [vmem:[%s9480_s23 + $0x10] sm:$0xff]  ;;  %v5792_v45 = vld [vmem:[%s9480_s23 + $0x18] sm:$0xff]  ;;  %v1004_v50 = vld [vmem:[%s9310_s4 + $0x40] sm:$0xff]  ;;  %p6062_p3 = pnand %p6061_p2, %p6252_p6 }
  0x46   : > { %v1006_v46 = vld [vmem:[%s9310_s4 + $0x50] sm:$0xff]  ;;  %v1007_v47 = vld [vmem:[%s9310_s4 + $0x58] sm:$0xff]  ;;  %v1005_v51 = vld [vmem:[%s9310_s4 + $0x48] sm:$0xff]  ;;  %p6067_p8 = por %p6066_p7, %p6065_p5 }
  0x47   : > { %v1022_v48 = vld [vmem:[%s9310_s4 + $0xd0] sm:$0xff]  ;;  %v1023_v49 = vld [vmem:[%s9310_s4 + $0xd8] sm:$0xff]  ;;  %v5793_v52 = vld [vmem:[%s9480_s23 + $0x20] sm:$0xff]  ;;  %p6063_p4 = pneg %p6062_p3 }
  0x48   : > { %730 = vperm.xlu0 %6003, %v652_v21   ;;  %720 = vperm.xlu1 %6004, %v650_v22   ;;  %v1020_v53 = vld [vmem:[%s9310_s4 + $0xc0] sm:$0xff]  ;;  %v1021_v54 = vld [vmem:[%s9310_s4 + $0xc8] sm:$0xff]  ;;  %v1002_v55 = vld [vmem:[%s9310_s4 + $0x30] sm:$0xff] }
  0x49   : > { %710 = vperm.xlu2 %6005, %v648_v23   ;;  %v1003_v56 = vld [vmem:[%s9310_s4 + $0x38] sm:$0xff]  ;;  %v1018_v57 = vld [vmem:[%s9310_s4 + $0xb0] sm:$0xff]  ;;  %v5794_v59 = vld [vmem:[%s9480_s23 + $0x28] sm:$0xff]  ;;  %p6068_p9 = pnand %p6067_p8, %p6063_p4 }
  0x4a   : > { %v1019_v58 = vld [vmem:[%s9310_s4 + $0xb8] sm:$0xff]  ;;  %v1000_v60 = vld [vmem:[%s9310_s4 + $0x20] sm:$0xff]  ;;  %v1001_v61 = vld [vmem:[%s9310_s4 + $0x28] sm:$0xff] }
  0x4b   : > { %v1016_v62 = vld [vmem:[%s9310_s4 + $0xa0] sm:$0xff]  ;;  %v1017_v63 = vld [vmem:[%s9310_s4 + $0xa8] sm:$0xff]  ;;  %v998_v0 = vld [vmem:[%s9310_s4 + $0x10] sm:$0xff] }
  0x4c   : > { %v999_v1 = vld [vmem:[%s9310_s4 + $0x18] sm:$0xff]  ;;  %v5795_v2 = vld [vmem:[%s9480_s23 + $0x30] sm:$0xff]  ;;  %v996_v5 = vld [vmem:[%s9310_s4] sm:$0xff] }
  0x4d   : > { %v1014_v3 = vld [vmem:[%s9310_s4 + $0x90] sm:$0xff]  ;;  %v1015_v4 = vld [vmem:[%s9310_s4 + $0x98] sm:$0xff]  ;;  %v997_v6 = vld [vmem:[%s9310_s4 + $0x8] sm:$0xff] }
  0x4e   : > { %v1012_v7 = vld [vmem:[%s9310_s4 + $0x80] sm:$0xff]  ;;  %v1013_v8 = vld [vmem:[%s9310_s4 + $0x88] sm:$0xff]  ;;  %v5796_v9 = vld [vmem:[%s9480_s23 + $0x38] sm:$0xff] }
  0x4f   : > { %v1668_v10 = vld [vmem:[%s9312_s6 + $0x170] sm:$0xff]  ;;  %v1669_v11 = vld [vmem:[%s9312_s6 + $0x178] sm:$0xff]  ;;  %v1666_v20 = vld [vmem:[%s9312_s6 + $0x160] sm:$0xff] }
  0x50   : > { %695 = vperm.xlu0 %6003, %v645_v25   ;;  %700 = vperm.xlu1 %6004, %v646_v26   ;;  %v1636_v12 = vld [vmem:[%s9312_s6 + $0x70] sm:$0xff]  ;;  %v1637_v13 = vld [vmem:[%s9312_s6 + $0x78] sm:$0xff]  ;;  %v1667_v23 = vld [vmem:[%s9312_s6 + $0x168] sm:$0xff] }
  0x51   : > { %685 = vperm.xlu2 %6005, %v643_v27   ;;  %v1684_v14 = vld [vmem:[%s9312_s6 + $0x1f0] sm:$0xff]  ;;  %v1685_v15 = vld [vmem:[%s9312_s6 + $0x1f8] sm:$0xff]  ;;  %v1634_v24 = vld [vmem:[%s9312_s6 + $0x60] sm:$0xff] }
  0x52   : > { %v1652_v18 = vld [vmem:[%s9312_s6 + $0xf0] sm:$0xff]  ;;  %v1653_v19 = vld [vmem:[%s9312_s6 + $0xf8] sm:$0xff]  ;;  %v1635_v25 = vld [vmem:[%s9312_s6 + $0x68] sm:$0xff] }
  0x54   : > { %5147 = vmatmul.msk.bf16.gmra.mxu0 %vm793_vm0, %v5790_v31 }
  0x55   : > { %5155 = vmatmul.msk.bf16.gmra.mxu1 %vm793_vm0, %v5790_v31 }
  0x58   : > { %690 = vperm.xlu0 %6003, %v644_v28   ;;  %675 = vperm.xlu1 %6004, %v641_v30   ;;  %v1682_v28 = vld [vmem:[%s9312_s6 + $0x1e0] sm:$0xff] }
  0x59   : > { %680 = vperm.xlu2 %6005, %v642_v29   ;;  %v1683_v29 = vld [vmem:[%s9312_s6 + $0x1e8] sm:$0xff]  ;;  %v1650_v30 = vld [vmem:[%s9312_s6 + $0xe0] sm:$0xff] }
  0x60   : > { %665 = vperm.xlu0 %6003, %v639_v32   ;;  %670 = vperm.xlu1 %6004, %v640_v33   ;;  %v1651_v33 = vld [vmem:[%s9312_s6 + $0xe8] sm:$0xff] }
  0x61   : > { %655 = vperm.xlu2 %6005, %v637_v34   ;;  %v1664_v34 = vld [vmem:[%s9312_s6 + $0x150] sm:$0xff] }
  0x64   : > { %5148 = vmatmul.msk.bf16.gmra.mxu0 %vm793_vm0, %v5791_v38 }
  0x65   : > { %5156 = vmatmul.msk.bf16.gmra.mxu1 %vm793_vm0, %v5791_v38  ;;  %v1632_v38 = vld [vmem:[%s9312_s6 + $0x50] sm:$0xff] }
  0x68   : > { %660 = vperm.xlu0 %6003, %v638_v35   ;;  %1100 = vperm.xlu1 %6004, %v1010_v36   ;;  %v1665_v35 = vld [vmem:[%s9312_s6 + $0x158] sm:$0xff] }
  0x69   : > { %1105 = vperm.xlu2 %6005, %v1011_v37  }
  0x70   : > { %1180 = vperm.xlu0 %6003, %v1026_v39   ;;  %1185 = vperm.xlu1 %6004, %v1027_v40   ;;  %v1633_v39 = vld [vmem:[%s9312_s6 + $0x58] sm:$0xff]  ;;  %v1680_v40 = vld [vmem:[%s9312_s6 + $0x1d0] sm:$0xff] }
  0x71   : > { %1090 = vperm.xlu2 %6005, %v1008_v41  }
  0x74   : > { %5149 = vmatmul.msk.bf16.gmra.mxu0 %vm793_vm0, %v5792_v45 }
  0x75   : > { %5157 = vmatmul.msk.bf16.gmra.mxu1 %vm793_vm0, %v5792_v45  ;;  %v1649_v45 = vld [vmem:[%s9312_s6 + $0xd8] sm:$0xff] }
  0x78   : > { %1095 = vperm.xlu0 %6003, %v1009_v42   ;;  %1170 = vperm.xlu1 %6004, %v1024_v43   ;;  %v1681_v43 = vld [vmem:[%s9312_s6 + $0x1d8] sm:$0xff] }
  0x79   : > { %1175 = vperm.xlu2 %6005, %v1025_v44   ;;  %v1648_v44 = vld [vmem:[%s9312_s6 + $0xd0] sm:$0xff] }
  0x80   : > { %1080 = vperm.xlu0 %6003, %v1006_v46   ;;  %1085 = vperm.xlu1 %6004, %v1007_v47  }
  0x81   : > { %1160 = vperm.xlu2 %6005, %v1022_v48   ;;  %v1662_v48 = vld [vmem:[%s9312_s6 + $0x140] sm:$0xff] }
  0x84   : > { %5150 = vmatmul.msk.bf16.gmra.mxu0 %vm793_vm0, %v5793_v52 }
  0x85   : > { %5158 = vmatmul.msk.bf16.gmra.mxu1 %vm793_vm0, %v5793_v52 }
  0x88   : > { %1165 = vperm.xlu0 %6003, %v1023_v49   ;;  %1070 = vperm.xlu1 %6004, %v1004_v50   ;;  %v1663_v49 = vld [vmem:[%s9312_s6 + $0x148] sm:$0xff]  ;;  %v1630_v50 = vld [vmem:[%s9312_s6 + $0x40] sm:$0xff] }
  0x89   : > { %1075 = vperm.xlu2 %6005, %v1005_v51  }
  0x90   : > { %1150 = vperm.xlu0 %6003, %v1020_v53   ;;  %1155 = vperm.xlu1 %6004, %v1021_v54   ;;  %v1631_v53 = vld [vmem:[%s9312_s6 + $0x48] sm:$0xff]  ;;  %v1678_v54 = vld [vmem:[%s9312_s6 + $0x1c0] sm:$0xff] }
  0x91   : > { %1060 = vperm.xlu2 %6005, %v1002_v55   ;;  %v1679_v55 = vld [vmem:[%s9312_s6 + $0x1c8] sm:$0xff] }
  0x94   : > { %5151 = vmatmul.msk.bf16.gmra.mxu0 %vm793_vm0, %v5794_v59 }
  0x95   : > { %5159 = vmatmul.msk.bf16.gmra.mxu1 %vm793_vm0, %v5794_v59  ;;  %v1647_v59 = vld [vmem:[%s9312_s6 + $0xc8] sm:$0xff] }
  0x98   : > { %1065 = vperm.xlu0 %6003, %v1003_v56   ;;  %1140 = vperm.xlu1 %6004, %v1018_v57  }
  0x99   : > { %1145 = vperm.xlu2 %6005, %v1019_v58   ;;  %v1646_v58 = vld [vmem:[%s9312_s6 + $0xc0] sm:$0xff] }
  0xa0   : > { %1050 = vperm.xlu0 %6003, %v1000_v60   ;;  %1055 = vperm.xlu1 %6004, %v1001_v61   ;;  %v1660_v60 = vld [vmem:[%s9312_s6 + $0x130] sm:$0xff] }
  0xa1   : > { %1130 = vperm.xlu2 %6005, %v1016_v62  }
  0xa4   : > { %5152 = vmatmul.msk.bf16.gmra.mxu0 %vm793_vm0, %v5795_v2 }
  0xa5   : > { %5160 = vmatmul.msk.bf16.gmra.mxu1 %vm793_vm0, %v5795_v2 }
  0xa8   : > { %1135 = vperm.xlu0 %6003, %v1017_v63   ;;  %1040 = vperm.xlu1 %6004, %v998_v0   ;;  %v1661_v63 = vld [vmem:[%s9312_s6 + $0x138] sm:$0xff]  ;;  %v1628_v0 = vld [vmem:[%s9312_s6 + $0x30] sm:$0xff] }
  0xa9   : > { %1045 = vperm.xlu2 %6005, %v999_v1   ;;  %v1629_v1 = vld [vmem:[%s9312_s6 + $0x38] sm:$0xff] }
  0xb0   : > { %1120 = vperm.xlu0 %6003, %v1014_v3   ;;  %1125 = vperm.xlu1 %6004, %v1015_v4   ;;  %v1676_v4 = vld [vmem:[%s9312_s6 + $0x1b0] sm:$0xff] }
  0xb1   : > { %1030 = vperm.xlu2 %6005, %v996_v5   ;;  %v1677_v5 = vld [vmem:[%s9312_s6 + $0x1b8] sm:$0xff] }
  0xb4   : > { %5153 = vmatmul.msk.bf16.gmra.mxu0 %vm793_vm0, %v5796_v9 }
  0xb5   : > { %5161 = vmatmul.msk.bf16.gmra.mxu1 %vm793_vm0, %v5796_v9  ;;  %v726_v9 = vpop.permute.xlu0 %725 }
  0xb8   : > { %1035 = vperm.xlu0 %6003, %v997_v6   ;;  %1110 = vperm.xlu1 %6004, %v1012_v7   ;;  %v1644_v6 = vld [vmem:[%s9312_s6 + $0xb0] sm:$0xff] }
  0xb9   : > { %1115 = vperm.xlu2 %6005, %v1013_v8  }
  0xc0   : > { %1918 = vperm.xlu0 %6003, %v1668_v10   ;;  %1923 = vperm.xlu1 %6004, %v1669_v11   ;;  %v1645_v10 = vld [vmem:[%s9312_s6 + $0xb8] sm:$0xff]  ;;  %v1658_v11 = vld [vmem:[%s9312_s6 + $0x120] sm:$0xff] }
  0xc1   : > { %1758 = vperm.xlu2 %6005, %v1636_v12   ;;  %v6496_v16 = vpop.f32.mrf.mxu0  ;;  %v1659_v12 = vld [vmem:[%s9312_s6 + $0x128] sm:$0xff] }
  0xc2   : > { %v6498_v17 = vpop.f32.mrf.mxu1 }
  0xc8   : > { %1763 = vperm.xlu0 %6003, %v1637_v13   ;;  %1998 = vperm.xlu1 %6004, %v1684_v14  }
  0xc9   : > { %2003 = vperm.xlu2 %6005, %v1685_v15   ;;  %v6509_v21 = vpop.f32.mrf.mxu0  ;;  %v716_v15 = vpop.permute.xlu1 %715 }
  0xca   : > { %v6511_v22 = vpop.f32.mrf.mxu1 }
  0xd0   : > { %1838 = vperm.xlu0 %6003, %v1652_v18   ;;  %1843 = vperm.xlu1 %6004, %v1653_v19   ;;  %v731_v18 = vpop.permute.xlu0 %730  ;;  %v1626_v19 = vld [vmem:[%s9312_s6 + $0x20] sm:$0xff] }
  0xd1   : > { %1908 = vperm.xlu2 %6005, %v1666_v20   ;;  %v6522_v26 = vpop.f32.mrf.mxu0  ;;  %v1627_v20 = vld [vmem:[%s9312_s6 + $0x28] sm:$0xff] }
  0xd2   : > { %v6524_v27 = vpop.f32.mrf.mxu1 }
  0xd8   : > { %1913 = vperm.xlu0 %6003, %v1667_v23   ;;  %1748 = vperm.xlu1 %6004, %v1634_v24   ;;  %v1674_v23 = vld [vmem:[%s9312_s6 + $0x1a0] sm:$0xff]  ;;  %v706_v24 = vpop.permute.xlu2 %705 }
  0xd9   : > { %1753 = vperm.xlu2 %6005, %v1635_v25   ;;  %v6535_v31 = vpop.f32.mrf.mxu0 }
  0xda   : > { %v6537_v32 = vpop.f32.mrf.mxu1 }
  0xe0   : > { %1988 = vperm.xlu0 %6003, %v1682_v28   ;;  %1993 = vperm.xlu1 %6004, %v1683_v29   ;;  %v721_v29 = vpop.permute.xlu1 %720 }
  0xe1   : > { %1828 = vperm.xlu2 %6005, %v1650_v30   ;;  %v6548_v36 = vpop.f32.mrf.mxu0  ;;  %v1675_v30 = vld [vmem:[%s9312_s6 + $0x1a8] sm:$0xff] }
  0xe2   : > { %v6550_v37 = vpop.f32.mrf.mxu1 }
  0xe8   : > { %1833 = vperm.xlu0 %6003, %v1651_v33   ;;  %1898 = vperm.xlu1 %6004, %v1664_v34   ;;  %v1642_v33 = vld [vmem:[%s9312_s6 + $0xa0] sm:$0xff]  ;;  %v1643_v34 = vld [vmem:[%s9312_s6 + $0xa8] sm:$0xff] }
  0xe9   : > { %1903 = vperm.xlu2 %6005, %v1665_v35   ;;  %v6561_v41 = vpop.f32.mrf.mxu0  ;;  %v696_v35 = vpop.permute.xlu0 %695 }
  0xea   : > { %v6563_v42 = vpop.f32.mrf.mxu1 }
  0xf0   : > { %1738 = vperm.xlu0 %6003, %v1632_v38   ;;  %1743 = vperm.xlu1 %6004, %v1633_v39  }
  0xf1   : > { %1978 = vperm.xlu2 %6005, %v1680_v40   ;;  %v6574_v46 = vpop.f32.mrf.mxu0  ;;  %v711_v40 = vpop.permute.xlu2 %710 }
  0xf2   : > { %v6576_v47 = vpop.f32.mrf.mxu1 }
  0xf8   : > { %1983 = vperm.xlu0 %6003, %v1681_v43   ;;  %1818 = vperm.xlu1 %6004, %v1648_v44   ;;  %v1656_v43 = vld [vmem:[%s9312_s6 + $0x110] sm:$0xff] }
  0xf9   : > { %1823 = vperm.xlu2 %6005, %v1649_v45   ;;  %v6587_v51 = vpop.f32.mrf.mxu0  ;;  %v1657_v45 = vld [vmem:[%s9312_s6 + $0x118] sm:$0xff] }
  0xfa   : > { %v6589_v52 = vpop.f32.mrf.mxu1 }
 0x100   : > { %1888 = vperm.xlu0 %6003, %v1662_v48   ;;  %1893 = vperm.xlu1 %6004, %v1663_v49   ;;  %v1624_v48 = vld [vmem:[%s9312_s6 + $0x10] sm:$0xff]  ;;  %v701_v49 = vpop.permute.xlu1 %700 }
 0x101   : > { %1728 = vperm.xlu2 %6005, %v1630_v50   ;;  %v6600_v56 = vpop.f32.mrf.mxu0 }
 0x102   : > { %v6602_v57 = vpop.f32.mrf.mxu1 }
 0x108   : > { %1733 = vperm.xlu0 %6003, %v1631_v53   ;;  %1968 = vperm.xlu1 %6004, %v1678_v54  }
 0x109   : > { %1973 = vperm.xlu2 %6005, %v1679_v55   ;;  %v6613_v61 = vpop.f32.mrf.mxu0 }
 0x10a   : > { %v6615_v62 = vpop.f32.mrf.mxu1 }
 0x110   : > { %1808 = vperm.xlu0 %6003, %v1646_v58   ;;  %1813 = vperm.xlu1 %6004, %v1647_v59   ;;  %v691_v59 = vpop.permute.xlu0 %690 }
 0x111   : > { %1878 = vperm.xlu2 %6005, %v1660_v60   ;;  %v6626_v2 = vpop.f32.mrf.mxu0 }
 0x112   : > { %v6628_v3 = vpop.f32.mrf.mxu1 }
 0x118   : > { %1883 = vperm.xlu0 %6003, %v1661_v63   ;;  %1718 = vperm.xlu1 %6004, %v1628_v0  }
 0x119   : > { %1723 = vperm.xlu2 %6005, %v1629_v1   ;;  %v854_v7 = vpop.f32.mrf.mxu0 }
 0x11a   : > { %v903_v8 = vpop.f32.mrf.mxu1 }
 0x120   : > { %1958 = vperm.xlu0 %6003, %v1676_v4   ;;  %1963 = vperm.xlu1 %6004, %v1677_v5  }
 0x121   : > { %1798 = vperm.xlu2 %6005, %v1644_v6   ;;  %v857_v13 = vpop.f32.mrf.mxu0  ;;  %v686_v6 = vpop.permute.xlu2 %685 }
 0x122   : > { %v906_v14 = vpop.f32.mrf.mxu1  ;;  %v858_v1 = vadd.f32 %v857_v13, %v716_v15  ;;  %v853_v13 = vadd.f32 %v6626_v2, %v706_v24  ;;  %v899_v2 = vadd.f32 %v6615_v62, %v701_v49  ;;  %v894_v62 = vadd.f32 %v6589_v52, %v691_v59 }
 0x123   : > { %v907_v60 = vadd.f32 %v906_v14, %v716_v15  ;;  %v1625_v14 = vld [vmem:[%s9312_s6 + $0x18] sm:$0xff] }
 0x124   : > { %v940_v15 = vmax.f32 %v858_v1, 0.0 }
 0x128   : > { %1803 = vperm.xlu0 %6003, %v1645_v10   ;;  %1868 = vperm.xlu1 %6004, %v1658_v11  }
 0x129   : > { %1873 = vperm.xlu2 %6005, %v1659_v12   ;;  %v859_v25 = vpop.f32.mrf.mxu0  ;;  %v902_v12 = vadd.f32 %v6628_v3, %v706_v24  ;;  %v1673_v3 = vld [vmem:[%s9312_s6 + $0x198] sm:$0xff] }
 0x12a   : > { %v908_v28 = vpop.f32.mrf.mxu1  ;;  %v860_v54 = vadd.f32 %v859_v25, %v721_v29  ;;  %v941_v25 = vmax.f32 %v907_v60, 0.0 }
 0x12b   : > { %v909_v63 = vadd.f32 %v908_v28, %v721_v29  ;;  %v937_v24 = vmax.f32 %v902_v12, 0.0 }
 0x130   : > { %1708 = vperm.xlu0 %6003, %v1626_v19   ;;  %1713 = vperm.xlu1 %6004, %v1627_v20   ;;  %v942_v19 = vmax.f32 %v860_v54, 0.0 }
 0x131   : > { %1948 = vperm.xlu2 %6005, %v1674_v23   ;;  %v862_v38 = vpop.f32.mrf.mxu0  ;;  %v904_v23 = vadd.f32 %v903_v8, %v711_v40  ;;  %v850_v8 = vadd.f32 %v6613_v61, %v701_v49  ;;  %v845_v61 = vadd.f32 %v6587_v51, %v691_v59  ;;  %v1654_v51 = vld [vmem:[%s9312_s6 + $0x100] sm:$0xff] }
 0x132   : > { %v911_v39 = vpop.f32.mrf.mxu1  ;;  %v863_v44 = vadd.f32 %v862_v38, %v726_v9  ;;  %v960_v29 = vpack.c.bf16 %v942_v19, %v940_v15 }
 0x133   : > { %v912_v50 = vadd.f32 %v911_v39, %v726_v9  ;;  %v855_v9 = vadd.f32 %v854_v7, %v711_v40  ;;  %v897_v7 = vadd.f32 %v6602_v57, %v696_v35  ;;  %v939_v38 = vmax.f32 %v904_v23, 0.0 }
 0x134   : > { %v944_v4 = vmax.f32 %v863_v44, 0.0  ;;  %v848_v40 = vadd.f32 %v6600_v56, %v696_v35  ;;  %v666_v44 = vpop.permute.xlu0 %665  ;;  %v892_v57 = vadd.f32 %v6576_v47, %v686_v6  ;;  %v1640_v56 = vld [vmem:[%s9312_s6 + $0x90] sm:$0xff]  ;;  %v843_v35 = vadd.f32 %v6574_v46, %v686_v6  ;;  %v1641_v47 = vld [vmem:[%s9312_s6 + $0x98] sm:$0xff] }
 0x135   : > { %v945_v10 = vmax.f32 %v912_v50, 0.0  ;;  %v938_v28 = vmax.f32 %v855_v9, 0.0  ;;  %v681_v50 = vpop.permute.xlu2 %680  ;;  %v933_v49 = vmax.f32 %v897_v7, 0.0  ;;  %v959_v54 = vpack.c.bf16 %v939_v38, %v937_v24 }
 0x136   : > { %v930_v59 = vmax.f32 %v845_v61, 0.0  ;;  %v889_v46 = vadd.f32 %v6563_v42, %v681_v50  ;;  %v833_v23 = vadd.f32 %v6522_v26, %v666_v44  ;;  %v3288_v61 = vld [vmem:[%s9314_s8 + $0xf0] sm:$0xff] }
 0x138   : > { %1953 = vperm.xlu0 %6003, %v1675_v30   ;;  %1788 = vperm.xlu1 %6004, %v1642_v33   ;;  %v943_v30 = vmax.f32 %v909_v63, 0.0  ;;  %v929_v63 = vmax.f32 %v892_v57, 0.0  ;;  %v927_v19 = vmax.f32 %v889_v46, 0.0  ;;  %v3273_v57 = vld [vmem:[%s9314_s8 + $0x78] sm:$0xff] }
 0x139   : > { %1793 = vperm.xlu2 %6005, %v1643_v34   ;;  %v864_v53 = vpop.f32.mrf.mxu0  ;;  %v676_v34 = vpop.permute.xlu1 %675  ;;  %v5800_v46 = vld [vmem:[%s9309_s3 + $0x18] sm:$0xff] }
 0x13a   : > { %v865_v55 = vadd.f32 %v864_v53, %v731_v18  ;;  %v913_v58 = vpop.f32.mrf.mxu1  ;;  %v961_v39 = vpack.c.bf16 %v943_v30, %v941_v25  ;;  %v935_v53 = vmax.f32 %v899_v2, 0.0  ;;  %v887_v52 = vadd.f32 %v6550_v37, %v676_v34  ;;  %v1670_v2 = vld [vmem:[%s9312_s6 + $0x180] sm:$0xff] }
 0x13b   : > { %v914_v0 = vadd.f32 %v913_v58, %v731_v18  ;;  %v1672_v18 = vld [vmem:[%s9312_s6 + $0x190] sm:$0xff]  ;;  %v840_v58 = vadd.f32 %v6561_v41, %v681_v50  ;;  %v882_v37 = vadd.f32 %v6524_v27, %v666_v44  ;;  %v1622_v27 = vld [vmem:[%s9312_s6] sm:$0xff]  ;;  %v5798_v50 = vld [vmem:[%s9309_s3 + $0x8] sm:$0xff] }
 0x13c   : > { %v946_v5 = vmax.f32 %v865_v55, 0.0  ;;  %v932_v55 = vmax.f32 %v848_v40, 0.0  ;;  %v957_v1 = vpack.c.bf16 %v935_v53, %v933_v49  ;;  %v661_v12 = vpop.permute.xlu0 %660  ;;  %v925_v9 = vmax.f32 %v887_v52, 0.0  ;;  %v5797_v40 = vld [vmem:[%s9309_s3] sm:$0xff]  ;;  %v3272_v44 = vld [vmem:[%s9314_s8 + $0x70] sm:$0xff]  ;;  %v3287_v53 = vld [vmem:[%s9314_s8 + $0xe8] sm:$0xff] }
 0x13d   : > { %v947_v11 = vmax.f32 %v914_v0, 0.0  ;;  %v931_v0 = vmax.f32 %v894_v62, 0.0  ;;  %v921_v26 = vmax.f32 %v882_v37, 0.0  ;;  %v879_v15 = vadd.f32 %v6511_v22, %v661_v12  ;;  %v1671_v22 = vld [vmem:[%s9312_s6 + $0x188] sm:$0xff]  ;;  %v3286_v49 = vld [vmem:[%s9314_s8 + $0xe0] sm:$0xff] }
 0x13e   : > { %v962_v20 = vpack.c.bf16 %v946_v5, %v944_v4  ;;  %v838_v4 = vadd.f32 %v6548_v36, %v676_v34  ;;  %v928_v5 = vmax.f32 %v843_v35, 0.0  ;;  %v1655_v36 = vld [vmem:[%s9312_s6 + $0x108] sm:$0xff]  ;;  %v3284_v35 = vld [vmem:[%s9314_s8 + $0xd0] sm:$0xff] }
 0x13f   : > { %v963_v33 = vpack.c.bf16 %v947_v11, %v945_v10  ;;  %v926_v10 = vmax.f32 %v840_v58, 0.0  ;;  %v919_v34 = vmax.f32 %v879_v15, 0.0  ;;  %v3271_v62 = vld [vmem:[%s9314_s8 + $0x68] sm:$0xff]  ;;  %v3282_v58 = vld [vmem:[%s9314_s8 + $0xc0] sm:$0xff] }
 0x140   : > { %1858 = vperm.xlu0 %6003, %v1656_v43   ;;  %1863 = vperm.xlu1 %6004, %v1657_v45   ;;  %v936_v43 = vmax.f32 %v853_v13, 0.0  ;;  %v934_v45 = vmax.f32 %v850_v8, 0.0  ;;  %v954_v11 = vpack.c.bf16 %v930_v59, %v928_v5  ;;  %v924_v25 = vmax.f32 %v838_v4, 0.0  ;;  %v3267_v52 = vld [vmem:[%s9314_s8 + $0x48] sm:$0xff]  ;;  %v3280_v4 = vld [vmem:[%s9314_s8 + $0xb0] sm:$0xff]  ;;  %v3281_v5 = vld [vmem:[%s9314_s8 + $0xb8] sm:$0xff] }
 0x141   : > { %1698 = vperm.xlu2 %6005, %v1624_v48   ;;  %1284 = vmatpush.bf16.msra.mxu2 %v962_v20  ;;  %v671_v6 = vpop.permute.xlu1 %670  ;;  %v955_v20 = vpack.c.bf16 %v931_v0, %v929_v63  ;;  %v920_v8 = vmax.f32 %v833_v23, 0.0  ;;  %v3283_v59 = vld [vmem:[%s9314_s8 + $0xc8] sm:$0xff]  ;;  %v3265_v0 = vld [vmem:[%s9314_s8 + $0x38] sm:$0xff]  ;;  %v3276_v23 = vld [vmem:[%s9314_s8 + $0x90] sm:$0xff] }
 0x142   : > { %1373 = vmatpush.bf16.msra.mxu3 %v963_v33  ;;  %v958_v48 = vpack.c.bf16 %v938_v28, %v936_v43  ;;  %v956_v60 = vpack.c.bf16 %v934_v45, %v932_v55  ;;  %v835_v41 = vadd.f32 %v6535_v31, %v671_v6  ;;  %v884_v42 = vadd.f32 %v6537_v32, %v671_v6  ;;  %v1623_v31 = vld [vmem:[%s9312_s6 + $0x8] sm:$0xff]  ;;  %v656_v32 = vpop.permute.xlu2 %655  ;;  %v3289_v45 = vld [vmem:[%s9314_s8 + $0xf8] sm:$0xff]  ;;  %v5799_v55 = vld [vmem:[%s9309_s3 + $0x10] sm:$0xff] }
 0x143   : > { %v877_v30 = vadd.f32 %v6498_v17, %v656_v32  ;;  %v830_v33 = vadd.f32 %v6509_v21, %v661_v12  ;;  %v952_v13 = vpack.c.bf16 %v926_v10, %v924_v25  ;;  %v828_v7 = vadd.f32 %v6496_v16, %v656_v32  ;;  %v1638_v16 = vld [vmem:[%s9312_s6 + $0x80] sm:$0xff]  ;;  %v1639_v43 = vld [vmem:[%s9312_s6 + $0x88] sm:$0xff] }
 0x144   : > { %v3262_v6 = vld [vmem:[%s9314_s8 + $0x20] sm:$0xff]  ;;  %v5802_v32 = vld [vmem:[%s9309_s3 + $0x28] sm:$0xff] }
 0x145   : > { %1285 = vmatpush.bf16.msra.mxu2 %v960_v29  ;;  %v918_v28 = vmax.f32 %v830_v33, 0.0  ;;  %v917_v17 = vmax.f32 %v877_v30, 0.0  ;;  %v916_v24 = vmax.f32 %v828_v7, 0.0  ;;  %v3278_v10 = vld [vmem:[%s9314_s8 + $0xa0] sm:$0xff] }
 0x146   : > { %1374 = vmatpush.bf16.msra.mxu3 %v961_v39  ;;  %v5801_v12 = vld [vmem:[%s9309_s3 + $0x20] sm:$0xff] }
 0x147   : > { %v948_v38 = vpack.c.bf16 %v918_v28, %v916_v24  ;;  %v949_v39 = vpack.c.bf16 %v919_v34, %v917_v17  ;;  %v4590_v28 = vld [vmem:[%s9316_s10 + $0x20] sm:$0xff]  ;;  %v4591_v34 = vld [vmem:[%s9316_s10 + $0x28] sm:$0xff]  ;;  %v4589_v24 = vld [vmem:[%s9316_s10 + $0x18] sm:$0xff] }
 0x148   : > { %1703 = vperm.xlu0 %6003, %v1625_v14   ;;  %1938 = vperm.xlu1 %6004, %v1672_v18   ;;  %v922_v14 = vmax.f32 %v835_v41, 0.0  ;;  %v923_v18 = vmax.f32 %v884_v42, 0.0  ;;  %v3263_v41 = vld [vmem:[%s9314_s8 + $0x28] sm:$0xff] }
 0x149   : > { %1943 = vperm.xlu2 %6005, %v1673_v3   ;;  %1286 = vmatpush.bf16.msra.mxu2 %v958_v48  ;;  %v953_v3 = vpack.c.bf16 %v927_v19, %v925_v9  ;;  %v3270_v48 = vld [vmem:[%s9314_s8 + $0x60] sm:$0xff]  ;;  %v3279_v42 = vld [vmem:[%s9314_s8 + $0xa8] sm:$0xff]  ;;  %v3260_v9 = vld [vmem:[%s9314_s8 + $0x10] sm:$0xff]  ;;  %v6844_v25 = vpop.permute.xlu1 %1100 }
 0x14a   : > { %1375 = vmatpush.bf16.msra.mxu3 %v959_v54  ;;  %v950_v29 = vpack.c.bf16 %v922_v14, %v920_v8  ;;  %v951_v21 = vpack.c.bf16 %v923_v18, %v921_v26  ;;  %v3268_v54 = vld [vmem:[%s9314_s8 + $0x50] sm:$0xff]  ;;  %v6799_v63 = vpop.permute.xlu2 %1105  ;;  %v3261_v19 = vld [vmem:[%s9314_s8 + $0x18] sm:$0xff]  ;;  %v3259_v14 = vld [vmem:[%s9314_s8 + $0x8] sm:$0xff] }
 0x14b   : > { %v3275_v26 = vld [vmem:[%s9314_s8 + $0x88] sm:$0xff]  ;;  %v4593_v8 = vld [vmem:[%s9316_s10 + $0x38] sm:$0xff] }
 0x14d   : > { %1287 = vmatpush.bf16.msra.mxu2 %v956_v60  ;;  %v3264_v60 = vld [vmem:[%s9314_s8 + $0x30] sm:$0xff] }
 0x14e   : > { %1376 = vmatpush.bf16.msra.mxu3 %v957_v1  ;;  %v6804_v1 = vpop.permute.xlu0 %1180 }
 0x150   : > { %1778 = vperm.xlu0 %6003, %v1640_v56   ;;  %1783 = vperm.xlu1 %6004, %v1641_v47   ;;  %v3269_v56 = vld [vmem:[%s9314_s8 + $0x58] sm:$0xff] }
 0x151   : > { %1848 = vperm.xlu2 %6005, %v1654_v51   ;;  %1288 = vmatpush.bf16.msra.mxu2 %v954_v11  ;;  %v3285_v47 = vld [vmem:[%s9314_s8 + $0xd8] sm:$0xff]  ;;  %v3266_v51 = vld [vmem:[%s9314_s8 + $0x40] sm:$0xff]  ;;  %v6868_v15 = vpop.permute.xlu1 %1185 }
 0x152   : > { %1377 = vmatpush.bf16.msra.mxu3 %v955_v20  ;;  %v6815_v37 = vpop.permute.xlu2 %1090 }
 0x155   : > { %1289 = vmatpush.bf16.msra.mxu2 %v952_v13  ;;  %v3274_v13 = vld [vmem:[%s9314_s8 + $0x80] sm:$0xff] }
 0x156   : > { %1378 = vmatpush.bf16.msra.mxu3 %v953_v3  ;;  %v6823_v11 = vpop.permute.xlu0 %1095  ;;  %v4592_v3 = vld [vmem:[%s9316_s10 + $0x30] sm:$0xff] }
 0x158   : > { %1853 = vperm.xlu0 %6003, %v1655_v36   ;;  %1688 = vperm.xlu1 %6004, %v1622_v27   ;;  %v3277_v27 = vld [vmem:[%s9314_s8 + $0x98] sm:$0xff] }
 0x159   : > { %1693 = vperm.xlu2 %6005, %v1623_v31   ;;  %1290 = vmatpush.bf16.msra.mxu2 %v950_v29  ;;  %v3258_v31 = vld [vmem:[%s9314_s8] sm:$0xff]  ;;  %v5803_v29 = vld [vmem:[%s9309_s3 + $0x30] sm:$0xff]  ;;  %v6886_v17 = vpop.permute.xlu1 %1170 }
 0x15a   : > { %1379 = vmatpush.bf16.msra.mxu3 %v951_v21  ;;  %v6837_v20 = vpop.permute.xlu2 %1175 }
 0x15d   : > { %1291 = vmatpush.bf16.msra.mxu2 %v948_v38  ;;  %v4586_v38 = vld [vmem:[%s9316_s10] sm:$0xff] }
 0x15e   : > { %1380 = vmatpush.bf16.msra.mxu3 %v949_v39  ;;  %v6839_v36 = vpop.permute.xlu0 %1080  ;;  %v4587_v39 = vld [vmem:[%s9316_s10 + $0x8] sm:$0xff] }
 0x160   : > { %1928 = vperm.xlu0 %6003, %v1670_v2   ;;  %1933 = vperm.xlu1 %6004, %v1671_v22   ;;  %v4588_v2 = vld [vmem:[%s9316_s10 + $0x10] sm:$0xff] }
 0x161   : > { %1768 = vperm.xlu2 %6005, %v1638_v16   ;;  %1292 = vmatmul.bf16.vlgmr.msra.gmra.mxu2 %v5797_v40  ;;  %v6901_v16 = vpop.permute.xlu1 %1085 }
 0x162   : > { %1381 = vmatmul.bf16.vlgmr.msra.gmra.mxu3 %v5797_v40  ;;  %v6855_v30 = vpop.permute.xlu2 %1160  ;;  %v4816_v40 = vld [vmem:[%s9318_s12] sm:$0xff] }
 0x166   : > { %v6857_v33 = vpop.permute.xlu0 %1165 }
 0x168   : > { %1773 = vperm.xlu0 %6003, %v1639_v43   ;;  %3362 = vperm.xlu1 %6004, %v3272_v44   ;;  %v5804_v44 = vld [vmem:[%s9309_s3 + $0x38] sm:$0xff] }
 0x169   : > { %3367 = vperm.xlu2 %6005, %v3273_v57  }
 0x16a   : > { %v6870_v18 = vpop.permute.xlu2 %1075 }
 0x16e   : > { %v6875_v7 = vpop.permute.xlu0 %1150 }
 0x170   : > { %3442 = vperm.xlu0 %6003, %v3288_v61   ;;  %3447 = vperm.xlu1 %6004, %v3289_v45   ;;  %v4817_v61 = vld [vmem:[%s9318_s12 + $0x8] sm:$0xff]  ;;  %v6920_v45 = vpop.permute.xlu1 %1070 }
 0x171   : > { %3352 = vperm.xlu2 %6005, %v3270_v48   ;;  %1297 = vmatmul.bf16.gmra.mxu2 %v5798_v50  ;;  %v4872_v48 = vld [vmem:[%s9320_s14] sm:$0xf] }
 0x172   : > { %1386 = vmatmul.bf16.gmra.mxu3 %v5798_v50  ;;  %v6891_v21 = vpop.permute.xlu2 %1060  ;;  %v4913_v50 = vld [vmem:[%s9321_s15] sm:$0xf] }
 0x176   : > { %v6899_v22 = vpop.permute.xlu0 %1065 }
 0x178   : > { %3357 = vperm.xlu0 %6003, %v3271_v62   ;;  %3432 = vperm.xlu1 %6004, %v3286_v49  }
 0x179   : > { %3437 = vperm.xlu2 %6005, %v3287_v53   ;;  %v4936_v53 = vld [vmem:[#allocation2] sm:$0x1] }
 0x17a   : > { %v6912_v43 = vpop.permute.xlu2 %1145 }
 0x17e   : > { %v1051_v57 = vpop.permute.xlu0 %1050 }
 0x180   : > { %3342 = vperm.xlu0 %6003, %v3268_v54   ;;  %3347 = vperm.xlu1 %6004, %v3269_v56   ;;  %v6932_v54 = vpop.permute.xlu1 %1155  ;;  %v5805_v56 = vld [vmem:[%s9309_s3 + $0x40] sm:$0xff] }
 0x181   : > { %3422 = vperm.xlu2 %6005, %v3284_v35   ;;  %1302 = vmatmul.bf16.gmra.mxu2 %v5799_v55 }
 0x182   : > { %1391 = vmatmul.bf16.gmra.mxu3 %v5799_v55  ;;  %v6928_v62 = vpop.permute.xlu2 %1130 }
 0x186   : > { %v6930_v49 = vpop.permute.xlu0 %1135 }
 0x188   : > { %3427 = vperm.xlu0 %6003, %v3285_v47   ;;  %3332 = vperm.xlu1 %6004, %v3266_v51  }
 0x189   : > { %3337 = vperm.xlu2 %6005, %v3267_v52   ;;  %v6939_v52 = vpop.permute.xlu1 %1140 }
 0x18a   : > { %v1046_v35 = vpop.permute.xlu2 %1045 }
 0x18e   : > { %v6937_v55 = vpop.permute.xlu0 %1120 }
 0x190   : > { %3412 = vperm.xlu0 %6003, %v3282_v58   ;;  %3417 = vperm.xlu1 %6004, %v3283_v59  }
 0x191   : > { %3322 = vperm.xlu2 %6005, %v3264_v60   ;;  %1307 = vmatmul.bf16.gmra.mxu2 %v5800_v46 }
 0x192   : > { %1396 = vmatmul.bf16.gmra.mxu3 %v5800_v46  ;;  %v1031_v58 = vpop.permute.xlu2 %1030 }
 0x196   : > { %v1036_v60 = vpop.permute.xlu0 %1035 }
 0x198   : > { %3327 = vperm.xlu0 %6003, %v3265_v0   ;;  %3402 = vperm.xlu1 %6004, %v3280_v4  }
 0x199   : > { %3407 = vperm.xlu2 %6005, %v3281_v5  }
 0x1a0   : > { %3312 = vperm.xlu0 %6003, %v3262_v6   ;;  %3317 = vperm.xlu1 %6004, %v3263_v41   ;;  %v5806_v6 = vld [vmem:[%s9309_s3 + $0x48] sm:$0xff] }
 0x1a1   : > { %3392 = vperm.xlu2 %6005, %v3278_v10   ;;  %1312 = vmatmul.bf16.gmra.mxu2 %v5801_v12 }
 0x1a2   : > { %1401 = vmatmul.bf16.gmra.mxu3 %v5801_v12 }
 0x1a8   : > { %3397 = vperm.xlu0 %6003, %v3279_v42   ;;  %3302 = vperm.xlu1 %6004, %v3260_v9   ;;  %v1056_v42 = vpop.permute.xlu1 %1055 }
 0x1a9   : > { %3307 = vperm.xlu2 %6005, %v3261_v19  }
 0x1b0   : > { %3382 = vperm.xlu0 %6003, %v3276_v23   ;;  %3387 = vperm.xlu1 %6004, %v3277_v27  }
 0x1b1   : > { %3292 = vperm.xlu2 %6005, %v3258_v31   ;;  %1317 = vmatmul.bf16.gmra.mxu2 %v5802_v32 }
 0x1b2   : > { %1406 = vmatmul.bf16.gmra.mxu3 %v5802_v32 }
 0x1b8   : > { %3297 = vperm.xlu0 %6003, %v3259_v14   ;;  %3372 = vperm.xlu1 %6004, %v3274_v13   ;;  %v1041_v14 = vpop.permute.xlu1 %1040 }
 0x1b9   : > { %3377 = vperm.xlu2 %6005, %v3275_v26  }
 0x1c0   : > { %4626 = vperm.xlu0 %6003, %v4592_v3   ;;  %4631 = vperm.xlu1 %6004, %v4593_v8  }
 0x1c1   : > { %4616 = vperm.xlu2 %6005, %v4590_v28   ;;  %1322 = vmatmul.bf16.gmra.mxu2 %v5803_v29 }
 0x1c2   : > { %1411 = vmatmul.bf16.gmra.mxu3 %v5803_v29  ;;  %v5807_v29 = vld [vmem:[%s9309_s3 + $0x50] sm:$0xff] }
 0x1c8   : > { %4621 = vperm.xlu0 %6003, %v4591_v34   ;;  %4606 = vperm.xlu1 %6004, %v4588_v2  }
 0x1c9   : > { %4611 = vperm.xlu2 %6005, %v4589_v24  }
 0x1d0   : > { %4596 = vperm.xlu0 %6003, %v4586_v38   ;;  %4601 = vperm.xlu1 %6004, %v4587_v39  }
 0x1d1   : > { %4820 = vperm.xlu2 %6005, %v4816_v40   ;;  %1327 = vmatmul.bf16.gmra.mxu2 %v5804_v44 }
 0x1d2   : > { %1416 = vmatmul.bf16.gmra.mxu3 %v5804_v44 }
 0x1d8   : > { %4825 = vperm.xlu0 %6003, %v4817_v61   ;;  %4875 = vperm.xlu1 %6004, %v4872_v48  }
 0x1d9   : > { %4916 = vperm.xlu2 %6005, %v4913_v50  }
 0x1e0   : > { %4939 = vperm.xlu0 %6003, %v4936_v53  }
 0x1e1   : > { %1332 = vmatmul.bf16.gmra.mxu2 %v5805_v56 }
 0x1e2   : > { %1421 = vmatmul.bf16.gmra.mxu3 %v5805_v56 }
 0x1e4   : > { %v1293_v47 = vpop.f32.mrf.mxu2 }
 0x1e5   : > { %v1382_v51 = vpop.f32.mrf.mxu3  ;;  %v1294_v59 = vadd.f32 %v1293_v47, %v1031_v58 }
 0x1e6   : > { %v1383_v46 = vadd.f32 %v1382_v51, %v1031_v58 }
 0x1e7   : > { %v1462_v10 = vmax.f32 %v1294_v59, 0.0 }
 0x1e8   : > { %v1463_v9 = vmax.f32 %v1383_v46, 0.0 }
 0x1ec   : > { %v1295_v0 = vpop.f32.mrf.mxu2 }
 0x1ed   : > { %v1296_v4 = vadd.f32 %v1295_v0, %v1036_v60  ;;  %v1384_v5 = vpop.f32.mrf.mxu3 }
 0x1ee   : > { %v1385_v41 = vadd.f32 %v1384_v5, %v1036_v60 }
 0x1ef   : > { %v1464_v12 = vmax.f32 %v1296_v4, 0.0 }
 0x1f0   : > { %v1465_v19 = vmax.f32 %v1385_v41, 0.0 }
 0x1f1   : > { %1337 = vmatmul.bf16.gmra.mxu2 %v5806_v6  ;;  %v6944_v23 = vpack.c.bf16 %v1464_v12, %v1462_v10 }
 0x1f2   : > { %1426 = vmatmul.bf16.gmra.mxu3 %v5806_v6  ;;  %v6946_v27 = vpack.c.bf16 %v1465_v19, %v1463_v9  ;;  %v5809_v19 = vld [vmem:[%s9309_s3 + $0x60] sm:$0xff] }
 0x1f4   : > { %v1298_v31 = vpop.f32.mrf.mxu2 }
 0x1f5   : > { %v1387_v32 = vpop.f32.mrf.mxu3  ;;  %v1299_v13 = vadd.f32 %v1298_v31, %v1041_v14 }
 0x1f6   : > { %v1388_v26 = vadd.f32 %v1387_v32, %v1041_v14 }
 0x1f7   : > { %v1466_v2 = vmax.f32 %v1299_v13, 0.0 }
 0x1f8   : > { %v1467_v38 = vmax.f32 %v1388_v26, 0.0 }
 0x1fc   : > { %v1300_v3 = vpop.f32.mrf.mxu2 }
 0x1fd   : > { %v1301_v8 = vadd.f32 %v1300_v3, %v1046_v35  ;;  %v1389_v28 = vpop.f32.mrf.mxu3 }
 0x1fe   : > { %v1390_v34 = vadd.f32 %v1389_v28, %v1046_v35  ;;  %v5808_v35 = vld [vmem:[%s9309_s3 + $0x58] sm:$0xff] }
 0x1ff   : > { %v1468_v24 = vmax.f32 %v1301_v8, 0.0 }
 0x200   : > { %v1469_v39 = vmax.f32 %v1390_v34, 0.0 }
 0x201   : > { %1342 = vmatmul.bf16.gmra.mxu2 %v5807_v29  ;;  %v6951_v40 = vpack.c.bf16 %v1468_v24, %v1466_v2  ;;  %v5810_v2 = vld [vmem:[%s9309_s3 + $0x68] sm:$0xff] }
 0x202   : > { %1431 = vmatmul.bf16.gmra.mxu3 %v5807_v29  ;;  %v6953_v44 = vpack.c.bf16 %v1469_v39, %v1467_v38 }
 0x204   : > { %v1303_v61 = vpop.f32.mrf.mxu2 }
 0x205   : > { %v1392_v48 = vpop.f32.mrf.mxu3  ;;  %v1304_v50 = vadd.f32 %v1303_v61, %v1051_v57  ;;  %v5811_v61 = vld [vmem:[%s9309_s3 + $0x70] sm:$0xff] }
 0x206   : > { %v1393_v53 = vadd.f32 %v1392_v48, %v1051_v57 }
 0x207   : > { %v1470_v59 = vmax.f32 %v1304_v50, 0.0 }
 0x208   : > { %v1471_v46 = vmax.f32 %v1393_v53, 0.0 }
 0x20c   : > { %v1305_v56 = vpop.f32.mrf.mxu2 }
 0x20d   : > { %v1306_v47 = vadd.f32 %v1305_v56, %v1056_v42  ;;  %v1394_v51 = vpop.f32.mrf.mxu3 }
 0x20e   : > { %v1395_v58 = vadd.f32 %v1394_v51, %v1056_v42 }
 0x20f   : > { %v1472_v60 = vmax.f32 %v1306_v47, 0.0  ;;  %v5812_v47 = vld [vmem:[%s9309_s3 + $0x78] sm:$0xff] }
 0x210   : > { %v1473_v0 = vmax.f32 %v1395_v58, 0.0 }
 0x211   : > { %1347 = vmatmul.bf16.gmra.mxu2 %v5808_v35  ;;  %v6958_v4 = vpack.c.bf16 %v1472_v60, %v1470_v59 }
 0x212   : > { %1436 = vmatmul.bf16.gmra.mxu3 %v5808_v35  ;;  %v6960_v5 = vpack.c.bf16 %v1473_v0, %v1471_v46 }
 0x214   : > { %v1308_v6 = vpop.f32.mrf.mxu2 }
 0x215   : > { %v1397_v57 = vpop.f32.mrf.mxu3  ;;  %v1309_v41 = vadd.f32 %v1308_v6, %v6891_v21 }
 0x216   : > { %v1398_v10 = vadd.f32 %v1397_v57, %v6891_v21 }
 0x217   : > { %v1474_v32 = vmax.f32 %v1309_v41, 0.0 }
 0x218   : > { %v1475_v13 = vmax.f32 %v1398_v10, 0.0 }
 0x21c   : > { %v1310_v12 = vpop.f32.mrf.mxu2 }
 0x21d   : > { %v1311_v9 = vadd.f32 %v1310_v12, %v6899_v22  ;;  %v1399_v42 = vpop.f32.mrf.mxu3 }
 0x21e   : > { %v1400_v31 = vadd.f32 %v1399_v42, %v6899_v22 }
 0x21f   : > { %v1476_v14 = vmax.f32 %v1311_v9, 0.0 }
 0x220   : > { %v1477_v26 = vmax.f32 %v1400_v31, 0.0 }
 0x221   : > { %1352 = vmatmul.bf16.gmra.mxu2 %v5809_v19  ;;  %v6969_v3 = vpack.c.bf16 %v1476_v14, %v1474_v32 }
 0x222   : > { %1441 = vmatmul.bf16.gmra.mxu3 %v5809_v19  ;;  %v6971_v8 = vpack.c.bf16 %v1477_v26, %v1475_v13 }
 0x224   : > { %v1313_v21 = vpop.f32.mrf.mxu2 }
 0x225   : > { %v1402_v28 = vpop.f32.mrf.mxu3 }
 0x22c   : > { %v1315_v29 = vpop.f32.mrf.mxu2 }
 0x22d   : > { %v1404_v34 = vpop.f32.mrf.mxu3 }
 0x231   : > { %1357 = vmatmul.bf16.gmra.mxu2 %v5810_v2 }
 0x232   : > { %1446 = vmatmul.bf16.gmra.mxu3 %v5810_v2 }
 0x234   : > { %v1318_v22 = vpop.f32.mrf.mxu2 }
 0x235   : > { %v1407_v24 = vpop.f32.mrf.mxu3 }
 0x23c   : > { %v1320_v38 = vpop.f32.mrf.mxu2 }
 0x23d   : > { %v1409_v39 = vpop.f32.mrf.mxu3 }
 0x23e   : > { %v1410_v13 = vadd.f32 %v1409_v39, %v6901_v16 }
 0x240   : > { %v1485_v39 = vmax.f32 %v1410_v13, 0.0 }
 0x241   : > { %1362 = vmatmul.bf16.gmra.mxu2 %v5811_v61 }
 0x242   : > { %1451 = vmatmul.bf16.gmra.mxu3 %v5811_v61 }
 0x244   : > { %v1323_v48 = vpop.f32.mrf.mxu2 }
 0x245   : > { %v1412_v50 = vpop.f32.mrf.mxu3  ;;  %v1324_v10 = vadd.f32 %v1323_v48, %v6815_v37 }
 0x246   : > { %v1413_v42 = vadd.f32 %v1412_v50, %v6815_v37  ;;  %v1316_v37 = vadd.f32 %v1315_v29, %v6870_v18 }
 0x247   : > { %v1486_v61 = vmax.f32 %v1324_v10, 0.0 }
 0x248   : > { %v1487_v48 = vmax.f32 %v1413_v42, 0.0  ;;  %v5244_v42 = vld [vmem:[%s9311_s5 + $0x20] sm:$0xf] }
 0x24c   : > { %v1325_v53 = vpop.f32.mrf.mxu2 }
 0x24d   : > { %v1414_v56 = vpop.f32.mrf.mxu3  ;;  %v1326_v46 = vadd.f32 %v1325_v53, %v6823_v11 }
 0x24e   : > { %v1415_v57 = vadd.f32 %v1414_v56, %v6823_v11  ;;  %v1319_v11 = vadd.f32 %v1318_v22, %v6839_v36  ;;  %v1314_v22 = vadd.f32 %v1313_v21, %v6920_v45 }
 0x24f   : > { %v1488_v32 = vmax.f32 %v1326_v46, 0.0 }
 0x250   : > { %v1489_v26 = vmax.f32 %v1415_v57, 0.0 }
 0x251   : > { %1367 = vmatmul.bf16.gmra.mxu2 %v5812_v47  ;;  %v1538_v56 = vpack.c.bf16 %v1488_v32, %v1486_v61 }
 0x252   : > { %1456 = vmatmul.bf16.gmra.mxu3 %v5812_v47  ;;  %v1539_v47 = vpack.c.bf16 %v1489_v26, %v1487_v48  ;;  %v7060_v26 = vpop.permute.xlu1 %1125 }
 0x254   : > { %v1328_v51 = vpop.f32.mrf.mxu2 }
 0x255   : > { %v1417_v35 = vpop.f32.mrf.mxu3  ;;  %v1329_v58 = vadd.f32 %v1328_v51, %v6844_v25  ;;  %v1482_v51 = vmax.f32 %v1319_v11, 0.0  ;;  %v5820_v11 = vld [vmem:[%s9311_s5 + $0x34] sm:$0xf0] }
 0x256   : > { %v1418_v59 = vadd.f32 %v1417_v35, %v6844_v25  ;;  %v1321_v25 = vadd.f32 %v1320_v38, %v6901_v16  ;;  %v1405_v16 = vadd.f32 %v1404_v34, %v6870_v18  ;;  %v1480_v35 = vmax.f32 %v1316_v37, 0.0 }
 0x257   : > { %v1490_v12 = vmax.f32 %v1329_v58, 0.0 }
 0x258   : > { %v1491_v19 = vmax.f32 %v1418_v59, 0.0  ;;  %v1484_v50 = vmax.f32 %v1321_v25, 0.0  ;;  %v1481_v59 = vmax.f32 %v1405_v16, 0.0  ;;  %v5260_v16 = vld [vmem:[%s9311_s5 + $0x40] sm:$0xf] }
 0x25a   : > { %v1536_v58 = vpack.c.bf16 %v1484_v50, %v1482_v51  ;;  %v7072_v50 = vpop.permute.xlu1 %1110 }
 0x25c   : > { %v1330_v60 = vpop.f32.mrf.mxu2 }
 0x25d   : > { %v1331_v0 = vadd.f32 %v1330_v60, %v6799_v63  ;;  %v1419_v6 = vpop.f32.mrf.mxu3  ;;  %v1478_v60 = vmax.f32 %v1314_v22, 0.0  ;;  %v7080_v22 = vpop.permute.xlu2 %1115 }
 0x25e   : > { %v1420_v41 = vadd.f32 %v1419_v6, %v6799_v63  ;;  %v1408_v63 = vadd.f32 %v1407_v24, %v6839_v36  ;;  %v1403_v36 = vadd.f32 %v1402_v28, %v6920_v45  ;;  %v5228_v6 = vld [vmem:[%s9311_s5] sm:$0xf] }
 0x25f   : > { %v1492_v9 = vmax.f32 %v1331_v0, 0.0  ;;  %v1534_v34 = vpack.c.bf16 %v1480_v35, %v1478_v60  ;;  %v5268_v60 = vld [vmem:[%s9311_s5 + $0x50] sm:$0xf] }
 0x260   : > { %v1493_v31 = vmax.f32 %v1420_v41, 0.0  ;;  %v1483_v24 = vmax.f32 %v1408_v63, 0.0  ;;  %v1479_v46 = vmax.f32 %v1403_v36, 0.0 }
 0x261   : > { %v1540_v14 = vpack.c.bf16 %v1492_v9, %v1490_v12 }
 0x262   : > { %v1541_v2 = vpack.c.bf16 %v1493_v31, %v1491_v19  ;;  %v1537_v29 = vpack.c.bf16 %v1485_v39, %v1483_v24  ;;  %v1535_v21 = vpack.c.bf16 %v1481_v59, %v1479_v46  ;;  %v5818_v19 = vld [vmem:[%s9311_s5 + $0x24] sm:$0xf0]  ;;  %v7082_v24 = vpop.permute.xlu1 %1923  ;;  %v5824_v46 = vld [vmem:[%s9311_s5 + $0x54] sm:$0xf0] }
 0x263   : > { %2326 = vmatpush.bf16.msrb.mxu0 %v1540_v14  ;;  %v5245_v32 = vor.u32 %v5818_v19, %v5244_v42  ;;  %v5822_v39 = vld [vmem:[%s9311_s5 + $0x44] sm:$0xf0]  ;;  %9481 = vst [vmem:[#allocation15_spill] sm:$0xff] %v7082_v24  ;;  %v5276_v19 = vld [vmem:[%s9311_s5 + $0x60] sm:$0xf] }
 0x264   : > { %2664 = vmatpush.bf16.msrb.mxu2 %v1541_v2  ;;  %v6994_v53 = vpop.f32.mrf.mxu2  ;;  %v5252_v2 = vld [vmem:[%s9311_s5 + $0x30] sm:$0xf]  ;;  %v5261_v36 = vor.u32 %v5822_v39, %v5260_v16 }
 0x265   : > { %v6997_v38 = vpop.f32.mrf.mxu3  ;;  %v5253_v48 = vor.u32 %v5820_v11, %v5252_v2  ;;  %v7084_v59 = vpop.permute.xlu2 %1758 }
 0x266   : > { %9482 = vst [vmem:[#allocation16_spill] sm:$0xff] %v7084_v59 }
 0x267   : > { %2327 = vmatpush.bf16.msrb.mxu0 %v1538_v56 }
 0x268   : > { %2665 = vmatpush.bf16.msrb.mxu2 %v1539_v47 }
 0x26b   : > { %2328 = vmatpush.bf16.msrb.mxu0 %v1536_v58 }
 0x26c   : > { %2666 = vmatpush.bf16.msrb.mxu2 %v1537_v29  ;;  %v7002_v0 = vpop.f32.mrf.mxu2  ;;  %v7086_v29 = vpop.permute.xlu1 %1998 }
 0x26d   : > { %v7004_v18 = vpop.f32.mrf.mxu3  ;;  %9483 = vst [vmem:[#allocation17_spill] sm:$0xff] %v7086_v29 }
 0x26f   : > { %2329 = vmatpush.bf16.msrb.mxu0 %v1534_v34 }
 0x270   : > { %2667 = vmatpush.bf16.msrb.mxu2 %v1535_v21 }
 0x273   : > { %2330 = vmatpush.bf16.msrb.mxu0 %v6969_v3  ;;  %v5814_v3 = vld [vmem:[%s9311_s5 + $0x4] sm:$0xf0] }
 0x274   : > { %2668 = vmatpush.bf16.msrb.mxu2 %v6971_v8  ;;  %v7008_v45 = vpop.f32.mrf.mxu2  ;;  %v5229_v41 = vor.u32 %v5814_v3, %v5228_v6  ;;  %v5269_v6 = vor.u32 %v5824_v46, %v5268_v60  ;;  %v7094_v3 = vpop.permute.xlu2 %2003 }
 0x275   : > { %v7010_v28 = vpop.f32.mrf.mxu3  ;;  %9484 = vst [vmem:[#allocation18_spill] sm:$0xff] %v7094_v3 }
 0x277   : > { %2331 = vmatpush.bf16.msrb.mxu0 %v6958_v4 }
 0x278   : > { %2669 = vmatpush.bf16.msrb.mxu2 %v6960_v5  ;;  %v5236_v5 = vld [vmem:[%s9311_s5 + $0x10] sm:$0xf] }
 0x27b   : > { %2332 = vmatpush.bf16.msrb.mxu0 %v6951_v40 }
 0x27c   : > { %2670 = vmatpush.bf16.msrb.mxu2 %v6953_v44  ;;  %v7022_v8 = vpop.f32.mrf.mxu2  ;;  %v5816_v44 = vld [vmem:[%s9311_s5 + $0x14] sm:$0xf0] }
 0x27d   : > { %v7024_v57 = vpop.f32.mrf.mxu3 }
 0x27f   : > { %2333 = vmatpush.bf16.msrb.mxu0 %v6944_v23  ;;  %v5237_v23 = vor.u32 %v5816_v44, %v5236_v5 }
 0x280   : > { %2671 = vmatpush.bf16.msrb.mxu2 %v6946_v27 }
 0x282   : > { %2334 = vmatmul.bf16.vlgmr.msrb.gmra.mxu0 %v5229_v41 }
 0x283   : > { %2672 = vmatmul.bf16.vlgmr.msrb.gmra.mxu2 %v5229_v41  ;;  %v7096_v41 = vpop.permute.xlu1 %1843 }
 0x284   : > { %v7028_v40 = vpop.f32.mrf.mxu2  ;;  %9485 = vst [vmem:[#allocation19_spill] sm:$0xff] %v7096_v41 }
 0x285   : > { %v7030_v4 = vpop.f32.mrf.mxu3 }
 0x28c   : > { %v7038_v10 = vpop.f32.mrf.mxu2 }
 0x28d   : > { %v7040_v12 = vpop.f32.mrf.mxu3 }
 0x292   : > { %2339 = vmatmul.bf16.gmra.mxu0 %v5237_v23 }
 0x293   : > { %2677 = vmatmul.bf16.gmra.mxu2 %v5237_v23  ;;  %v7098_v23 = vpop.permute.xlu2 %1908 }
 0x294   : > { %v7042_v27 = vpop.f32.mrf.mxu2  ;;  %9486 = vst [vmem:[#allocation20_spill] sm:$0xff] %v7098_v23 }
 0x295   : > { %v7044_v9 = vpop.f32.mrf.mxu3 }
 0x29c   : > { %v7052_v31 = vpop.f32.mrf.mxu2 }
 0x29d   : > { %v7054_v25 = vpop.f32.mrf.mxu3 }
 0x2a2   : > { %2344 = vmatmul.bf16.gmra.mxu0 %v5245_v32 }
 0x2a3   : > { %2682 = vmatmul.bf16.gmra.mxu2 %v5245_v32  ;;  %v5826_v32 = vld [vmem:[%s9311_s5 + $0x64] sm:$0xf0] }
 0x2a4   : > { %v7056_v14 = vpop.f32.mrf.mxu2 }
 0x2a5   : > { %v7058_v13 = vpop.f32.mrf.mxu3 }
 0x2ac   : > { %v7068_v61 = vpop.f32.mrf.mxu2 }
 0x2ad   : > { %v7070_v63 = vpop.f32.mrf.mxu3 }
 0x2b2   : > { %2349 = vmatmul.bf16.gmra.mxu0 %v5253_v48 }
 0x2b3   : > { %2687 = vmatmul.bf16.gmra.mxu2 %v5253_v48  ;;  %v7108_v48 = vpop.permute.xlu1 %1748 }
 0x2b4   : > { %v1358_v37 = vpop.f32.mrf.mxu2 }
 0x2b5   : > { %v1447_v56 = vpop.f32.mrf.mxu3 }
 0x2bc   : > { %v1360_v47 = vpop.f32.mrf.mxu2 }
 0x2bd   : > { %v1449_v51 = vpop.f32.mrf.mxu3  ;;  %v1361_v23 = vadd.f32 %v1360_v47, %v6857_v33  ;;  %v1356_v47 = vadd.f32 %v7068_v61, %v6932_v54  ;;  %v1351_v61 = vadd.f32 %v7052_v31, %v6912_v43  ;;  %v5828_v31 = vld [vmem:[%s9311_s5 + $0x74] sm:$0xf0] }
 0x2c2   : > { %2354 = vmatmul.bf16.gmra.mxu0 %v5261_v36 }
 0x2c3   : > { %2692 = vmatmul.bf16.gmra.mxu2 %v5261_v36 }
 0x2c4   : > { %v1363_v35 = vpop.f32.mrf.mxu2 }
 0x2c5   : > { %v1452_v58 = vpop.f32.mrf.mxu3 }
 0x2c6   : > { %v1453_v24 = vadd.f32 %v1452_v58, %v6886_v17  ;;  %v1516_v58 = vmax.f32 %v1361_v23, 0.0 }
 0x2cc   : > { %v1365_v34 = vpop.f32.mrf.mxu2 }
 0x2cd   : > { %v1454_v21 = vpop.f32.mrf.mxu3  ;;  %v1366_v16 = vadd.f32 %v1365_v34, %v6837_v20 }
 0x2ce   : > { %v1455_v60 = vadd.f32 %v1454_v21, %v6837_v20 }
 0x2cf   : > { %v1520_v41 = vmax.f32 %v1366_v16, 0.0  ;;  %v1508_v16 = vmax.f32 %v1351_v61, 0.0 }
 0x2d0   : > { %v1521_v59 = vmax.f32 %v1455_v60, 0.0 }
 0x2d2   : > { %2359 = vmatmul.bf16.gmra.mxu0 %v5269_v6 }
 0x2d3   : > { %2697 = vmatmul.bf16.gmra.mxu2 %v5269_v6  ;;  %v5277_v6 = vor.u32 %v5826_v32, %v5276_v19  ;;  %v1354_v19 = vadd.f32 %v7056_v14, %v6875_v7  ;;  %v7136_v32 = vpop.permute.xlu0 %1918  ;;  %v1349_v14 = vadd.f32 %v7042_v27, %v6939_v52 }
 0x2d4   : > { %v1368_v5 = vpop.f32.mrf.mxu2  ;;  %9488 = vst [vmem:[#allocation22_spill] sm:$0xff] %v7136_v32 }
 0x2d5   : > { %v1457_v44 = vpop.f32.mrf.mxu3  ;;  %v1369_v42 = vadd.f32 %v1368_v5, %v6804_v1  ;;  %v1364_v5 = vadd.f32 %v1363_v35, %v6886_v17  ;;  %v1448_v35 = vadd.f32 %v1447_v56, %v6855_v30  ;;  %v7120_v17 = vpop.permute.xlu2 %1753  ;;  %v1443_v56 = vadd.f32 %v7058_v13, %v6875_v7  ;;  %v5284_v7 = vld [vmem:[%s9311_s5 + $0x70] sm:$0xf] }
 0x2d6   : > { %v1458_v2 = vadd.f32 %v1457_v44, %v6804_v1  ;;  %v1346_v13 = vadd.f32 %v7038_v10, %v6930_v49 }
 0x2d7   : > { %v1522_v3 = vmax.f32 %v1369_v42, 0.0  ;;  %v1518_v21 = vmax.f32 %v1364_v5, 0.0  ;;  %v1519_v42 = vmax.f32 %v1453_v24, 0.0  ;;  %v1515_v24 = vmax.f32 %v1448_v35, 0.0 }
 0x2d8   : > { %v1523_v1 = vmax.f32 %v1458_v2, 0.0  ;;  %v1510_v2 = vmax.f32 %v1354_v19, 0.0  ;;  %v1344_v5 = vadd.f32 %v7028_v40, %v6928_v62  ;;  %v1334_v35 = vadd.f32 %v6994_v53, %v7072_v50  ;;  %v5292_v53 = vld [vmem:[%s9311_s5 + $0x80] sm:$0xf] }
 0x2dc   : > { %v1370_v11 = vpop.f32.mrf.mxu2 }
 0x2dd   : > { %v1371_v39 = vadd.f32 %v1370_v11, %v6868_v15  ;;  %v1459_v36 = vpop.f32.mrf.mxu3  ;;  %v1450_v11 = vadd.f32 %v1449_v51, %v6857_v33  ;;  %v1445_v33 = vadd.f32 %v7070_v63, %v6932_v54  ;;  %v1440_v54 = vadd.f32 %v7054_v25, %v6912_v43 }
 0x2de   : > { %v1460_v46 = vadd.f32 %v1459_v36, %v6868_v15  ;;  %v1359_v15 = vadd.f32 %v1358_v37, %v6855_v30  ;;  %v7126_v37 = vpop.permute.xlu1 %1993  ;;  %v1438_v43 = vadd.f32 %v7044_v9, %v6939_v52  ;;  %v1511_v25 = vmax.f32 %v1443_v56, 0.0 }
 0x2df   : > { %v1524_v29 = vmax.f32 %v1371_v39, 0.0  ;;  %v1517_v51 = vmax.f32 %v1450_v11, 0.0  ;;  %9487 = vst [vmem:[#allocation21_spill] sm:$0xff] %v7126_v37  ;;  %v1513_v63 = vmax.f32 %v1445_v33, 0.0  ;;  %v1435_v39 = vadd.f32 %v7040_v12, %v6930_v49 }
 0x2e0   : > { %v1525_v44 = vmax.f32 %v1460_v46, 0.0  ;;  %v1514_v30 = vmax.f32 %v1359_v15, 0.0  ;;  %v1509_v36 = vmax.f32 %v1440_v54, 0.0  ;;  %v5285_v46 = vor.u32 %v5828_v31, %v5284_v7  ;;  %v5300_v31 = vld [vmem:[%s9311_s5 + $0x90] sm:$0xf] }
 0x2e1   : > { %v1556_v34 = vpack.c.bf16 %v1524_v29, %v1522_v3  ;;  %v1554_v29 = vpack.c.bf16 %v1520_v41, %v1518_v21  ;;  %v1555_v3 = vpack.c.bf16 %v1521_v59, %v1519_v42  ;;  %v1512_v41 = vmax.f32 %v1356_v47, 0.0 }
 0x2e2   : > { %2364 = vmatmul.bf16.gmra.mxu0 %v5277_v6  ;;  %v1557_v20 = vpack.c.bf16 %v1525_v44, %v1523_v1  ;;  %v1552_v23 = vpack.c.bf16 %v1516_v58, %v1514_v30  ;;  %v1553_v59 = vpack.c.bf16 %v1517_v51, %v1515_v24  ;;  %v1551_v60 = vpack.c.bf16 %v1513_v63, %v1511_v25  ;;  %v5815_v25 = vld [vmem:[%s9311_s5 + $0x14] sm:$0xf] }
 0x2e3   : > { %2702 = vmatmul.bf16.gmra.mxu2 %v5277_v6  ;;  %2495 = vmatpush.bf16.msrb.mxu1 %v1556_v34  ;;  %v1550_v27 = vpack.c.bf16 %v1512_v41, %v1510_v2  ;;  %v7152_v6 = vpop.permute.xlu2 %1828  ;;  %v1506_v1 = vmax.f32 %v1349_v14, 0.0  ;;  %v1433_v52 = vadd.f32 %v7030_v4, %v6928_v62  ;;  %v1507_v9 = vmax.f32 %v1438_v43, 0.0  ;;  %v5832_v43 = vld [vmem:[%s9311_s5 + $0x94] sm:$0xf0] }
 0x2e4   : > { %2833 = vmatpush.bf16.msrb.mxu3 %v1557_v20  ;;  %9489 = vst [vmem:[#allocation23_spill] sm:$0xff] %v7152_v6  ;;  %v1341_v49 = vadd.f32 %v7022_v8, %v7060_v26  ;;  %v1504_v12 = vmax.f32 %v1346_v13, 0.0  ;;  %v1430_v34 = vadd.f32 %v7024_v57, %v7060_v26  ;;  %v1505_v11 = vmax.f32 %v1435_v39, 0.0  ;;  %v7168_v8 = vpop.permute.xlu0 %1763  ;;  %v5238_v13 = vld [vmem:[%s9311_s5 + $0x18] sm:$0xf0] }
 0x2e5   : > { %v1548_v44 = vpack.c.bf16 %v1508_v16, %v1506_v1  ;;  %v1549_v40 = vpack.c.bf16 %v1509_v36, %v1507_v9  ;;  %v1339_v20 = vadd.f32 %v7008_v45, %v6937_v55  ;;  %v1502_v15 = vmax.f32 %v1344_v5, 0.0 }
 0x2e6   : > { %v7158_v10 = vpop.permute.xlu1 %1898  ;;  %v1428_v62 = vadd.f32 %v7010_v28, %v6937_v55  ;;  %v1503_v4 = vmax.f32 %v1433_v52, 0.0  ;;  %v1336_v21 = vadd.f32 %v7002_v0, %v7080_v22  ;;  %v1500_v57 = vmax.f32 %v1341_v49, 0.0 }
 0x2e7   : > { %2496 = vmatpush.bf16.msrb.mxu1 %v1554_v29  ;;  %9490 = vst [vmem:[#allocation24_spill] sm:$0xff] %v7158_v10  ;;  %v1546_v26 = vpack.c.bf16 %v1504_v12, %v1502_v15  ;;  %v1425_v45 = vadd.f32 %v7004_v18, %v7080_v22  ;;  %v1501_v42 = vmax.f32 %v1430_v34, 0.0  ;;  %v1498_v58 = vmax.f32 %v1339_v20, 0.0  ;;  %v5230_v22 = vld [vmem:[%s9311_s5 + $0x8] sm:$0xf0] }
 0x2e8   : > { %2834 = vmatpush.bf16.msrb.mxu3 %v1555_v3  ;;  %v1547_v47 = vpack.c.bf16 %v1505_v11, %v1503_v4  ;;  %v1423_v55 = vadd.f32 %v6997_v38, %v7072_v50  ;;  %v1499_v28 = vmax.f32 %v1428_v62, 0.0  ;;  %v1496_v0 = vmax.f32 %v1336_v21, 0.0  ;;  %v5830_v38 = vld [vmem:[%s9311_s5 + $0x84] sm:$0xf0]  ;;  %v5813_v50 = vld [vmem:[%s9311_s5 + $0x4] sm:$0xf] }
 0x2e9   : > { %v1544_v33 = vpack.c.bf16 %v1500_v57, %v1498_v58  ;;  %v1494_v51 = vmax.f32 %v1334_v35, 0.0  ;;  %v1497_v3 = vmax.f32 %v1425_v45, 0.0  ;;  %v5293_v61 = vor.u32 %v5830_v38, %v5292_v53  ;;  %v5308_v12 = vld [vmem:[%s9311_s5 + $0xa0] sm:$0xf]  ;;  %v5817_v34 = vld [vmem:[%s9311_s5 + $0x24] sm:$0xf] }
 0x2ea   : > { %v1545_v19 = vpack.c.bf16 %v1501_v42, %v1499_v28  ;;  %v1495_v30 = vmax.f32 %v1423_v55, 0.0  ;;  %v5233_v41 = vor.u32 %v5813_v50, %v5230_v22  ;;  %v5301_v39 = vor.u32 %v5832_v43, %v5300_v31  ;;  %v5246_v11 = vld [vmem:[%s9311_s5 + $0x28] sm:$0xf0]  ;;  %v5316_v42 = vld [vmem:[%s9311_s5 + $0xb0] sm:$0xf] }
 0x2eb   : > { %2497 = vmatpush.bf16.msrb.mxu1 %v1552_v23  ;;  %v7178_v29 = vpop.permute.xlu2 %1903  ;;  %v1542_v56 = vpack.c.bf16 %v1496_v0, %v1494_v51  ;;  %v5241_v36 = vor.u32 %v5815_v25, %v5238_v13  ;;  %v5249_v62 = vor.u32 %v5817_v34, %v5246_v11  ;;  %v5836_v58 = vld [vmem:[%s9311_s5 + $0xb4] sm:$0xf0]  ;;  %v5819_v55 = vld [vmem:[%s9311_s5 + $0x34] sm:$0xf]  ;;  %v5254_v28 = vld [vmem:[%s9311_s5 + $0x38] sm:$0xf0] }
 0x2ec   : > { %2835 = vmatpush.bf16.msrb.mxu3 %v1553_v59  ;;  %9491 = vst [vmem:[#allocation25_spill] sm:$0xff] %v7178_v29  ;;  %v1543_v24 = vpack.c.bf16 %v1497_v3, %v1495_v30  ;;  %v7194_v23 = vpop.permute.xlu0 %1838  ;;  %v5317_v51 = vor.u32 %v5836_v58, %v5316_v42  ;;  %v5257_v3 = vor.u32 %v5819_v55, %v5254_v28  ;;  %v5262_v31 = vld [vmem:[%s9311_s5 + $0x48] sm:$0xf0]  ;;  %v5840_v58 = vld [vmem:[%s9311_s5 + $0xd4] sm:$0xf0] }
 0x2ed   : > { %9492 = vst [vmem:[#allocation26_spill] sm:$0xff] %v7194_v23  ;;  %v5823_v55 = vld [vmem:[%s9311_s5 + $0x54] sm:$0xf]  ;;  %v5270_v28 = vld [vmem:[%s9311_s5 + $0x58] sm:$0xf0] }
 0x2ee   : > { %v7183_v18 = vpop.permute.xlu1 %1743 }
 0x2ef   : > { %2498 = vmatpush.bf16.msrb.mxu1 %v1550_v27 }
 0x2f0   : > { %2836 = vmatpush.bf16.msrb.mxu3 %v1551_v60 }
 0x2f2   : > { %2369 = vmatmul.bf16.gmra.mxu0 %v5285_v46 }
 0x2f3   : > { %2707 = vmatmul.bf16.gmra.mxu2 %v5285_v46  ;;  %2499 = vmatpush.bf16.msrb.mxu1 %v1548_v44  ;;  %v7198_v63 = vpop.permute.xlu2 %1978  ;;  %v5834_v44 = vld [vmem:[%s9311_s5 + $0xa4] sm:$0xf0] }
 0x2f4   : > { %2837 = vmatpush.bf16.msrb.mxu3 %v1549_v40  ;;  %9493 = vst [vmem:[#allocation27_spill] sm:$0xff] %v7198_v63  ;;  %v7206_v7 = vpop.permute.xlu0 %1913  ;;  %v5309_v15 = vor.u32 %v5834_v44, %v5308_v12 }
 0x2f5   : > { %9495 = vst [vmem:[#allocation29_spill] sm:$0xff] %v7206_v7 }
 0x2f6   : > { %v7200_v59 = vpop.permute.xlu1 %1818 }
 0x2f7   : > { %2500 = vmatpush.bf16.msrb.mxu1 %v1546_v26  ;;  %9494 = vst [vmem:[#allocation28_spill] sm:$0xff] %v7200_v59 }
 0x2f8   : > { %2838 = vmatpush.bf16.msrb.mxu3 %v1547_v47 }
 0x2fb   : > { %2501 = vmatpush.bf16.msrb.mxu1 %v1544_v33  ;;  %v7220_v16 = vpop.permute.xlu2 %1823 }
 0x2fc   : > { %2839 = vmatpush.bf16.msrb.mxu3 %v1545_v19  ;;  %9496 = vst [vmem:[#allocation30_spill] sm:$0xff] %v7220_v16  ;;  %v7228_v5 = vpop.permute.xlu0 %1988 }
 0x2fd   : > { %9498 = vst [vmem:[#allocation32_spill] sm:$0xff] %v7228_v5 }
 0x2fe   : > { %v7224_v60 = vpop.permute.xlu1 %1893 }
 0x2ff   : > { %v7196_v54 = vpop.f32.mrf.mxu0  ;;  %2502 = vmatpush.bf16.msrb.mxu1 %v1542_v56  ;;  %9497 = vst [vmem:[#allocation31_spill] sm:$0xff] %v7224_v60  ;;  %v5324_v56 = vld [vmem:[%s9311_s5 + $0xc0] sm:$0xf] }
 0x300   : > { %2840 = vmatpush.bf16.msrb.mxu3 %v1543_v24 }
 0x302   : > { %2374 = vmatmul.bf16.gmra.mxu0 %v5293_v61  ;;  %2503 = vmatmul.bf16.vlgmr.msrb.gmra.mxu1 %v5233_v41 }
 0x303   : > { %2712 = vmatmul.bf16.gmra.mxu2 %v5293_v61  ;;  %2841 = vmatmul.bf16.vlgmr.msrb.gmra.mxu3 %v5233_v41  ;;  %v7232_v52 = vpop.permute.xlu2 %1728  ;;  %v5838_v61 = vld [vmem:[%s9311_s5 + $0xc4] sm:$0xf0]  ;;  %v5821_v41 = vld [vmem:[%s9311_s5 + $0x44] sm:$0xf] }
 0x304   : > { %v7250_v40 = vpop.permute.xlu0 %1833  ;;  %v5325_v25 = vor.u32 %v5838_v61, %v5324_v56  ;;  %v5265_v13 = vor.u32 %v5821_v41, %v5262_v31  ;;  %v5273_v56 = vor.u32 %v5823_v55, %v5270_v28  ;;  %v5825_v55 = vld [vmem:[%s9311_s5 + $0x64] sm:$0xf]  ;;  %v5278_v28 = vld [vmem:[%s9311_s5 + $0x68] sm:$0xf0] }
 0x305   : > { %9500 = vst [vmem:[#allocation34_spill] sm:$0xff] %v7250_v40  ;;  %v5281_v63 = vor.u32 %v5825_v55, %v5278_v28 }
 0x306   : > { %v7202_v14 = vpop.f32.mrf.mxu2  ;;  %v7236_v49 = vpop.permute.xlu1 %1968 }
 0x307   : > { %v7204_v2 = vpop.f32.mrf.mxu0  ;;  %9499 = vst [vmem:[#allocation33_spill] sm:$0xff] %v7236_v49 }
 0x30b   : > { %v7256_v21 = vpop.permute.xlu2 %1973 }
 0x30c   : > { %9501 = vst [vmem:[#allocation35_spill] sm:$0xff] %v7256_v21  ;;  %v7262_v35 = vpop.permute.xlu0 %1738 }
 0x30e   : > { %v7222_v27 = vpop.f32.mrf.mxu2  ;;  %v7258_v57 = vpop.permute.xlu1 %1813 }
 0x30f   : > { %v7226_v46 = vpop.f32.mrf.mxu0  ;;  %9502 = vst [vmem:[#allocation36_spill] sm:$0xff] %v7258_v57 }
 0x312   : > { %2379 = vmatmul.bf16.gmra.mxu0 %v5301_v39  ;;  %2508 = vmatmul.bf16.gmra.mxu1 %v5241_v36 }
 0x313   : > { %2717 = vmatmul.bf16.gmra.mxu2 %v5301_v39  ;;  %2846 = vmatmul.bf16.gmra.mxu3 %v5241_v36  ;;  %v7269_v47 = vpop.permute.xlu2 %1878 }
 0x314   : > { %9503 = vst [vmem:[#allocation37_spill] sm:$0xff] %v7269_v47  ;;  %v7286_v53 = vpop.permute.xlu0 %1983 }
 0x315   : > { %9504 = vst [vmem:[#allocation38_spill] sm:$0xff] %v7286_v53 }
 0x316   : > { %v7230_v1 = vpop.f32.mrf.mxu2  ;;  %v7280_v0 = vpop.permute.xlu1 %1718 }
 0x317   : > { %v7234_v9 = vpop.f32.mrf.mxu0 }
 0x31b   : > { %v7288_v38 = vpop.permute.xlu2 %1723 }
 0x31c   : > { %v7299_v24 = vpop.permute.xlu0 %1888 }
 0x31d   : > { %9506 = vst [vmem:[#allocation40_spill] sm:$0xff] %v7299_v24 }
 0x31e   : > { %v7252_v20 = vpop.f32.mrf.mxu2  ;;  %v7292_v22 = vpop.permute.xlu1 %1963 }
 0x31f   : > { %v7254_v4 = vpop.f32.mrf.mxu0  ;;  %9505 = vst [vmem:[#allocation39_spill] sm:$0xff] %v7292_v22 }
 0x322   : > { %2384 = vmatmul.bf16.gmra.mxu0 %v5309_v15  ;;  %2513 = vmatmul.bf16.gmra.mxu1 %v5249_v62 }
 0x323   : > { %2722 = vmatmul.bf16.gmra.mxu2 %v5309_v15  ;;  %2851 = vmatmul.bf16.gmra.mxu3 %v5249_v62  ;;  %v7312_v39 = vpop.permute.xlu2 %1798  ;;  %v5332_v62 = vld [vmem:[%s9311_s5 + $0xd0] sm:$0xf] }
 0x324   : > { %9507 = vst [vmem:[#allocation41_spill] sm:$0xff] %v7312_v39  ;;  %v7318_v44 = vpop.permute.xlu0 %1733 }
 0x326   : > { %v7260_v26 = vpop.f32.mrf.mxu2  ;;  %v7316_v12 = vpop.permute.xlu1 %1868 }
 0x327   : > { %v7264_v45 = vpop.f32.mrf.mxu0  ;;  %9508 = vst [vmem:[#allocation42_spill] sm:$0xff] %v7316_v12 }
 0x32b   : > { %v7324_v15 = vpop.permute.xlu2 %1873 }
 0x32c   : > { %9509 = vst [vmem:[#allocation43_spill] sm:$0xff] %v7324_v15  ;;  %v7342_v61 = vpop.permute.xlu0 %1808 }
 0x32d   : > { %9510 = vst [vmem:[#allocation44_spill] sm:$0xff] %v7342_v61 }
 0x32e   : > { %v7282_v33 = vpop.f32.mrf.mxu2  ;;  %v7329_v42 = vpop.permute.xlu1 %1713 }
 0x32f   : > { %v7284_v19 = vpop.f32.mrf.mxu0 }
 0x332   : > { %2389 = vmatmul.bf16.gmra.mxu0 %v5317_v51  ;;  %2518 = vmatmul.bf16.gmra.mxu1 %v5257_v3 }
 0x333   : > { %2727 = vmatmul.bf16.gmra.mxu2 %v5317_v51  ;;  %2856 = vmatmul.bf16.gmra.mxu3 %v5257_v3  ;;  %v5333_v3 = vor.u32 %v5840_v58, %v5332_v62  ;;  %v7346_v31 = vpop.permute.xlu2 %1948  ;;  %v5340_v62 = vld [vmem:[%s9311_s5 + $0xe0] sm:$0xf]  ;;  %v5842_v58 = vld [vmem:[%s9311_s5 + $0xe4] sm:$0xf0] }
 0x334   : > { %9511 = vst [vmem:[#allocation45_spill] sm:$0xff] %v7346_v31  ;;  %v7354_v5 = vpop.permute.xlu0 %1883  ;;  %v5341_v53 = vor.u32 %v5842_v58, %v5340_v62  ;;  %v5348_v62 = vld [vmem:[%s9311_s5 + $0xf0] sm:$0xf]  ;;  %v5844_v58 = vld [vmem:[%s9311_s5 + $0xf4] sm:$0xf0] }
 0x335   : > { %9513 = vst [vmem:[#allocation47_spill] sm:$0xff] %v7354_v5 }
 0x336   : > { %v7290_v50 = vpop.f32.mrf.mxu2 }
 0x337   : > { %v7294_v30 = vpop.f32.mrf.mxu0 }
 0x33c   : > { %v7376_v22 = vpop.permute.xlu0 %1958 }
 0x33d   : > { %9516 = vst [vmem:[#allocation50_spill] sm:$0xff] %v7376_v22  ;;  %v5349_v22 = vor.u32 %v5844_v58, %v5348_v62  ;;  %v5356_v62 = vld [vmem:[%s9311_s5 + $0x100] sm:$0xf] }
 0x33e   : > { %v7310_v43 = vpop.f32.mrf.mxu2 }
 0x33f   : > { %v7314_v36 = vpop.f32.mrf.mxu0 }
 0x342   : > { %2394 = vmatmul.bf16.gmra.mxu0 %v5325_v25  ;;  %2523 = vmatmul.bf16.gmra.mxu1 %v5265_v13 }
 0x343   : > { %2732 = vmatmul.bf16.gmra.mxu2 %v5325_v25  ;;  %2861 = vmatmul.bf16.gmra.mxu3 %v5265_v13  ;;  %v7348_v25 = vpop.permute.xlu1 %1788 }
 0x344   : > { %9512 = vst [vmem:[#allocation46_spill] sm:$0xff] %v7348_v25  ;;  %v7398_v55 = vpop.permute.xlu0 %1803 }
 0x345   : > { %9518 = vst [vmem:[#allocation52_spill] sm:$0xff] %v7398_v55 }
 0x346   : > { %v7320_v34 = vpop.f32.mrf.mxu2 }
 0x347   : > { %v7322_v11 = vpop.f32.mrf.mxu0 }
 0x34b   : > { %v7372_v21 = vpop.permute.xlu1 %1863 }
 0x34c   : > { %9515 = vst [vmem:[#allocation49_spill] sm:$0xff] %v7372_v21  ;;  %v7408_v5 = vpop.permute.xlu0 %1708 }
 0x34e   : > { %v7340_v51 = vpop.f32.mrf.mxu2 }
 0x34f   : > { %v7344_v41 = vpop.f32.mrf.mxu0 }
 0x352   : > { %2399 = vmatmul.bf16.gmra.mxu0 %v5333_v3  ;;  %2528 = vmatmul.bf16.gmra.mxu1 %v5273_v56 }
 0x353   : > { %2737 = vmatmul.bf16.gmra.mxu2 %v5333_v3  ;;  %2866 = vmatmul.bf16.gmra.mxu3 %v5273_v56  ;;  %v7368_v3 = vpop.permute.xlu2 %1793  ;;  %v7384_v29 = vpop.permute.xlu1 %1938 }
 0x354   : > { %9514 = vst [vmem:[#allocation48_spill] sm:$0xff] %v7368_v3  ;;  %v7431_v6 = vpop.permute.xlu0 %1953 }
 0x355   : > { %9517 = vst [vmem:[#allocation51_spill] sm:$0xff] %v7384_v29 }
 0x356   : > { %v7350_v13 = vpop.f32.mrf.mxu2  ;;  %9522 = vst [vmem:[#allocation56_spill] sm:$0xff] %v7431_v6  ;;  %v5364_v6 = vld [vmem:[%s9311_s5 + $0x110] sm:$0xf] }
 0x357   : > { %v7352_v37 = vpop.f32.mrf.mxu0 }
 0x35b   : > { %v7380_v32 = vpop.permute.xlu2 %1698  ;;  %v7406_v24 = vpop.permute.xlu1 %1783 }
 0x35c   : > { %9520 = vst [vmem:[#allocation54_spill] sm:$0xff] %v7406_v24  ;;  %v7442_v55 = vpop.permute.xlu0 %1858 }
 0x35d   : > { %9523 = vst [vmem:[#allocation57_spill] sm:$0xff] %v7442_v55 }
 0x35e   : > { %v7370_v56 = vpop.f32.mrf.mxu2 }
 0x35f   : > { %v7374_v49 = vpop.f32.mrf.mxu0 }
 0x362   : > { %2404 = vmatmul.bf16.gmra.mxu0 %v5341_v53  ;;  %2533 = vmatmul.bf16.gmra.mxu1 %v5281_v63 }
 0x363   : > { %2742 = vmatmul.bf16.gmra.mxu2 %v5341_v53  ;;  %2871 = vmatmul.bf16.gmra.mxu3 %v5281_v63  ;;  %v5827_v63 = vld [vmem:[%s9311_s5 + $0x74] sm:$0xf]  ;;  %v5286_v53 = vld [vmem:[%s9311_s5 + $0x78] sm:$0xf0]  ;;  %v7404_v60 = vpop.permute.xlu2 %1943 }
 0x364   : > { %v5289_v29 = vor.u32 %v5827_v63, %v5286_v53  ;;  %9519 = vst [vmem:[#allocation53_spill] sm:$0xff] %v7404_v60  ;;  %v5846_v63 = vld [vmem:[%s9311_s5 + $0x104] sm:$0xf0]  ;;  %v1689_v53 = vpop.permute.xlu1 %1688 }
 0x365   : > { %v2336_v60 = vadd.f32 %v7196_v54, %v1689_v53  ;;  %v5357_v12 = vor.u32 %v5846_v63, %v5356_v62  ;;  %v2674_v57 = vadd.f32 %v7202_v14, %v1689_v53  ;;  %v5848_v14 = vld [vmem:[%s9311_s5 + $0x114] sm:$0xf0] }
 0x366   : > { %v7378_v31 = vpop.f32.mrf.mxu2 }
 0x367   : > { %v7382_v7 = vpop.f32.mrf.mxu0 }
 0x36b   : > { %v7417_v58 = vpop.permute.xlu2 %1848 }
 0x36c   : > { %9521 = vst [vmem:[#allocation55_spill] sm:$0xff] %v7417_v58 }
 0x36e   : > { %v7400_v28 = vpop.f32.mrf.mxu2 }
 0x36f   : > { %v7402_v10 = vpop.f32.mrf.mxu0 }
 0x372   : > { %2409 = vmatmul.bf16.gmra.mxu0 %v5349_v22  ;;  %2538 = vmatmul.bf16.gmra.mxu1 %v5289_v29 }
 0x373   : > { %2747 = vmatmul.bf16.gmra.mxu2 %v5349_v22  ;;  %2876 = vmatmul.bf16.gmra.mxu3 %v5289_v29  ;;  %v5829_v29 = vld [vmem:[%s9311_s5 + $0x84] sm:$0xf]  ;;  %v5294_v22 = vld [vmem:[%s9311_s5 + $0x88] sm:$0xf0]  ;;  %v1694_v59 = vpop.permute.xlu2 %1693 }
 0x374   : > { %v5297_v21 = vor.u32 %v5829_v29, %v5294_v22  ;;  %v2338_v61 = vadd.f32 %v7204_v2, %v1694_v59  ;;  %v5831_v2 = vld [vmem:[%s9311_s5 + $0x94] sm:$0xf] }
 0x376   : > { %v7412_v15 = vpop.f32.mrf.mxu2 }
 0x377   : > { %v7410_v47 = vpop.f32.mrf.mxu0 }
 0x37e   : > { %v7433_v16 = vpop.f32.mrf.mxu2 }
 0x37f   : > { %v7429_v23 = vpop.f32.mrf.mxu0  ;;  %v2504_v58 = vpop.f32.mrf.mxu1 }
 0x380   : > { %v2505_v40 = vadd.f32 %v2504_v58, %v2336_v60 }
 0x382   : > { %2414 = vmatmul.bf16.gmra.mxu0 %v5357_v12  ;;  %2543 = vmatmul.bf16.gmra.mxu1 %v5297_v21  ;;  %v3002_v60 = vmax.f32 %v2505_v40, 0.0 }
 0x383   : > { %2752 = vmatmul.bf16.gmra.mxu2 %v5357_v12  ;;  %2881 = vmatmul.bf16.gmra.mxu3 %v5297_v21  ;;  %v5302_v21 = vld [vmem:[%s9311_s5 + $0x98] sm:$0xf0]  ;;  %v2676_v12 = vadd.f32 %v7222_v27, %v1694_v59  ;;  %v1704_v59 = vpop.permute.xlu0 %1703  ;;  %v2679_v27 = vadd.f32 %v7230_v1, %v7380_v32  ;;  %v5833_v1 = vld [vmem:[%s9311_s5 + $0xa4] sm:$0xf] }
 0x386   : > { %v2842_v54 = vpop.f32.mrf.mxu3  ;;  %v7453_v40 = vpop.f32.mrf.mxu2 }
 0x387   : > { %v2843_v62 = vadd.f32 %v2842_v54, %v2674_v57  ;;  %v7437_v63 = vpop.f32.mrf.mxu0  ;;  %v2506_v29 = vpop.f32.mrf.mxu1  ;;  %v5365_v54 = vor.u32 %v5848_v14, %v5364_v6  ;;  %v2343_v6 = vadd.f32 %v7234_v9, %v1704_v59  ;;  %v5310_v9 = vld [vmem:[%s9311_s5 + $0xa8] sm:$0xf0] }
 0x388   : > { %v2507_v22 = vadd.f32 %v2506_v29, %v2338_v61  ;;  %v2341_v61 = vadd.f32 %v7226_v46, %v7380_v32  ;;  %v5305_v29 = vor.u32 %v5831_v2, %v5302_v21  ;;  %v5850_v32 = vld [vmem:[%s9311_s5 + $0x124] sm:$0xf0] }
 0x389   : > { %v3003_v25 = vmax.f32 %v2843_v62, 0.0 }
 0x38a   : > { %v3004_v58 = vmax.f32 %v2507_v22, 0.0 }
 0x38c   : > { %v7455_v57 = vpack.c.bf16 %v3004_v58, %v3002_v60 }
 0x38e   : > { %v2844_v53 = vpop.f32.mrf.mxu3  ;;  %v7467_v46 = vpop.f32.mrf.mxu2 }
 0x38f   : > { %v2845_v22 = vadd.f32 %v2844_v53, %v2676_v12  ;;  %v7460_v55 = vpop.f32.mrf.mxu0  ;;  %v2509_v39 = vpop.f32.mrf.mxu1 }
 0x390   : > { %v2510_v3 = vadd.f32 %v2509_v39, %v2341_v61  ;;  %v2346_v61 = vadd.f32 %v7254_v4, %v7408_v5  ;;  %v2684_v4 = vadd.f32 %v7260_v26, %v7408_v5  ;;  %v5852_v5 = vld [vmem:[%s9311_s5 + $0x134] sm:$0xf0]  ;;  %v5835_v26 = vld [vmem:[%s9311_s5 + $0xb4] sm:$0xf] }
 0x391   : > { %v3005_v24 = vmax.f32 %v2845_v22, 0.0 }
 0x392   : > { %2419 = vmatmul.bf16.gmra.mxu0 %v5365_v54  ;;  %2548 = vmatmul.bf16.gmra.mxu1 %v5305_v29  ;;  %v3006_v21 = vmax.f32 %v2510_v3, 0.0  ;;  %v2681_v3 = vadd.f32 %v7252_v20, %v1704_v59  ;;  %v2348_v59 = vadd.f32 %v7264_v45, %v7329_v42  ;;  %v5318_v45 = vld [vmem:[%s9311_s5 + $0xb8] sm:$0xf0] }
 0x393   : > { %2757 = vmatmul.bf16.gmra.mxu2 %v5365_v54  ;;  %2886 = vmatmul.bf16.gmra.mxu3 %v5305_v29  ;;  %v7462_v60 = vpack.c.bf16 %v3005_v24, %v3003_v25  ;;  %v5372_v24 = vld [vmem:[%s9311_s5 + $0x120] sm:$0xf]  ;;  %v5313_v29 = vor.u32 %v5833_v1, %v5310_v9 }
 0x394   : > { %v5373_v54 = vor.u32 %v5850_v32, %v5372_v24 }
 0x395   : > { %9524 = vst [vmem:[#allocation58_spill] sm:$0xff] %v7462_v60 }
 0x396   : > { %v2847_v58 = vpop.f32.mrf.mxu3 }
 0x397   : > { %v2848_v14 = vadd.f32 %v2847_v58, %v2679_v27  ;;  %v7469_v2 = vpop.f32.mrf.mxu0  ;;  %v2511_v39 = vpop.f32.mrf.mxu1 }
 0x398   : > { %v2512_v62 = vadd.f32 %v2511_v39, %v2343_v6  ;;  %v7490_v58 = vpop.f32.mrf.mxu2 }
 0x39a   : > { %v3008_v12 = vmax.f32 %v2512_v62, 0.0  ;;  %v3007_v62 = vmax.f32 %v2848_v14, 0.0 }
 0x39c   : > { %v7483_v25 = vpack.c.bf16 %v3008_v12, %v3006_v21 }
 0x39e   : > { %v2849_v53 = vpop.f32.mrf.mxu3 }
 0x39f   : > { %v2850_v22 = vadd.f32 %v2849_v53, %v2681_v3  ;;  %v7488_v27 = vpop.f32.mrf.mxu0  ;;  %v2514_v6 = vpop.f32.mrf.mxu1  ;;  %v2686_v53 = vadd.f32 %v7282_v33, %v7329_v42  ;;  %v2353_v42 = vadd.f32 %v7294_v30, %v7288_v38 }
 0x3a0   : > { %v2515_v39 = vadd.f32 %v2514_v6, %v2346_v61  ;;  %v7500_v14 = vpop.f32.mrf.mxu2  ;;  %v5321_v6 = vor.u32 %v5835_v26, %v5318_v45 }
 0x3a1   : > { %v3009_v60 = vmax.f32 %v2850_v22, 0.0 }
 0x3a2   : > { %2424 = vmatmul.bf16.gmra.mxu0 %v5373_v54  ;;  %2553 = vmatmul.bf16.gmra.mxu1 %v5313_v29  ;;  %v3010_v9 = vmax.f32 %v2515_v39, 0.0 }
 0x3a3   : > { %2762 = vmatmul.bf16.gmra.mxu2 %v5373_v54  ;;  %2891 = vmatmul.bf16.gmra.mxu3 %v5313_v29  ;;  %v7492_v20 = vpack.c.bf16 %v3009_v60, %v3007_v62  ;;  %v5380_v60 = vld [vmem:[%s9311_s5 + $0x130] sm:$0xf]  ;;  %v2351_v54 = vadd.f32 %v7284_v19, %v7280_v0  ;;  %v2689_v19 = vadd.f32 %v7290_v50, %v7280_v0  ;;  %v5837_v0 = vld [vmem:[%s9311_s5 + $0xc4] sm:$0xf]  ;;  %v5326_v50 = vld [vmem:[%s9311_s5 + $0xc8] sm:$0xf0] }
 0x3a4   : > { %v5381_v22 = vor.u32 %v5852_v5, %v5380_v60 }
 0x3a6   : > { %v2852_v21 = vpop.f32.mrf.mxu3 }
 0x3a7   : > { %v2853_v12 = vadd.f32 %v2852_v21, %v2684_v4  ;;  %v7498_v24 = vpop.f32.mrf.mxu0  ;;  %v2516_v32 = vpop.f32.mrf.mxu1 }
 0x3a8   : > { %v2517_v1 = vadd.f32 %v2516_v32, %v2348_v59  ;;  %v7524_v33 = vpop.f32.mrf.mxu2 }
 0x3a9   : > { %v3011_v21 = vmax.f32 %v2853_v12, 0.0 }
 0x3aa   : > { %v3012_v3 = vmax.f32 %v2517_v1, 0.0 }
 0x3ac   : > { %v7514_v61 = vpack.c.bf16 %v3012_v3, %v3010_v9 }
 0x3ae   : > { %v2854_v29 = vpop.f32.mrf.mxu3 }
 0x3af   : > { %v2855_v39 = vadd.f32 %v2854_v29, %v2686_v53  ;;  %v7520_v62 = vpop.f32.mrf.mxu0  ;;  %v2519_v4 = vpop.f32.mrf.mxu1  ;;  %v5388_v53 = vld [vmem:[%s9311_s5 + $0x140] sm:$0xf]  ;;  %v2691_v29 = vadd.f32 %v7310_v43, %v7288_v38  ;;  %v2694_v43 = vadd.f32 %v7320_v34, %v7232_v52  ;;  %v5839_v34 = vld [vmem:[%s9311_s5 + $0xd4] sm:$0xf] }
 0x3b0   : > { %v2520_v59 = vadd.f32 %v2519_v4, %v2351_v54  ;;  %v5854_v54 = vld [vmem:[%s9311_s5 + $0x144] sm:$0xf0] }
 0x3b1   : > { %v3013_v32 = vmax.f32 %v2855_v39, 0.0  ;;  %v5389_v4 = vor.u32 %v5854_v54, %v5388_v53 }
 0x3b2   : > { %2429 = vmatmul.bf16.gmra.mxu0 %v5381_v22  ;;  %2558 = vmatmul.bf16.gmra.mxu1 %v5321_v6  ;;  %v3014_v26 = vmax.f32 %v2520_v59, 0.0  ;;  %v5329_v59 = vor.u32 %v5837_v0, %v5326_v50 }
 0x3b3   : > { %2767 = vmatmul.bf16.gmra.mxu2 %v5381_v22  ;;  %2896 = vmatmul.bf16.gmra.mxu3 %v5321_v6  ;;  %v7522_v1 = vpack.c.bf16 %v3013_v32, %v3011_v21  ;;  %v2356_v22 = vadd.f32 %v7314_v36, %v7232_v52  ;;  %v7550_v6 = vpop.f32.mrf.mxu2  ;;  %v2358_v36 = vadd.f32 %v7322_v11, %v7318_v44  ;;  %v5856_v52 = vld [vmem:[%s9311_s5 + $0x154] sm:$0xf0]  ;;  %v5334_v11 = vld [vmem:[%s9311_s5 + $0xd8] sm:$0xf0] }
 0x3b6   : > { %v2857_v9 = vpop.f32.mrf.mxu3 }
 0x3b7   : > { %v2858_v3 = vadd.f32 %v2857_v9, %v2689_v19  ;;  %v7530_v60 = vpop.f32.mrf.mxu0  ;;  %v2521_v12 = vpop.f32.mrf.mxu1 }
 0x3b8   : > { %v2522_v5 = vadd.f32 %v2521_v12, %v2353_v42 }
 0x3b9   : > { %v3015_v9 = vmax.f32 %v2858_v3, 0.0 }
 0x3ba   : > { %v3016_v45 = vmax.f32 %v2522_v5, 0.0 }
 0x3bb   : > { %v7562_v54 = vpop.f32.mrf.mxu2 }
 0x3bc   : > { %v7544_v30 = vpack.c.bf16 %v3016_v45, %v3014_v26 }
 0x3be   : > { %v2859_v39 = vpop.f32.mrf.mxu3 }
 0x3bf   : > { %v2860_v21 = vadd.f32 %v2859_v39, %v2691_v29  ;;  %v7552_v32 = vpop.f32.mrf.mxu0  ;;  %v2524_v19 = vpop.f32.mrf.mxu1  ;;  %v5396_v29 = vld [vmem:[%s9311_s5 + $0x150] sm:$0xf]  ;;  %v2696_v39 = vadd.f32 %v7340_v51, %v7318_v44  ;;  %v2361_v44 = vadd.f32 %v7344_v41, %v7262_v35  ;;  %v2363_v51 = vadd.f32 %v7352_v37, %v7183_v18  ;;  %v5858_v41 = vld [vmem:[%s9311_s5 + $0x164] sm:$0xf0]  ;;  %v5841_v37 = vld [vmem:[%s9311_s5 + $0xe4] sm:$0xf] }
 0x3c0   : > { %v2525_v42 = vadd.f32 %v2524_v19, %v2356_v22 }
 0x3c1   : > { %v3017_v12 = vmax.f32 %v2860_v21, 0.0  ;;  %v5337_v21 = vor.u32 %v5839_v34, %v5334_v11  ;;  %v5404_v34 = vld [vmem:[%s9311_s5 + $0x160] sm:$0xf]  ;;  %v2699_v11 = vadd.f32 %v7350_v13, %v7262_v35 }
 0x3c2   : > { %2434 = vmatmul.bf16.gmra.mxu0 %v5389_v4  ;;  %2563 = vmatmul.bf16.gmra.mxu1 %v5329_v59  ;;  %v3018_v0 = vmax.f32 %v2525_v42, 0.0 }
 0x3c3   : > { %2772 = vmatmul.bf16.gmra.mxu2 %v5389_v4  ;;  %2901 = vmatmul.bf16.gmra.mxu3 %v5329_v59  ;;  %v7554_v38 = vpack.c.bf16 %v3017_v12, %v3015_v9  ;;  %v5397_v59 = vor.u32 %v5856_v52, %v5396_v29 }
 0x3c6   : > { %v2862_v5 = vpop.f32.mrf.mxu3 }
 0x3c7   : > { %v2863_v26 = vadd.f32 %v2862_v5, %v2694_v43  ;;  %v7560_v45 = vpop.f32.mrf.mxu0  ;;  %v2526_v53 = vpop.f32.mrf.mxu1 }
 0x3c8   : > { %v2527_v3 = vadd.f32 %v2526_v53, %v2358_v36  ;;  %v7582_v36 = vpop.f32.mrf.mxu2 }
 0x3c9   : > { %v3019_v12 = vmax.f32 %v2863_v26, 0.0 }
 0x3ca   : > { %v3020_v50 = vmax.f32 %v2527_v3, 0.0 }
 0x3cc   : > { %v7576_v22 = vpack.c.bf16 %v3020_v50, %v3018_v0 }
 0x3ce   : > { %v2864_v4 = vpop.f32.mrf.mxu3 }
 0x3cf   : > { %v2865_v19 = vadd.f32 %v2864_v4, %v2696_v39  ;;  %v7580_v42 = vpop.f32.mrf.mxu0  ;;  %v2529_v9 = vpop.f32.mrf.mxu1  ;;  %v5342_v39 = vld [vmem:[%s9311_s5 + $0xe8] sm:$0xf0] }
 0x3d0   : > { %v2530_v53 = vadd.f32 %v2529_v9, %v2361_v44  ;;  %v7606_v4 = vpop.f32.mrf.mxu2  ;;  %v5345_v9 = vor.u32 %v5841_v37, %v5342_v39 }
 0x3d1   : > { %v3021_v43 = vmax.f32 %v2865_v19, 0.0  ;;  %v5405_v19 = vor.u32 %v5858_v41, %v5404_v34 }
 0x3d2   : > { %2439 = vmatmul.bf16.gmra.mxu0 %v5397_v59  ;;  %2568 = vmatmul.bf16.gmra.mxu1 %v5337_v21  ;;  %v3022_v29 = vmax.f32 %v2530_v53, 0.0 }
 0x3d3   : > { %2777 = vmatmul.bf16.gmra.mxu2 %v5397_v59  ;;  %2906 = vmatmul.bf16.gmra.mxu3 %v5337_v21  ;;  %v7584_v5 = vpack.c.bf16 %v3021_v43, %v3019_v12  ;;  %v2701_v21 = vadd.f32 %v7370_v56, %v7183_v18  ;;  %v7618_v18 = vpop.permute.xlu0 %1778  ;;  %v2368_v56 = vadd.f32 %v7382_v7, %v7120_v17  ;;  %v5860_v7 = vld [vmem:[%s9311_s5 + $0x174] sm:$0xf0] }
 0x3d6   : > { %v2867_v3 = vpop.f32.mrf.mxu3 }
 0x3d7   : > { %v7590_v0 = vpop.f32.mrf.mxu0  ;;  %v2531_v26 = vpop.f32.mrf.mxu1  ;;  %v2868_v35 = vadd.f32 %v2867_v3, %v2699_v11 }
 0x3d8   : > { %v2532_v50 = vadd.f32 %v2531_v26, %v2363_v51  ;;  %v7622_v3 = vpop.f32.mrf.mxu2 }
 0x3d9   : > { %v3023_v51 = vmax.f32 %v2868_v35, 0.0  ;;  %v5843_v35 = vld [vmem:[%s9311_s5 + $0xf4] sm:$0xf] }
 0x3da   : > { %v3024_v52 = vmax.f32 %v2532_v50, 0.0  ;;  %v2366_v50 = vadd.f32 %v7374_v49, %v7108_v48  ;;  %v2704_v49 = vadd.f32 %v7378_v31, %v7108_v48 }
 0x3dc   : > { %v7608_v59 = vpack.c.bf16 %v3024_v52, %v3022_v29 }
 0x3de   : > { %v2869_v13 = vpop.f32.mrf.mxu3 }
 0x3df   : > { %v2870_v12 = vadd.f32 %v2869_v13, %v2701_v21  ;;  %v7612_v43 = vpop.f32.mrf.mxu0  ;;  %v2534_v44 = vpop.f32.mrf.mxu1  ;;  %v5412_v21 = vld [vmem:[%s9311_s5 + $0x170] sm:$0xf]  ;;  %v5350_v13 = vld [vmem:[%s9311_s5 + $0xf8] sm:$0xf0] }
 0x3e0   : > { %v2535_v29 = vadd.f32 %v2534_v44, %v2366_v50  ;;  %v5353_v48 = vor.u32 %v5843_v35, %v5350_v13 }
 0x3e1   : > { %v3025_v53 = vmax.f32 %v2870_v12, 0.0 }
 0x3e2   : > { %2444 = vmatmul.bf16.gmra.mxu0 %v5405_v19  ;;  %2573 = vmatmul.bf16.gmra.mxu1 %v5345_v9  ;;  %v3026_v37 = vmax.f32 %v2535_v29, 0.0  ;;  %v7646_v29 = vpop.permute.xlu0 %1853 }
 0x3e3   : > { %2782 = vmatmul.bf16.gmra.mxu2 %v5405_v19  ;;  %2911 = vmatmul.bf16.gmra.mxu3 %v5345_v9  ;;  %v7614_v26 = vpack.c.bf16 %v3025_v53, %v3023_v51  ;;  %v2706_v9 = vadd.f32 %v7400_v28, %v7120_v17  ;;  %v5413_v51 = vor.u32 %v5860_v7, %v5412_v21  ;;  %v9527_v17 = vld [vmem:[#allocation16_spill] sm:$0xff] }
 0x3e4   : > { %9526 = vst [vmem:[#allocation60_spill] sm:$0xff] %v7646_v29  ;;  %v2371_v28 = vadd.f32 %v7402_v10, %v9527_v17  ;;  %v2709_v10 = vadd.f32 %v7412_v15, %v9527_v17 }
 0x3e6   : > { %v2872_v52 = vpop.f32.mrf.mxu3 }
 0x3e7   : > { %v7624_v34 = vpop.f32.mrf.mxu0  ;;  %v2536_v11 = vpop.f32.mrf.mxu1  ;;  %v2873_v12 = vadd.f32 %v2872_v52, %v2704_v49  ;;  %v2373_v52 = vadd.f32 %v7410_v47, %v7168_v8  ;;  %v5862_v47 = vld [vmem:[%s9311_s5 + $0x184] sm:$0xf0] }
 0x3e8   : > { %v2537_v41 = vadd.f32 %v2536_v11, %v2368_v56  ;;  %v7644_v56 = vpop.f32.mrf.mxu2 }
 0x3e9   : > { %v3027_v11 = vmax.f32 %v2873_v12, 0.0 }
 0x3ea   : > { %v3028_v39 = vmax.f32 %v2537_v41, 0.0 }
 0x3ec   : > { %v3142_v19 = vpack.c.bf16 %v3028_v39, %v3026_v37 }
 0x3ee   : > { %v2874_v44 = vpop.f32.mrf.mxu3 }
 0x3ef   : > { %v2875_v31 = vadd.f32 %v2874_v44, %v2706_v9  ;;  %v7642_v53 = vpop.f32.mrf.mxu0  ;;  %v2539_v50 = vpop.f32.mrf.mxu1  ;;  %v5420_v44 = vld [vmem:[%s9311_s5 + $0x180] sm:$0xf] }
 0x3f0   : > { %9525 = vst [vmem:[#allocation59_spill] sm:$0xff] %v7642_v53  ;;  %v2540_v39 = vadd.f32 %v2539_v50, %v2371_v28  ;;  %v7656_v13 = vpop.f32.mrf.mxu2 }
 0x3f1   : > { %v3029_v41 = vmax.f32 %v2875_v31, 0.0  ;;  %v5358_v31 = vld [vmem:[%s9311_s5 + $0x108] sm:$0xf0] }
 0x3f2   : > { %2449 = vmatmul.bf16.gmra.mxu0 %v5413_v51  ;;  %2578 = vmatmul.bf16.gmra.mxu1 %v5353_v48  ;;  %v3030_v9 = vmax.f32 %v2540_v39, 0.0 }
 0x3f3   : > { %2787 = vmatmul.bf16.gmra.mxu2 %v5413_v51  ;;  %2916 = vmatmul.bf16.gmra.mxu3 %v5353_v48  ;;  %v7648_v37 = vpack.c.bf16 %v3029_v41, %v3027_v11  ;;  %v7661_v51 = vpop.permute.xlu0 %1928  ;;  %v5845_v48 = vld [vmem:[%s9311_s5 + $0x104] sm:$0xf]  ;;  %v1769_v11 = vpop.permute.xlu2 %1768  ;;  %v2711_v41 = vadd.f32 %v7433_v16, %v7168_v8 }
 0x3f4   : > { %9529 = vst [vmem:[#allocation61_spill] sm:$0xff] %v7661_v51  ;;  %v2376_v15 = vadd.f32 %v7429_v23, %v1769_v11  ;;  %v5361_v39 = vor.u32 %v5845_v48, %v5358_v31  ;;  %v2714_v16 = vadd.f32 %v7453_v40, %v1769_v11  ;;  %v5864_v40 = vld [vmem:[%s9311_s5 + $0x194] sm:$0xf0]  ;;  %v2381_v31 = vadd.f32 %v7460_v55, %v7618_v18 }
 0x3f5   : > { %v2719_v55 = vadd.f32 %v7490_v58, %v7618_v18  ;;  %v5849_v58 = vld [vmem:[%s9311_s5 + $0x124] sm:$0xf]  ;;  %v5374_v18 = vld [vmem:[%s9311_s5 + $0x128] sm:$0xf0] }
 0x3f6   : > { %v2877_v21 = vpop.f32.mrf.mxu3 }
 0x3f7   : > { %v7654_v49 = vpop.f32.mrf.mxu0  ;;  %v2541_v7 = vpop.f32.mrf.mxu1  ;;  %v2878_v28 = vadd.f32 %v2877_v21, %v2709_v10 }
 0x3f8   : > { %9528 = vst [vmem:[#allocation16_spill] sm:$0xff] %v7654_v49  ;;  %v2542_v35 = vadd.f32 %v2541_v7, %v2373_v52  ;;  %v5421_v52 = vor.u32 %v5862_v47, %v5420_v44  ;;  %v7679_v8 = vpop.f32.mrf.mxu2 }
 0x3f9   : > { %v3031_v49 = vmax.f32 %v2878_v28, 0.0 }
 0x3fa   : > { %v3032_v12 = vmax.f32 %v2542_v35, 0.0 }
 0x3fb   : > { %v1774_v23 = vpop.permute.xlu0 %1773 }
 0x3fc   : > { %v3144_v50 = vpack.c.bf16 %v3032_v12, %v3030_v9  ;;  %v2378_v21 = vadd.f32 %v7437_v63, %v1774_v23  ;;  %v5847_v63 = vld [vmem:[%s9311_s5 + $0x114] sm:$0xf] }
 0x3fe   : > { %v2879_v17 = vpop.f32.mrf.mxu3  ;;  %3770 = vmatpush.bf16.msra.mxu0 %v3144_v50 }
 0x3ff   : > { %v2880_v7 = vadd.f32 %v2879_v17, %v2711_v41  ;;  %v7677_v35 = vpop.f32.mrf.mxu0  ;;  %v2544_v51 = vpop.f32.mrf.mxu1 }
 0x400   : > { %v2545_v29 = vadd.f32 %v2544_v51, %v2376_v15  ;;  %v7704_v50 = vpop.f32.mrf.mxu2 }
 0x401   : > { %v3033_v53 = vmax.f32 %v2880_v7, 0.0 }
 0x402   : > { %2454 = vmatmul.bf16.gmra.mxu0 %v5421_v52  ;;  %2583 = vmatmul.bf16.gmra.mxu1 %v5361_v39  ;;  %v3034_v48 = vmax.f32 %v2545_v29, 0.0  ;;  %v2716_v29 = vadd.f32 %v7467_v46, %v1774_v23  ;;  %v9530_v23 = vld [vmem:[#allocation54_spill] sm:$0xff] }
 0x403   : > { %v3145_v9 = vpack.c.bf16 %v3033_v53, %v3031_v49  ;;  %2792 = vmatmul.bf16.gmra.mxu2 %v5421_v52  ;;  %2921 = vmatmul.bf16.gmra.mxu3 %v5361_v39  ;;  %v5428_v49 = vld [vmem:[%s9311_s5 + $0x190] sm:$0xf] }
 0x404   : > { %3771 = vmatpush.bf16.msra.mxu0 %v3142_v19  ;;  %v5366_v19 = vld [vmem:[%s9311_s5 + $0x118] sm:$0xf0]  ;;  %v5429_v41 = vor.u32 %v5864_v40, %v5428_v49  ;;  %v2721_v49 = vadd.f32 %v7500_v14, %v9530_v23 }
 0x405   : > { %v5369_v28 = vor.u32 %v5847_v63, %v5366_v19  ;;  %v9531_v40 = vld [vmem:[#allocation46_spill] sm:$0xff] }
 0x406   : > { %v2882_v12 = vpop.f32.mrf.mxu3  ;;  %v2386_v63 = vadd.f32 %v7488_v27, %v9531_v40  ;;  %v2724_v27 = vadd.f32 %v7524_v33, %v9531_v40  ;;  %v5868_v33 = vld [vmem:[%s9311_s5 + $0x1b4] sm:$0xf0] }
 0x407   : > { %v2883_v44 = vadd.f32 %v2882_v12, %v2714_v16  ;;  %v7683_v10 = vpop.f32.mrf.mxu0  ;;  %v2546_v51 = vpop.f32.mrf.mxu1  ;;  %v2383_v16 = vadd.f32 %v7469_v2, %v9530_v23  ;;  %v5866_v2 = vld [vmem:[%s9311_s5 + $0x1a4] sm:$0xf0] }
 0x408   : > { %3772 = vmatpush.bf16.msra.mxu0 %v7608_v59  ;;  %v2547_v47 = vadd.f32 %v2546_v51, %v2378_v21  ;;  %v7718_v51 = vpop.f32.mrf.mxu2 }
 0x40a   : > { %v3036_v53 = vmax.f32 %v2547_v47, 0.0 }
 0x40c   : > { %3773 = vmatpush.bf16.msra.mxu0 %v7576_v22  ;;  %v7699_v59 = vpack.c.bf16 %v3036_v53, %v3034_v48  ;;  %v3035_v22 = vmax.f32 %v2883_v44, 0.0 }
 0x40e   : > { %v2884_v11 = vpop.f32.mrf.mxu3 }
 0x40f   : > { %v2885_v15 = vadd.f32 %v2884_v11, %v2716_v29  ;;  %v7706_v17 = vpop.f32.mrf.mxu0  ;;  %v2549_v52 = vpop.f32.mrf.mxu1 }
 0x410   : > { %3774 = vmatpush.bf16.msra.mxu0 %v7544_v30  ;;  %v2550_v39 = vadd.f32 %v2549_v52, %v2381_v31  ;;  %v5377_v31 = vor.u32 %v5849_v58, %v5374_v18 }
 0x411   : > { %v3037_v7 = vmax.f32 %v2885_v15, 0.0 }
 0x412   : > { %2459 = vmatmul.bf16.gmra.mxu0 %v5429_v41  ;;  %2588 = vmatmul.bf16.gmra.mxu1 %v5369_v28  ;;  %v3038_v48 = vmax.f32 %v2550_v39, 0.0 }
 0x413   : > { %2797 = vmatmul.bf16.gmra.mxu2 %v5429_v41  ;;  %2926 = vmatmul.bf16.gmra.mxu3 %v5369_v28  ;;  %v7709_v46 = vpack.c.bf16 %v3037_v7, %v3035_v22 }
 0x414   : > { %3775 = vmatpush.bf16.msra.mxu0 %v7514_v61  ;;  %v5436_v61 = vld [vmem:[%s9311_s5 + $0x1a0] sm:$0xf] }
 0x415   : > { %v5437_v29 = vor.u32 %v5866_v2, %v5436_v61 }
 0x416   : > { %v2887_v21 = vpop.f32.mrf.mxu3 }
 0x417   : > { %v2888_v12 = vadd.f32 %v2887_v21, %v2719_v55  ;;  %v7716_v30 = vpop.f32.mrf.mxu0  ;;  %v2551_v44 = vpop.f32.mrf.mxu1 }
 0x418   : > { %3776 = vmatpush.bf16.msra.mxu0 %v7483_v25  ;;  %v2552_v47 = vadd.f32 %v2551_v44, %v2383_v16  ;;  %v5444_v44 = vld [vmem:[%s9311_s5 + $0x1b0] sm:$0xf] }
 0x419   : > { %v3039_v52 = vmax.f32 %v2888_v12, 0.0  ;;  %v5445_v58 = vor.u32 %v5868_v33, %v5444_v44 }
 0x41a   : > { %v3040_v53 = vmax.f32 %v2552_v47, 0.0 }
 0x41c   : > { %3777 = vmatpush.bf16.msra.mxu0 %v7455_v57  ;;  %v7734_v25 = vpack.c.bf16 %v3040_v53, %v3038_v48  ;;  %v7743_v57 = vpop.f32.mrf.mxu2  ;;  %v9533_v53 = vld [vmem:[#allocation41_spill] sm:$0xff] }
 0x41d   : > { %v2391_v61 = vadd.f32 %v7520_v62, %v9533_v53  ;;  %v2729_v62 = vadd.f32 %v7562_v54, %v9533_v53  ;;  %v5452_v54 = vld [vmem:[%s9311_s5 + $0x1c0] sm:$0xf] }
 0x41e   : > { %v2889_v19 = vpop.f32.mrf.mxu3 }
 0x41f   : > { %v2890_v11 = vadd.f32 %v2889_v19, %v2721_v49  ;;  %v7740_v41 = vpop.f32.mrf.mxu0  ;;  %v2554_v28 = vpop.f32.mrf.mxu1 }
 0x420   : > { %4126 = vmatpush.bf16.msrb.mxu0 %v3145_v9  ;;  %v2555_v15 = vadd.f32 %v2554_v28, %v2386_v63  ;;  %v9532_v9 = vld [vmem:[#allocation48_spill] sm:$0xff] }
 0x421   : > { %v3041_v39 = vmax.f32 %v2890_v11, 0.0  ;;  %v2388_v22 = vadd.f32 %v7498_v24, %v9532_v9  ;;  %v5851_v24 = vld [vmem:[%s9311_s5 + $0x134] sm:$0xf]  ;;  %v2726_v48 = vadd.f32 %v7550_v6, %v9532_v9  ;;  %v9535_v9 = vld [vmem:[#allocation58_spill] sm:$0xff] }
 0x422   : > { %2464 = vmatmul.bf16.gmra.mxu0 %v5437_v29  ;;  %2593 = vmatmul.bf16.gmra.mxu1 %v5377_v31  ;;  %v3042_v21 = vmax.f32 %v2555_v15, 0.0 }
 0x423   : > { %2802 = vmatmul.bf16.gmra.mxu2 %v5437_v29  ;;  %2931 = vmatmul.bf16.gmra.mxu3 %v5377_v31  ;;  %v7745_v14 = vpack.c.bf16 %v3041_v39, %v3039_v52 }
 0x424   : > { %4127 = vmatpush.bf16.msrb.mxu0 %v7648_v37  ;;  %v7767_v47 = vpop.f32.mrf.mxu2 }
 0x426   : > { %v2892_v7 = vpop.f32.mrf.mxu3 }
 0x427   : > { %v2893_v55 = vadd.f32 %v2892_v7, %v2724_v27  ;;  %v7752_v23 = vpop.f32.mrf.mxu0  ;;  %v2556_v37 = vpop.f32.mrf.mxu1 }
 0x428   : > { %4128 = vmatpush.bf16.msrb.mxu0 %v7614_v26  ;;  %v2557_v16 = vadd.f32 %v2556_v37, %v2388_v22  ;;  %v5382_v26 = vld [vmem:[%s9311_s5 + $0x138] sm:$0xf0] }
 0x429   : > { %v5385_v18 = vor.u32 %v5851_v24, %v5382_v26  ;;  %v3043_v29 = vmax.f32 %v2893_v55, 0.0  ;;  %v5390_v55 = vld [vmem:[%s9311_s5 + $0x148] sm:$0xf0] }
 0x42a   : > { %v3044_v12 = vmax.f32 %v2557_v16, 0.0 }
 0x42c   : > { %4129 = vmatpush.bf16.msrb.mxu0 %v7584_v5  ;;  %v7769_v5 = vpack.c.bf16 %v3044_v12, %v3042_v21  ;;  %v7786_v28 = vpop.f32.mrf.mxu2  ;;  %v9536_v21 = vld [vmem:[#allocation44_spill] sm:$0xff] }
 0x42d   : > { %v2396_v12 = vadd.f32 %v7552_v32, %v9536_v21  ;;  %v2734_v32 = vadd.f32 %v7606_v4, %v9536_v21  ;;  %v5872_v4 = vld [vmem:[%s9311_s5 + $0x1d4] sm:$0xf0] }
 0x42e   : > { %v2894_v2 = vpop.f32.mrf.mxu3 }
 0x42f   : > { %v2895_v49 = vadd.f32 %v2894_v2, %v2726_v48  ;;  %v7776_v40 = vpop.f32.mrf.mxu0  ;;  %v2559_v63 = vpop.f32.mrf.mxu1 }
 0x430   : > { %4130 = vmatpush.bf16.msrb.mxu0 %v7554_v38  ;;  %v2560_v19 = vadd.f32 %v2559_v63, %v2391_v61  ;;  %v9534_v38 = vld [vmem:[#allocation52_spill] sm:$0xff] }
 0x431   : > { %v3045_v31 = vmax.f32 %v2895_v49, 0.0  ;;  %v2393_v11 = vadd.f32 %v7530_v60, %v9534_v38  ;;  %v5853_v60 = vld [vmem:[%s9311_s5 + $0x144] sm:$0xf]  ;;  %v2731_v16 = vadd.f32 %v7582_v36, %v9534_v38  ;;  %v9537_v49 = vld [vmem:[#allocation36_spill] sm:$0xff] }
 0x432   : > { %2469 = vmatmul.bf16.gmra.mxu0 %v5445_v58  ;;  %2598 = vmatmul.bf16.gmra.mxu1 %v5385_v18  ;;  %v3046_v22 = vmax.f32 %v2560_v19, 0.0  ;;  %v5393_v24 = vor.u32 %v5853_v60, %v5390_v55  ;;  %v2398_v63 = vadd.f32 %v7560_v45, %v9537_v49  ;;  %v5855_v45 = vld [vmem:[%s9311_s5 + $0x154] sm:$0xf] }
 0x433   : > { %2807 = vmatmul.bf16.gmra.mxu2 %v5445_v58  ;;  %2936 = vmatmul.bf16.gmra.mxu3 %v5385_v18  ;;  %v7779_v6 = vpack.c.bf16 %v3045_v31, %v3043_v29 }
 0x434   : > { %4131 = vmatpush.bf16.msrb.mxu0 %v7522_v1  ;;  %v7811_v61 = vpop.f32.mrf.mxu2 }
 0x436   : > { %v2897_v15 = vpop.f32.mrf.mxu3 }
 0x437   : > { %v2898_v52 = vadd.f32 %v2897_v15, %v2729_v62  ;;  %v7788_v39 = vpop.f32.mrf.mxu0  ;;  %v2561_v1 = vpop.f32.mrf.mxu1 }
 0x438   : > { %4132 = vmatpush.bf16.msrb.mxu0 %v7492_v20  ;;  %v2562_v27 = vadd.f32 %v2561_v1, %v2393_v11  ;;  %v5870_v20 = vld [vmem:[%s9311_s5 + $0x1c4] sm:$0xf0]  ;;  %v5460_v1 = vld [vmem:[%s9311_s5 + $0x1d0] sm:$0xf] }
 0x439   : > { %v5453_v33 = vor.u32 %v5870_v20, %v5452_v54  ;;  %v3047_v58 = vmax.f32 %v2898_v52, 0.0  ;;  %v5461_v54 = vor.u32 %v5872_v4, %v5460_v1 }
 0x43a   : > { %v3048_v7 = vmax.f32 %v2562_v27, 0.0  ;;  %v5398_v27 = vld [vmem:[%s9311_s5 + $0x158] sm:$0xf0] }
 0x43b   : > { %v5401_v20 = vor.u32 %v5855_v45, %v5398_v27 }
 0x43c   : > { %4133 = vmatpush.bf16.msrb.mxu0 %v9535_v9  ;;  %v7803_v37 = vpack.c.bf16 %v3048_v7, %v3046_v22  ;;  %v7821_v11 = vpop.f32.mrf.mxu2  ;;  %v2736_v22 = vadd.f32 %v7622_v3, %v9537_v49  ;;  %v9539_v3 = vld [vmem:[#allocation30_spill] sm:$0xff] }
 0x43e   : > { %v2899_v44 = vpop.f32.mrf.mxu3 }
 0x43f   : > { %v2900_v26 = vadd.f32 %v2899_v44, %v2731_v16  ;;  %v7809_v48 = vpop.f32.mrf.mxu0  ;;  %v2564_v53 = vpop.f32.mrf.mxu1 }
 0x440   : > { %v2565_v2 = vadd.f32 %v2564_v53, %v2396_v12  ;;  %v2403_v53 = vadd.f32 %v7590_v0, %v9539_v3  ;;  %v5857_v0 = vld [vmem:[%s9311_s5 + $0x164] sm:$0xf] }
 0x441   : > { %v3049_v18 = vmax.f32 %v2900_v26, 0.0 }
 0x442   : > { %2474 = vmatmul.bf16.gmra.mxu0 %v5453_v33  ;;  %2603 = vmatmul.bf16.gmra.mxu1 %v5393_v24  ;;  %v3050_v15 = vmax.f32 %v2565_v2, 0.0 }
 0x443   : > { %2812 = vmatmul.bf16.gmra.mxu2 %v5453_v33  ;;  %2941 = vmatmul.bf16.gmra.mxu3 %v5393_v24  ;;  %v7813_v36 = vpack.c.bf16 %v3049_v18, %v3047_v58  ;;  %v9538_v33 = vld [vmem:[#allocation28_spill] sm:$0xff] }
 0x444   : > { %v2401_v24 = vadd.f32 %v7580_v42, %v9538_v33  ;;  %v7845_v26 = vpop.f32.mrf.mxu2  ;;  %v2739_v42 = vadd.f32 %v7644_v56, %v9538_v33 }
 0x446   : > { %v2902_v19 = vpop.f32.mrf.mxu3 }
 0x447   : > { %v2903_v29 = vadd.f32 %v2902_v19, %v2734_v32  ;;  %v7819_v31 = vpop.f32.mrf.mxu0  ;;  %v2566_v62 = vpop.f32.mrf.mxu1 }
 0x448   : > { %v2567_v38 = vadd.f32 %v2566_v62, %v2398_v63  ;;  %v5874_v62 = vld [vmem:[%s9311_s5 + $0x1e4] sm:$0xf0] }
 0x449   : > { %v3051_v21 = vmax.f32 %v2903_v29, 0.0  ;;  %v5468_v29 = vld [vmem:[%s9311_s5 + $0x1e0] sm:$0xf] }
 0x44a   : > { %v3052_v52 = vmax.f32 %v2567_v38, 0.0  ;;  %v5406_v38 = vld [vmem:[%s9311_s5 + $0x168] sm:$0xf0]  ;;  %v5469_v45 = vor.u32 %v5874_v62, %v5468_v29  ;;  %v5859_v29 = vld [vmem:[%s9311_s5 + $0x174] sm:$0xf] }
 0x44b   : > { %v5409_v27 = vor.u32 %v5857_v0, %v5406_v38 }
 0x44c   : > { %v7835_v9 = vpack.c.bf16 %v3052_v52, %v3050_v15  ;;  %v2741_v52 = vadd.f32 %v7656_v13, %v9539_v3  ;;  %v7869_v4 = vpop.f32.mrf.mxu2 }
 0x44e   : > { %v2904_v7 = vpop.f32.mrf.mxu3 }
 0x44f   : > { %v2905_v60 = vadd.f32 %v2904_v7, %v2736_v22  ;;  %v7839_v55 = vpop.f32.mrf.mxu0  ;;  %v2569_v16 = vpop.f32.mrf.mxu1 }
 0x450   : > { %v2570_v2 = vadd.f32 %v2569_v16, %v2401_v24 }
 0x451   : > { %v3053_v12 = vmax.f32 %v2905_v60, 0.0 }
 0x452   : > { %2479 = vmatmul.bf16.gmra.mxu0 %v5461_v54  ;;  %2608 = vmatmul.bf16.gmra.mxu1 %v5401_v20  ;;  %v3054_v63 = vmax.f32 %v2570_v2, 0.0 }
 0x453   : > { %2817 = vmatmul.bf16.gmra.mxu2 %v5461_v54  ;;  %2946 = vmatmul.bf16.gmra.mxu3 %v5401_v20  ;;  %v7841_v44 = vpack.c.bf16 %v3053_v12, %v3051_v21  ;;  %v9540_v21 = vld [vmem:[#allocation23_spill] sm:$0xff]  ;;  %v9541_v12 = vld [vmem:[#allocation34_spill] sm:$0xff] }
 0x454   : > { %v2406_v13 = vadd.f32 %v7612_v43, %v9540_v21  ;;  %v2408_v33 = vadd.f32 %v7624_v34, %v9541_v12  ;;  %v2744_v43 = vadd.f32 %v7679_v8, %v9540_v21  ;;  %v5876_v34 = vld [vmem:[%s9311_s5 + $0x1f4] sm:$0xf0]  ;;  %v2746_v0 = vadd.f32 %v7704_v50, %v9541_v12  ;;  %v9542_v21 = vld [vmem:[#allocation26_spill] sm:$0xff]  ;;  %v9543_v50 = vld [vmem:[#allocation59_spill] sm:$0xff] }
 0x455   : > { %v9544_v12 = vld [vmem:[#allocation19_spill] sm:$0xff] }
 0x456   : > { %v2907_v58 = vpop.f32.mrf.mxu3 }
 0x457   : > { %v7849_v18 = vpop.f32.mrf.mxu0  ;;  %v2571_v32 = vpop.f32.mrf.mxu1  ;;  %v2908_v1 = vadd.f32 %v2907_v58, %v2739_v42  ;;  %v5414_v42 = vld [vmem:[%s9311_s5 + $0x178] sm:$0xf0] }
 0x458   : > { %v2572_v49 = vadd.f32 %v2571_v32, %v2403_v53  ;;  %v7881_v32 = vpop.f32.mrf.mxu2  ;;  %v5417_v8 = vor.u32 %v5859_v29, %v5414_v42  ;;  %v2749_v29 = vadd.f32 %v7718_v51, %v9542_v21  ;;  %v5422_v42 = vld [vmem:[%s9311_s5 + $0x188] sm:$0xf0] }
 0x459   : > { %v3055_v20 = vmax.f32 %v2908_v1, 0.0 }
 0x45a   : > { %v3056_v19 = vmax.f32 %v2572_v49, 0.0 }
 0x45c   : > { %v7865_v15 = vpack.c.bf16 %v3056_v19, %v3054_v63  ;;  %v5476_v19 = vld [vmem:[%s9311_s5 + $0x1f0] sm:$0xf] }
 0x45d   : > { %v5477_v1 = vor.u32 %v5876_v34, %v5476_v19  ;;  %v5861_v34 = vld [vmem:[%s9311_s5 + $0x184] sm:$0xf] }
 0x45e   : > { %v2909_v56 = vpop.f32.mrf.mxu3 }
 0x45f   : > { %v2910_v22 = vadd.f32 %v2909_v56, %v2741_v52  ;;  %v7871_v7 = vpop.f32.mrf.mxu0  ;;  %v2574_v54 = vpop.f32.mrf.mxu1 }
 0x460   : > { %v2575_v24 = vadd.f32 %v2574_v54, %v2406_v13  ;;  %v2411_v13 = vadd.f32 %v9543_v50, %v9542_v21 }
 0x461   : > { %v3057_v60 = vmax.f32 %v2910_v22, 0.0 }
 0x462   : > { %2484 = vmatmul.bf16.gmra.mxu0 %v5469_v45  ;;  %2613 = vmatmul.bf16.gmra.mxu1 %v5409_v27  ;;  %v3058_v49 = vmax.f32 %v2575_v24, 0.0 }
 0x463   : > { %2822 = vmatmul.bf16.gmra.mxu2 %v5469_v45  ;;  %2951 = vmatmul.bf16.gmra.mxu3 %v5409_v27  ;;  %v7873_v16 = vpack.c.bf16 %v3057_v60, %v3055_v20  ;;  %v7901_v20 = vpop.f32.mrf.mxu2 }
 0x466   : > { %v2912_v3 = vpop.f32.mrf.mxu3 }
 0x467   : > { %v7879_v53 = vpop.f32.mrf.mxu0  ;;  %v2576_v2 = vpop.f32.mrf.mxu1  ;;  %v2913_v38 = vadd.f32 %v2912_v3, %v2744_v43 }
 0x468   : > { %v2577_v58 = vadd.f32 %v2576_v2, %v2408_v33  ;;  %v9545_v33 = vld [vmem:[#allocation16_spill] sm:$0xff] }
 0x469   : > { %v3059_v22 = vmax.f32 %v2913_v38, 0.0  ;;  %v2413_v24 = vadd.f32 %v9545_v33, %v9544_v12  ;;  %v5879_v38 = vld [vmem:[#allocation4 + $0xc] sm:$0xf0] }
 0x46a   : > { %v3060_v63 = vmax.f32 %v2577_v58, 0.0 }
 0x46c   : > { %v3158_v62 = vpack.c.bf16 %v3060_v63, %v3058_v49 }
 0x46e   : > { %v2914_v52 = vpop.f32.mrf.mxu3 }
 0x46f   : > { %v2915_v56 = vadd.f32 %v2914_v52, %v2746_v0  ;;  %v7899_v45 = vpop.f32.mrf.mxu0  ;;  %v2579_v27 = vpop.f32.mrf.mxu1  ;;  %v5484_v0 = vld [vmem:[#allocation4] sm:$0xf] }
 0x470   : > { %v2580_v3 = vadd.f32 %v2579_v27, %v2411_v13  ;;  %v7923_v50 = vor.u32 %v5879_v38, %v5484_v0  ;;  %v5883_v0 = vld [vmem:[#allocation4 + $0x2c] sm:$0xf0] }
 0x471   : > { %v3061_v54 = vmax.f32 %v2915_v56, 0.0  ;;  %v9546_v56 = vld [vmem:[#allocation55_spill] sm:$0xff] }
 0x472   : > { %2489 = vmatmul.bf16.gmra.mxu0 %v5477_v1  ;;  %2618 = vmatmul.bf16.gmra.mxu1 %v5417_v8  ;;  %v3062_v19 = vmax.f32 %v2580_v3, 0.0  ;;  %v2416_v27 = vadd.f32 %v7677_v35, %v9546_v56  ;;  %9547 = vst [vmem:[#allocation54_spill] sm:$0xff] %v7923_v50  ;;  %v2754_v35 = vadd.f32 %v7767_v47, %v9546_v56  ;;  %v5500_v47 = vld [vmem:[#allocation4 + $0x20] sm:$0xf] }
 0x473   : > { %2827 = vmatmul.bf16.gmra.mxu2 %v5477_v1  ;;  %2956 = vmatmul.bf16.gmra.mxu3 %v5417_v8  ;;  %v7903_v60 = vpack.c.bf16 %v3061_v54, %v3059_v22  ;;  %v2751_v1 = vadd.f32 %v7743_v57, %v9544_v12  ;;  %v5425_v54 = vor.u32 %v5861_v34, %v5422_v42  ;;  %v9548_v12 = vld [vmem:[#allocation60_spill] sm:$0xff] }
 0x476   : > { %v2917_v2 = vpop.f32.mrf.mxu3 }
 0x477   : > { %v7909_v58 = vpop.f32.mrf.mxu0  ;;  %v2581_v49 = vpop.f32.mrf.mxu1  ;;  %v2918_v8 = vadd.f32 %v2917_v2, %v2749_v29  ;;  %v2418_v2 = vadd.f32 %v7683_v10, %v9548_v12  ;;  %v5430_v10 = vld [vmem:[%s9311_s5 + $0x198] sm:$0xf0] }
 0x478   : > { %v2582_v63 = vadd.f32 %v2581_v49, %v2413_v24 }
 0x479   : > { %v3063_v24 = vmax.f32 %v2918_v8, 0.0 }
 0x47a   : > { %v3064_v43 = vmax.f32 %v2582_v63, 0.0 }
 0x47c   : > { %v3160_v52 = vpack.c.bf16 %v3064_v43, %v3062_v19 }
 0x47e   : > { %v2919_v22 = vpop.f32.mrf.mxu3  ;;  %3859 = vmatpush.bf16.msra.mxu1 %v3160_v52  ;;  %v9549_v52 = vld [vmem:[#allocation57_spill] sm:$0xff] }
 0x47f   : > { %v2920_v51 = vadd.f32 %v2919_v22, %v2751_v1  ;;  %v7925_v21 = vpop.f32.mrf.mxu0  ;;  %v2584_v13 = vpop.f32.mrf.mxu1  ;;  %v2421_v1 = vadd.f32 %v7706_v17, %v9549_v52 }
 0x480   : > { %v2585_v33 = vadd.f32 %v2584_v13, %v2416_v27  ;;  %v7948_v27 = vor.u32 %v5883_v0, %v5500_v47 }
 0x481   : > { %v3065_v3 = vmax.f32 %v2920_v51, 0.0 }
 0x482   : > { %2623 = vmatmul.bf16.gmra.mxu1 %v5425_v54  ;;  %3778 = vmatmul.bf16.vlgmr.msra.gmra.mxu0 %v7923_v50  ;;  %v3066_v29 = vmax.f32 %v2585_v33, 0.0  ;;  %9550 = vst [vmem:[#allocation46_spill] sm:$0xff] %v7948_v27  ;;  %v5877_v50 = vld [vmem:[#allocation4 + $0x4] sm:$0xf] }
 0x483   : > { %v3161_v57 = vpack.c.bf16 %v3065_v3, %v3063_v24  ;;  %2961 = vmatmul.bf16.gmra.mxu3 %v5425_v54  ;;  %3860 = vmatpush.bf16.msra.mxu1 %v3158_v62  ;;  %v5863_v62 = vld [vmem:[%s9311_s5 + $0x194] sm:$0xf] }
 0x484   : > { %v5433_v56 = vor.u32 %v5863_v62, %v5430_v10  ;;  %v9551_v24 = vld [vmem:[#allocation49_spill] sm:$0xff] }
 0x486   : > { %v2922_v49 = vpop.f32.mrf.mxu3 }
 0x487   : > { %v2923_v63 = vadd.f32 %v2922_v49, %v2754_v35  ;;  %3861 = vmatpush.bf16.msra.mxu1 %v7865_v15  ;;  %v7933_v19 = vpop.f32.mrf.mxu0  ;;  %v2586_v43 = vpop.f32.mrf.mxu1  ;;  %v2756_v15 = vadd.f32 %v7786_v28, %v9548_v12  ;;  %v2759_v28 = vadd.f32 %v7811_v61, %v9549_v52  ;;  %v5516_v61 = vld [vmem:[#allocation4 + $0x40] sm:$0xf] }
 0x488   : > { %v2587_v34 = vadd.f32 %v2586_v43, %v2418_v2 }
 0x489   : > { %v3067_v13 = vmax.f32 %v2923_v63, 0.0 }
 0x48a   : > { %v3068_v42 = vmax.f32 %v2587_v34, 0.0  ;;  %v5887_v34 = vld [vmem:[#allocation4 + $0x4c] sm:$0xf0] }
 0x48b   : > { %3862 = vmatpush.bf16.msra.mxu1 %v7835_v9  ;;  %v7977_v0 = vor.u32 %v5887_v34, %v5516_v61 }
 0x48c   : > { %v7942_v38 = vpack.c.bf16 %v3068_v42, %v3066_v29  ;;  %v2761_v29 = vadd.f32 %v7821_v11, %v9551_v24  ;;  %v9552_v42 = vld [vmem:[#allocation42_spill] sm:$0xff] }
 0x48d   : > { %v2426_v62 = vadd.f32 %v7740_v41, %v9552_v42  ;;  %9553 = vst [vmem:[#allocation48_spill] sm:$0xff] %v7977_v0  ;;  %v2764_v11 = vadd.f32 %v7845_v26, %v9552_v42  ;;  %v5446_v26 = vld [vmem:[%s9311_s5 + $0x1b8] sm:$0xf0] }
 0x48e   : > { %v2924_v8 = vpop.f32.mrf.mxu3 }
 0x48f   : > { %v2925_v22 = vadd.f32 %v2924_v8, %v2756_v15  ;;  %3863 = vmatpush.bf16.msra.mxu1 %v7803_v37  ;;  %v7951_v9 = vpop.f32.mrf.mxu0  ;;  %v2589_v54 = vpop.f32.mrf.mxu1  ;;  %v2423_v37 = vadd.f32 %v7716_v30, %v9551_v24  ;;  %v5438_v30 = vld [vmem:[%s9311_s5 + $0x1a8] sm:$0xf0] }
 0x490   : > { %v2590_v51 = vadd.f32 %v2589_v54, %v2421_v1 }
 0x491   : > { %v3069_v33 = vmax.f32 %v2925_v22, 0.0  ;;  %v9554_v22 = vld [vmem:[#allocation43_spill] sm:$0xff] }
 0x492   : > { %2628 = vmatmul.bf16.gmra.mxu1 %v5433_v56  ;;  %3783 = vmatmul.bf16.gmra.mxu0 %v7948_v27  ;;  %v3070_v63 = vmax.f32 %v2590_v51, 0.0  ;;  %v2428_v54 = vadd.f32 %v7752_v23, %v9554_v22  ;;  %v5891_v23 = vld [vmem:[#allocation4 + $0x6c] sm:$0xf0] }
 0x493   : > { %2966 = vmatmul.bf16.gmra.mxu3 %v5433_v56  ;;  %3864 = vmatpush.bf16.msra.mxu1 %v7769_v5  ;;  %v7955_v17 = vpack.c.bf16 %v3069_v33, %v3067_v13  ;;  %v5865_v5 = vld [vmem:[%s9311_s5 + $0x1a4] sm:$0xf]  ;;  %v7982_v56 = vpop.f32.mrf.mxu2  ;;  %v5911_v27 = vld [vmem:[#allocation4 + $0x10c] sm:$0xf0] }
 0x494   : > { %v5441_v47 = vor.u32 %v5865_v5, %v5438_v30 }
 0x496   : > { %v2927_v3 = vpop.f32.mrf.mxu3 }
 0x497   : > { %v2928_v35 = vadd.f32 %v2927_v3, %v2759_v28  ;;  %3865 = vmatpush.bf16.msra.mxu1 %v7734_v25  ;;  %v7962_v12 = vpop.f32.mrf.mxu0  ;;  %v2591_v2 = vpop.f32.mrf.mxu1  ;;  %v5532_v3 = vld [vmem:[#allocation4 + $0x60] sm:$0xf] }
 0x498   : > { %v2592_v49 = vadd.f32 %v2591_v2, %v2423_v37  ;;  %v8010_v30 = vor.u32 %v5891_v23, %v5532_v3 }
 0x49a   : > { %v3072_v43 = vmax.f32 %v2592_v49, 0.0  ;;  %v9555_v49 = vld [vmem:[#allocation37_spill] sm:$0xff]  ;;  %9556 = vst [vmem:[#allocation41_spill] sm:$0xff] %v8010_v30 }
 0x49b   : > { %3866 = vmatpush.bf16.msra.mxu1 %v7699_v59 }
 0x49c   : > { %v7971_v25 = vpack.c.bf16 %v3072_v43, %v3070_v63  ;;  %v2431_v63 = vadd.f32 %v7776_v40, %v9555_v49  ;;  %v2769_v40 = vadd.f32 %v7881_v32, %v9555_v49  ;;  %v5548_v32 = vld [vmem:[#allocation4 + $0x80] sm:$0xf] }
 0x49e   : > { %v2929_v10 = vpop.f32.mrf.mxu3 }
 0x49f   : > { %4215 = vmatpush.bf16.msrb.mxu1 %v3161_v57  ;;  %v2930_v59 = vadd.f32 %v2929_v10, %v2761_v29  ;;  %v7979_v15 = vpop.f32.mrf.mxu0  ;;  %v2594_v52 = vpop.f32.mrf.mxu1  ;;  %v3071_v57 = vmax.f32 %v2928_v35, 0.0  ;;  %v9557_v10 = vld [vmem:[#allocation47_spill] sm:$0xff] }
 0x4a0   : > { %v2595_v1 = vadd.f32 %v2594_v52, %v2426_v62  ;;  %v8001_v35 = vpop.f32.mrf.mxu2 }
 0x4a1   : > { %v3073_v8 = vmax.f32 %v2930_v59, 0.0 }
 0x4a2   : > { %2633 = vmatmul.bf16.gmra.mxu1 %v5441_v47  ;;  %3788 = vmatmul.bf16.gmra.mxu0 %v7977_v0  ;;  %v3074_v24 = vmax.f32 %v2595_v1, 0.0  ;;  %v5612_v0 = vld [vmem:[#allocation4 + $0x100] sm:$0xf] }
 0x4a3   : > { %4216 = vmatpush.bf16.msrb.mxu1 %v7903_v60  ;;  %2971 = vmatmul.bf16.gmra.mxu3 %v5441_v47  ;;  %v7985_v41 = vpack.c.bf16 %v3073_v8, %v3071_v57  ;;  %v2433_v47 = vadd.f32 %v7788_v39, %v9557_v10  ;;  %v5454_v39 = vld [vmem:[%s9311_s5 + $0x1c8] sm:$0xf0] }
 0x4a6   : > { %v2932_v51 = vpop.f32.mrf.mxu3 }
 0x4a7   : > { %4217 = vmatpush.bf16.msrb.mxu1 %v7873_v16  ;;  %v2933_v60 = vadd.f32 %v2932_v51, %v2764_v11  ;;  %v7992_v13 = vpop.f32.mrf.mxu0  ;;  %v2596_v33 = vpop.f32.mrf.mxu1  ;;  %v5867_v16 = vld [vmem:[%s9311_s5 + $0x1b4] sm:$0xf] }
 0x4a8   : > { %v2597_v28 = vadd.f32 %v2596_v33, %v2428_v54  ;;  %v5449_v5 = vor.u32 %v5867_v16, %v5446_v26  ;;  %v8023_v59 = vpop.f32.mrf.mxu2  ;;  %v5895_v54 = vld [vmem:[#allocation4 + $0x8c] sm:$0xf0] }
 0x4a9   : > { %v9558_v33 = vld [vmem:[#allocation40_spill] sm:$0xff] }
 0x4aa   : > { %v3076_v37 = vmax.f32 %v2597_v28, 0.0 }
 0x4ab   : > { %4218 = vmatpush.bf16.msrb.mxu1 %v7841_v44  ;;  %v2766_v44 = vadd.f32 %v7869_v4, %v9554_v22 }
 0x4ac   : > { %v8004_v2 = vpack.c.bf16 %v3076_v37, %v3074_v24  ;;  %v8040_v37 = vor.u32 %v5895_v54, %v5548_v32  ;;  %v9562_v32 = vld [vmem:[#allocation24_spill] sm:$0xff] }
 0x4ad   : > { %v2441_v54 = vadd.f32 %v7839_v55, %v9562_v32  ;;  %v5470_v55 = vld [vmem:[%s9311_s5 + $0x1e8] sm:$0xf0] }
 0x4ae   : > { %v2934_v43 = vpop.f32.mrf.mxu3  ;;  %9559 = vst [vmem:[#allocation52_spill] sm:$0xff] %v8040_v37 }
 0x4af   : > { %4219 = vmatpush.bf16.msrb.mxu1 %v7813_v36  ;;  %v2935_v61 = vadd.f32 %v2934_v43, %v2766_v44  ;;  %v8012_v34 = vpop.f32.mrf.mxu0  ;;  %v2599_v29 = vpop.f32.mrf.mxu1  ;;  %v3075_v36 = vmax.f32 %v2933_v60, 0.0  ;;  %v2771_v60 = vadd.f32 %v7901_v20, %v9557_v10  ;;  %v9560_v43 = vld [vmem:[#allocation31_spill] sm:$0xff] }
 0x4b0   : > { %v2600_v42 = vadd.f32 %v2599_v29, %v2431_v63  ;;  %v8044_v23 = vpop.f32.mrf.mxu2 }
 0x4b1   : > { %v3077_v62 = vmax.f32 %v2935_v61, 0.0 }
 0x4b2   : > { %2638 = vmatmul.bf16.gmra.mxu1 %v5449_v5  ;;  %3793 = vmatmul.bf16.gmra.mxu0 %v8010_v30  ;;  %v3078_v11 = vmax.f32 %v2600_v42, 0.0 }
 0x4b3   : > { %4220 = vmatpush.bf16.msrb.mxu1 %v7779_v6  ;;  %2976 = vmatmul.bf16.gmra.mxu3 %v5449_v5  ;;  %v8016_v4 = vpack.c.bf16 %v3077_v62, %v3075_v36  ;;  %v2438_v5 = vadd.f32 %v7819_v31, %v9560_v43  ;;  %v5564_v31 = vld [vmem:[#allocation4 + $0xa0] sm:$0xf] }
 0x4b6   : > { %v2937_v52 = vpop.f32.mrf.mxu3 }
 0x4b7   : > { %4221 = vmatpush.bf16.msrb.mxu1 %v7745_v14  ;;  %v2938_v6 = vadd.f32 %v2937_v52, %v2769_v40  ;;  %v8025_v1 = vpop.f32.mrf.mxu0  ;;  %v2601_v57 = vpop.f32.mrf.mxu1  ;;  %v5869_v14 = vld [vmem:[%s9311_s5 + $0x1c4] sm:$0xf]  ;;  %v5871_v52 = vld [vmem:[%s9311_s5 + $0x1d4] sm:$0xf] }
 0x4b8   : > { %v2602_v8 = vadd.f32 %v2601_v57, %v2433_v47  ;;  %v5457_v24 = vor.u32 %v5869_v14, %v5454_v39  ;;  %v8057_v40 = vpop.f32.mrf.mxu2 }
 0x4b9   : > { %v3079_v49 = vmax.f32 %v2938_v6, 0.0  ;;  %v5899_v6 = vld [vmem:[#allocation4 + $0xac] sm:$0xf0] }
 0x4ba   : > { %v3080_v22 = vmax.f32 %v2602_v8, 0.0 }
 0x4bb   : > { %4222 = vmatpush.bf16.msrb.mxu1 %v7709_v46  ;;  %v2436_v46 = vadd.f32 %v7809_v48, %v9558_v33  ;;  %v2774_v48 = vadd.f32 %v7982_v56, %v9558_v33  ;;  %v5462_v56 = vld [vmem:[%s9311_s5 + $0x1d8] sm:$0xf0] }
 0x4bc   : > { %v8034_v51 = vpack.c.bf16 %v3080_v22, %v3078_v11  ;;  %v5465_v11 = vor.u32 %v5871_v52, %v5462_v56  ;;  %v8069_v22 = vor.u32 %v5899_v6, %v5564_v31  ;;  %v9563_v33 = vld [vmem:[#allocation25_spill] sm:$0xff]  ;;  %v9566_v31 = vld [vmem:[#allocation20_spill] sm:$0xff] }
 0x4bd   : > { %v2446_v6 = vadd.f32 %v7871_v7, %v9566_v31  ;;  %v5478_v7 = vld [vmem:[%s9311_s5 + $0x1f8] sm:$0xf0] }
 0x4be   : > { %v2939_v28 = vpop.f32.mrf.mxu3  ;;  %9561 = vst [vmem:[#allocation58_spill] sm:$0xff] %v8069_v22 }
 0x4bf   : > { %v2940_v16 = vadd.f32 %v2939_v28, %v2771_v60  ;;  %v8042_v26 = vpop.f32.mrf.mxu0  ;;  %v2604_v3 = vpop.f32.mrf.mxu1 }
 0x4c0   : > { %v2605_v44 = vadd.f32 %v2604_v3, %v2436_v46  ;;  %v8076_v60 = vpop.f32.mrf.mxu2  ;;  %v2443_v46 = vadd.f32 %v7849_v18, %v9563_v33 }
 0x4c1   : > { %v3081_v63 = vmax.f32 %v2940_v16, 0.0 }
 0x4c2   : > { %2643 = vmatmul.bf16.gmra.mxu1 %v5457_v24  ;;  %3798 = vmatmul.bf16.gmra.mxu0 %v8040_v37  ;;  %v3082_v10 = vmax.f32 %v2605_v44, 0.0 }
 0x4c3   : > { %2981 = vmatmul.bf16.gmra.mxu3 %v5457_v24  ;;  %v8047_v20 = vpack.c.bf16 %v3081_v63, %v3079_v49 }
 0x4c6   : > { %v2942_v61 = vpop.f32.mrf.mxu3 }
 0x4c7   : > { %v8053_v29 = vadd.f32 %v2942_v61, %v2774_v48  ;;  %v8055_v42 = vpop.f32.mrf.mxu0  ;;  %v2606_v36 = vpop.f32.mrf.mxu1  ;;  %v5873_v48 = vld [vmem:[%s9311_s5 + $0x1e4] sm:$0xf]  ;;  %v5903_v61 = vld [vmem:[#allocation4 + $0xcc] sm:$0xf0] }
 0x4c8   : > { %v2607_v62 = vadd.f32 %v2606_v36, %v2438_v5  ;;  %v5580_v5 = vld [vmem:[#allocation4 + $0xc0] sm:$0xf]  ;;  %v8092_v36 = vpop.f32.mrf.mxu2 }
 0x4ca   : > { %v3084_v47 = vmax.f32 %v2607_v62, 0.0 }
 0x4cc   : > { %v8065_v57 = vpack.c.bf16 %v3084_v47, %v3082_v10  ;;  %v5473_v10 = vor.u32 %v5873_v48, %v5470_v55  ;;  %v8096_v47 = vor.u32 %v5903_v61, %v5580_v5  ;;  %v5875_v55 = vld [vmem:[%s9311_s5 + $0x1f4] sm:$0xf] }
 0x4cd   : > { %v5907_v5 = vld [vmem:[#allocation4 + $0xec] sm:$0xf0] }
 0x4ce   : > { %v8067_v8 = vpop.f32.mrf.mxu3  ;;  %9564 = vst [vmem:[#allocation44_spill] sm:$0xff] %v8096_v47 }
 0x4cf   : > { %v8071_v14 = vpop.f32.mrf.mxu0  ;;  %v2609_v39 = vpop.f32.mrf.mxu1 }
 0x4d0   : > { %v2610_v28 = vadd.f32 %v2609_v39, %v2441_v54 }
 0x4d2   : > { %2648 = vmatmul.bf16.gmra.mxu1 %v5465_v11  ;;  %3803 = vmatmul.bf16.gmra.mxu0 %v8069_v22  ;;  %v3086_v49 = vmax.f32 %v2610_v28, 0.0  ;;  %v9572_v22 = vld [vmem:[#allocation15_spill] sm:$0xff] }
 0x4d3   : > { %2986 = vmatmul.bf16.gmra.mxu3 %v5465_v11  ;;  %v9567_v11 = vld [vmem:[#allocation29_spill] sm:$0xff]  ;;  %v2453_v37 = vadd.f32 %v7909_v58, %v9572_v22  ;;  %v8134_v58 = vor.u32 %v5911_v27, %v5612_v0 }
 0x4d4   : > { %v2448_v39 = vadd.f32 %v7879_v53, %v9567_v11  ;;  %v5596_v53 = vld [vmem:[#allocation4 + $0xe0] sm:$0xf] }
 0x4d5   : > { %9574 = vst [vmem:[#allocation34_spill] sm:$0xff] %v8134_v58 }
 0x4d6   : > { %v8080_v24 = vpop.f32.mrf.mxu3 }
 0x4d7   : > { %v8082_v16 = vpop.f32.mrf.mxu0  ;;  %v2611_v3 = vpop.f32.mrf.mxu1 }
 0x4d8   : > { %v2612_v44 = vadd.f32 %v2611_v3, %v2443_v46 }
 0x4da   : > { %v3088_v63 = vmax.f32 %v2612_v44, 0.0  ;;  %v8109_v44 = vpop.f32.mrf.mxu2 }
 0x4dc   : > { %v8090_v18 = vpack.c.bf16 %v3088_v63, %v3086_v49 }
 0x4de   : > { %v8094_v62 = vpop.f32.mrf.mxu3 }
 0x4df   : > { %v8098_v52 = vpop.f32.mrf.mxu0  ;;  %v2614_v56 = vpop.f32.mrf.mxu1 }
 0x4e0   : > { %9565 = vst [vmem:[#allocation36_spill] sm:$0xff] %v8098_v52  ;;  %v2615_v54 = vadd.f32 %v2614_v56, %v2446_v6  ;;  %v5481_v56 = vor.u32 %v5875_v55, %v5478_v7  ;;  %v8119_v6 = vor.u32 %v5907_v5, %v5596_v53 }
 0x4e2   : > { %2653 = vmatmul.bf16.gmra.mxu1 %v5473_v10  ;;  %3808 = vmatmul.bf16.gmra.mxu0 %v8096_v47  ;;  %v3090_v63 = vmax.f32 %v2615_v54, 0.0  ;;  %9569 = vst [vmem:[#allocation30_spill] sm:$0xff] %v8119_v6  ;;  %v2793_v54 = vpop.f32.mrf.mxu2 }
 0x4e3   : > { %2991 = vmatmul.bf16.gmra.mxu3 %v5473_v10 }
 0x4e6   : > { %v8105_v46 = vpop.f32.mrf.mxu3 }
 0x4e7   : > { %v8107_v28 = vpop.f32.mrf.mxu0  ;;  %v2616_v3 = vpop.f32.mrf.mxu1 }
 0x4e8   : > { %9568 = vst [vmem:[#allocation28_spill] sm:$0xff] %v8107_v28  ;;  %v2617_v49 = vadd.f32 %v2616_v3, %v2448_v39  ;;  %v9571_v3 = vld [vmem:[#allocation22_spill] sm:$0xff]  ;;  %v9573_v28 = vld [vmem:[#allocation61_spill] sm:$0xff] }
 0x4ea   : > { %v3092_v48 = vmax.f32 %v2617_v49, 0.0  ;;  %v2451_v49 = vadd.f32 %v7899_v45, %v9571_v3  ;;  %v2456_v45 = vadd.f32 %v7925_v21, %v9573_v28 }
 0x4ec   : > { %v3174_v61 = vpack.c.bf16 %v3092_v48, %v3090_v63 }
 0x4ee   : > { %v8117_v10 = vpop.f32.mrf.mxu3 }
 0x4ef   : > { %v8121_v47 = vpop.f32.mrf.mxu0  ;;  %v2619_v39 = vpop.f32.mrf.mxu1 }
 0x4f0   : > { %9570 = vst [vmem:[#allocation23_spill] sm:$0xff] %v8121_v47  ;;  %v2620_v63 = vadd.f32 %v2619_v39, %v2451_v49  ;;  %v5486_v47 = vld [vmem:[#allocation4 + $0x10] sm:$0xf0] }
 0x4f1   : > { %v8136_v39 = vor.u32 %v5877_v50, %v5486_v47 }
 0x4f2   : > { %2658 = vmatmul.bf16.gmra.mxu1 %v5481_v56  ;;  %3813 = vmatmul.bf16.gmra.mxu0 %v8119_v6  ;;  %v3094_v53 = vmax.f32 %v2620_v63, 0.0  ;;  %v8130_v6 = vpop.f32.mrf.mxu2 }
 0x4f3   : > { %2996 = vmatmul.bf16.gmra.mxu3 %v5481_v56  ;;  %9575 = vst [vmem:[#allocation26_spill] sm:$0xff] %v8136_v39 }
 0x4f6   : > { %v2957_v48 = vpop.f32.mrf.mxu3 }
 0x4f7   : > { %v8128_v30 = vpop.f32.mrf.mxu0  ;;  %v2621_v55 = vpop.f32.mrf.mxu1 }
 0x4f8   : > { %v2622_v7 = vadd.f32 %v2621_v55, %v2453_v37  ;;  %v8142_v55 = vpop.permute.xlu1 %1933 }
 0x4f9   : > { %v2458_v21 = vadd.f32 %v7933_v19, %v8142_v55  ;;  %v9577_v19 = vld [vmem:[#allocation51_spill] sm:$0xff] }
 0x4fa   : > { %v3096_v5 = vmax.f32 %v2622_v7, 0.0  ;;  %v2794_v7 = vadd.f32 %v2793_v54, %v9573_v28  ;;  %v2798_v27 = vpop.f32.mrf.mxu2  ;;  %v5881_v28 = vld [vmem:[#allocation4 + $0x24] sm:$0xf]  ;;  %v5502_v54 = vld [vmem:[#allocation4 + $0x30] sm:$0xf0] }
 0x4fc   : > { %v3176_v56 = vpack.c.bf16 %v3096_v5, %v3094_v53 }
 0x4fe   : > { %v2959_v52 = vpop.f32.mrf.mxu3  ;;  %3948 = vmatpush.bf16.msra.mxu2 %v3176_v56 }
 0x4ff   : > { %v2624_v49 = vpop.f32.mrf.mxu1  ;;  %v8138_v37 = vpop.f32.mrf.mxu0 }
 0x500   : > { %v2625_v63 = vadd.f32 %v2624_v49, %v2456_v45  ;;  %v5915_v49 = vld [vmem:[#allocation4 + $0x12c] sm:$0xf0] }
 0x502   : > { %3818 = vmatmul.bf16.gmra.mxu0 %v8134_v58  ;;  %3867 = vmatmul.bf16.vlgmr.msra.gmra.mxu1 %v8136_v39  ;;  %v3098_v56 = vmax.f32 %v2625_v63, 0.0  ;;  %v8161_v39 = vor.u32 %v5881_v28, %v5502_v54  ;;  %v2781_v28 = vadd.f32 %v8044_v23, %v9563_v33 }
 0x503   : > { %3949 = vmatpush.bf16.msra.mxu2 %v3174_v61  ;;  %v5628_v61 = vld [vmem:[#allocation4 + $0x120] sm:$0xf] }
 0x504   : > { %9579 = vst [vmem:[#allocation16_spill] sm:$0xff] %v8161_v39 }
 0x506   : > { %v2962_v0 = vpop.f32.mrf.mxu3 }
 0x507   : > { %v8147_v50 = vadd.f32 %v2962_v0, %v2794_v7  ;;  %3950 = vmatpush.bf16.msra.mxu2 %v8090_v18  ;;  %v2626_v47 = vpop.f32.mrf.mxu1  ;;  %v8150_v53 = vpop.f32.mrf.mxu0  ;;  %v2461_v7 = vadd.f32 %v7951_v9, %v9577_v19  ;;  %v8159_v18 = vor.u32 %v5915_v49, %v5628_v61  ;;  %v2789_v9 = vadd.f32 %v8092_v36, %v9571_v3  ;;  %v9580_v49 = vld [vmem:[#allocation53_spill] sm:$0xff] }
 0x508   : > { %v2627_v5 = vadd.f32 %v2626_v47, %v2458_v21  ;;  %v8168_v47 = vpop.f32.mrf.mxu2  ;;  %v2799_v61 = vadd.f32 %v2798_v27, %v9577_v19  ;;  %v2463_v36 = vadd.f32 %v7962_v12, %v9580_v49  ;;  %v2779_v12 = vadd.f32 %v8023_v59, %v9562_v32 }
 0x509   : > { %9576 = vst [vmem:[#allocation59_spill] sm:$0xff] %v8147_v50  ;;  %v2950_v27 = vadd.f32 %v8094_v62, %v2781_v28  ;;  %v8214_v28 = vpop.permute.xlu2 %3367 }
 0x50a   : > { %v3100_v45 = vmax.f32 %v2627_v5, 0.0  ;;  %9578 = vst [vmem:[#allocation19_spill] sm:$0xff] %v8159_v18  ;;  %v2948_v59 = vadd.f32 %v8080_v24, %v2779_v12 }
 0x50b   : > { %3951 = vmatpush.bf16.msra.mxu2 %v8065_v57  ;;  %v2791_v57 = vadd.f32 %v8109_v44, %v9572_v22  ;;  %v2784_v44 = vadd.f32 %v8057_v40, %v9566_v31  ;;  %9586 = vst [vmem:[#allocation42_spill] sm:$0xff] %v8214_v28  ;;  %v5582_v28 = vld [vmem:[#allocation4 + $0xd0] sm:$0xf0] }
 0x50c   : > { %v8153_v58 = vpack.c.bf16 %v3100_v45, %v3098_v56  ;;  %v2958_v45 = vadd.f32 %v2957_v48, %v2789_v9  ;;  %v2776_v9 = vadd.f32 %v8001_v35, %v9560_v43 }
 0x50d   : > { %v2960_v56 = vadd.f32 %v2959_v52, %v2791_v57  ;;  %v2953_v48 = vadd.f32 %v8105_v46, %v2784_v44  ;;  %v5644_v57 = vld [vmem:[#allocation4 + $0x140] sm:$0xf]  ;;  %v5919_v46 = vld [vmem:[#allocation4 + $0x14c] sm:$0xf0] }
 0x50e   : > { %v8157_v0 = vpop.f32.mrf.mxu3  ;;  %v3095_v40 = vmax.f32 %v2958_v45, 0.0  ;;  %v9583_v45 = vld [vmem:[#allocation45_spill] sm:$0xff]  ;;  %v8208_v35 = vor.u32 %v5919_v46, %v5644_v57 }
 0x50f   : > { %3952 = vmatpush.bf16.msra.mxu2 %v8034_v51  ;;  %v2629_v63 = vpop.f32.mrf.mxu1  ;;  %v8164_v21 = vpop.f32.mrf.mxu0  ;;  %v2786_v51 = vadd.f32 %v8076_v60, %v9567_v11  ;;  %v3097_v52 = vmax.f32 %v2960_v56, 0.0  ;;  %v5492_v11 = vld [vmem:[#allocation4 + $0x8] sm:$0xf]  ;;  %v5885_v56 = vld [vmem:[#allocation4 + $0x44] sm:$0xf]  ;;  %v3091_v32 = vmax.f32 %v2953_v48, 0.0 }
 0x510   : > { %v2630_v5 = vadd.f32 %v2629_v63, %v2461_v7  ;;  %v2803_v23 = vpop.f32.mrf.mxu2  ;;  %9584 = vst [vmem:[#allocation57_spill] sm:$0xff] %v8208_v35  ;;  %v9587_v48 = vld [vmem:[#allocation56_spill] sm:$0xff] }
 0x511   : > { %v2955_v22 = vadd.f32 %v8117_v10, %v2786_v51  ;;  %v5880_v10 = vld [vmem:[#allocation4 + $0x14] sm:$0xf0]  ;;  %v3177_v33 = vpack.c.bf16 %v3097_v52, %v3095_v40  ;;  %v5518_v51 = vld [vmem:[#allocation4 + $0x50] sm:$0xf0]  ;;  %v3087_v52 = vmax.f32 %v2948_v59, 0.0  ;;  %v2468_v40 = vadd.f32 %v7992_v13, %v9587_v48 }
 0x512   : > { %3823 = vmatmul.bf16.gmra.mxu0 %v8159_v18  ;;  %3872 = vmatmul.bf16.gmra.mxu1 %v8161_v39  ;;  %v3102_v7 = vmax.f32 %v2630_v5, 0.0  ;;  %v2466_v5 = vadd.f32 %v7979_v15, %v9583_v45  ;;  %v8210_v43 = vor.u32 %v5885_v56, %v5518_v51  ;;  %v5923_v51 = vld [vmem:[#allocation4 + $0x16c] sm:$0xf0]  ;;  %v5889_v13 = vld [vmem:[#allocation4 + $0x64] sm:$0xf] }
 0x513   : > { %3953 = vmatpush.bf16.msra.mxu2 %v8004_v2  ;;  %v3093_v19 = vmax.f32 %v2955_v22, 0.0  ;;  %v3089_v22 = vmax.f32 %v2950_v27, 0.0  ;;  %v5534_v59 = vld [vmem:[#allocation4 + $0x70] sm:$0xf0]  ;;  %v5935_v18 = vld [vmem:[#allocation4 + $0x1cc] sm:$0xf0] }
 0x514   : > { %9585 = vst [vmem:[#allocation49_spill] sm:$0xff] %v8210_v43  ;;  %v5901_v39 = vld [vmem:[#allocation4 + $0xc4] sm:$0xf] }
 0x516   : > { %v2967_v3 = vpop.f32.mrf.mxu3 }
 0x517   : > { %v8185_v54 = vadd.f32 %v2967_v3, %v2799_v61  ;;  %3954 = vmatpush.bf16.msra.mxu2 %v7971_v25  ;;  %v2631_v2 = vpop.f32.mrf.mxu1  ;;  %v8188_v60 = vpop.f32.mrf.mxu0  ;;  %v8194_v25 = vor.u32 %v5880_v10, %v5492_v11  ;;  %v2945_v61 = vadd.f32 %v8067_v8, %v2776_v9  ;;  %v3173_v8 = vpack.c.bf16 %v3089_v22, %v3087_v52 }
 0x518   : > { %v2632_v31 = vadd.f32 %v2631_v2, %v2463_v36  ;;  %v8218_v2 = vpop.f32.mrf.mxu2  ;;  %v3083_v11 = vmax.f32 %v8053_v29, 0.0  ;;  %v2804_v10 = vadd.f32 %v2803_v23, %v9583_v45  ;;  %v8228_v9 = vpop.permute.xlu0 %3442  ;;  %v5660_v23 = vld [vmem:[#allocation4 + $0x160] sm:$0xf]  ;;  %v8244_v52 = vor.u32 %v5889_v13, %v5534_v59  ;;  %v5927_v13 = vld [vmem:[#allocation4 + $0x18c] sm:$0xf0] }
 0x519   : > { %9581 = vst [vmem:[#allocation55_spill] sm:$0xff] %v8185_v54  ;;  %v3085_v15 = vmax.f32 %v2945_v61, 0.0  ;;  %v5550_v59 = vld [vmem:[#allocation4 + $0x90] sm:$0xf0] }
 0x51a   : > { %v3104_v63 = vmax.f32 %v2632_v31, 0.0  ;;  %9582 = vst [vmem:[#allocation60_spill] sm:$0xff] %v8194_v25 }
 0x51b   : > { %3955 = vmatpush.bf16.msra.mxu2 %v7942_v38  ;;  %v3175_v38 = vpack.c.bf16 %v3093_v19, %v3091_v32  ;;  %v3171_v12 = vpack.c.bf16 %v3085_v15, %v3083_v11  ;;  %9588 = vst [vmem:[#allocation43_spill] sm:$0xff] %v8228_v9  ;;  %v8232_v32 = vpop.permute.xlu2 %3352 }
 0x51c   : > { %v8200_v62 = vpack.c.bf16 %v3104_v63, %v3102_v7  ;;  %v5508_v7 = vld [vmem:[#allocation4 + $0x28] sm:$0xf]  ;;  %v5884_v63 = vld [vmem:[#allocation4 + $0x34] sm:$0xf0]  ;;  %9590 = vst [vmem:[#allocation47_spill] sm:$0xff] %v8232_v32 }
 0x51d   : > { %v8230_v56 = vor.u32 %v5884_v63, %v5508_v7  ;;  %9593 = vst [vmem:[#allocation31_spill] sm:$0xff] %v8244_v52  ;;  %v5524_v7 = vld [vmem:[#allocation4 + $0x48] sm:$0xf]  ;;  %v5888_v63 = vld [vmem:[#allocation4 + $0x54] sm:$0xf0] }
 0x51e   : > { %v8205_v44 = vpop.f32.mrf.mxu3  ;;  %3956 = vmatmul.bf16.vlgmr.msra.gmra.mxu2 %v8194_v25  ;;  %v5708_v25 = vld [vmem:[#allocation4 + $0x1c0] sm:$0xf]  ;;  %v5572_v32 = vld [vmem:[#allocation4 + $0xa8] sm:$0xf] }
 0x51f   : > { %4304 = vmatpush.bf16.msrb.mxu2 %v3177_v33  ;;  %v2634_v24 = vpop.f32.mrf.mxu1  ;;  %v8212_v36 = vpop.f32.mrf.mxu0  ;;  %9589 = vst [vmem:[#allocation37_spill] sm:$0xff] %v8230_v56 }
 0x520   : > { %v2635_v3 = vadd.f32 %v2634_v24, %v2466_v5  ;;  %v9591_v5 = vld [vmem:[#allocation50_spill] sm:$0xff]  ;;  %v2808_v22 = vpop.f32.mrf.mxu2  ;;  %v8242_v24 = vor.u32 %v5923_v51, %v5660_v23  ;;  %v8266_v23 = vor.u32 %v5888_v63, %v5524_v7 }
 0x521   : > { %v2471_v61 = vadd.f32 %v8012_v34, %v9591_v5  ;;  %v8251_v34 = vpop.permute.xlu0 %3357  ;;  %v5676_v51 = vld [vmem:[#allocation4 + $0x180] sm:$0xf] }
 0x522   : > { %3828 = vmatmul.bf16.gmra.mxu0 %v8208_v35  ;;  %3877 = vmatmul.bf16.gmra.mxu1 %v8210_v43  ;;  %v3106_v29 = vmax.f32 %v2635_v3, 0.0  ;;  %9592 = vst [vmem:[#allocation40_spill] sm:$0xff] %v8242_v24 }
 0x523   : > { %4305 = vmatpush.bf16.msrb.mxu2 %v3175_v38  ;;  %9595 = vst [vmem:[#allocation25_spill] sm:$0xff] %v8251_v34  ;;  %v8255_v11 = vpop.permute.xlu2 %3437 }
 0x524   : > { %9596 = vst [vmem:[#allocation20_spill] sm:$0xff] %v8255_v11 }
 0x525   : > { %9599 = vst [vmem:[#allocation22_spill] sm:$0xff] %v8266_v23 }
 0x526   : > { %v2972_v31 = vpop.f32.mrf.mxu3 }
 0x527   : > { %4306 = vmatpush.bf16.msrb.mxu2 %v3173_v8  ;;  %v8224_v27 = vadd.f32 %v2972_v31, %v2804_v10  ;;  %v2636_v19 = vpop.f32.mrf.mxu1  ;;  %v8226_v33 = vpop.f32.mrf.mxu0  ;;  %v9597_v10 = vld [vmem:[#allocation39_spill] sm:$0xff] }
 0x528   : > { %v2637_v57 = vadd.f32 %v2636_v19, %v2468_v40  ;;  %v2473_v40 = vadd.f32 %v8025_v1, %v9597_v10  ;;  %v5893_v1 = vld [vmem:[#allocation4 + $0x84] sm:$0xf] }
 0x52a   : > { %v3108_v46 = vmax.f32 %v2637_v57, 0.0  ;;  %v8263_v57 = vpop.f32.mrf.mxu2 }
 0x52b   : > { %4307 = vmatpush.bf16.msrb.mxu2 %v3171_v12  ;;  %v8285_v63 = vpop.permute.xlu2 %3422 }
 0x52c   : > { %v8235_v45 = vpack.c.bf16 %v3108_v46, %v3106_v29  ;;  %9606 = vst [vmem:[#allocation56_spill] sm:$0xff] %v8285_v63 }
 0x52e   : > { %v8239_v38 = vpop.f32.mrf.mxu3  ;;  %3961 = vmatmul.bf16.gmra.mxu2 %v8230_v56 }
 0x52f   : > { %4308 = vmatpush.bf16.msrb.mxu2 %v8047_v20  ;;  %v2639_v3 = vpop.f32.mrf.mxu1  ;;  %v8246_v15 = vpop.f32.mrf.mxu0  ;;  %v2809_v20 = vadd.f32 %v2808_v22, %v9591_v5 }
 0x530   : > { %9594 = vst [vmem:[#allocation24_spill] sm:$0xff] %v8246_v15  ;;  %v2640_v8 = vadd.f32 %v2639_v3, %v2471_v61  ;;  %v8268_v5 = vpop.permute.xlu1 %3362  ;;  %v8272_v22 = vpop.permute.xlu0 %3342  ;;  %v9602_v3 = vld [vmem:[#allocation33_spill] sm:$0xff] }
 0x531   : > { %9600 = vst [vmem:[#allocation15_spill] sm:$0xff] %v8268_v5 }
 0x532   : > { %3833 = vmatmul.bf16.gmra.mxu0 %v8242_v24  ;;  %3882 = vmatmul.bf16.gmra.mxu1 %v8244_v52  ;;  %9601 = vst [vmem:[#allocation61_spill] sm:$0xff] %v8272_v22  ;;  %v5566_v24 = vld [vmem:[#allocation4 + $0xb0] sm:$0xf0] }
 0x533   : > { %4309 = vmatpush.bf16.msrb.mxu2 %v8016_v4 }
 0x536   : > { %v2977_v31 = vpop.f32.mrf.mxu3 }
 0x537   : > { %4310 = vmatpush.bf16.msrb.mxu2 %v7985_v41  ;;  %v8259_v12 = vadd.f32 %v2977_v31, %v2809_v20  ;;  %v2641_v19 = vpop.f32.mrf.mxu1  ;;  %v8261_v4 = vpop.f32.mrf.mxu0  ;;  %v3110_v41 = vmax.f32 %v2640_v8, 0.0  ;;  %v2476_v20 = vadd.f32 %v8042_v26, %v9602_v3  ;;  %v8281_v8 = vor.u32 %v5893_v1, %v5550_v59 }
 0x538   : > { %9598 = vst [vmem:[#allocation29_spill] sm:$0xff] %v8261_v4  ;;  %v2642_v29 = vadd.f32 %v2641_v19, %v2473_v40  ;;  %v8298_v63 = vpop.permute.xlu0 %3427 }
 0x539   : > { %9604 = vst [vmem:[#allocation53_spill] sm:$0xff] %v8281_v8 }
 0x53a   : > { %v3112_v46 = vmax.f32 %v2642_v29, 0.0  ;;  %v2813_v29 = vpop.f32.mrf.mxu2  ;;  %9610 = vst [vmem:[#allocation33_spill] sm:$0xff] %v8298_v63  ;;  %v5556_v63 = vld [vmem:[#allocation4 + $0x88] sm:$0xf] }
 0x53b   : > { %4311 = vmatpush.bf16.msrb.mxu2 %v7955_v17  ;;  %v8279_v17 = vor.u32 %v5927_v13, %v5676_v51  ;;  %v2814_v26 = vadd.f32 %v2813_v29, %v9602_v3  ;;  %v5692_v3 = vld [vmem:[#allocation4 + $0x1a0] sm:$0xf]  ;;  %v8302_v29 = vpop.permute.xlu2 %3337 }
 0x53c   : > { %v8270_v61 = vpack.c.bf16 %v3112_v46, %v3110_v41  ;;  %v8290_v41 = vpop.permute.xlu1 %3447  ;;  %v9608_v46 = vld [vmem:[#allocation35_spill] sm:$0xff]  ;;  %9612 = vst [vmem:[#allocation62_spill] sm:$0xff] %v8302_v29 }
 0x53d   : > { %9603 = vst [vmem:[#allocation51_spill] sm:$0xff] %v8279_v17  ;;  %v2478_v51 = vadd.f32 %v8055_v42, %v9608_v46  ;;  %v5897_v42 = vld [vmem:[#allocation4 + $0xa4] sm:$0xf] }
 0x53e   : > { %v8276_v40 = vpop.f32.mrf.mxu3  ;;  %3966 = vmatmul.bf16.gmra.mxu2 %v8266_v23  ;;  %9607 = vst [vmem:[#allocation50_spill] sm:$0xff] %v8290_v41  ;;  %v5931_v41 = vld [vmem:[#allocation4 + $0x1ac] sm:$0xf0]  ;;  %v8309_v52 = vor.u32 %v5897_v42, %v5566_v24  ;;  %v5905_v29 = vld [vmem:[#allocation4 + $0xe4] sm:$0xf] }
 0x53f   : > { %v2644_v31 = vpop.f32.mrf.mxu1  ;;  %v8283_v19 = vpop.f32.mrf.mxu0 }
 0x540   : > { %9605 = vst [vmem:[#allocation45_spill] sm:$0xff] %v8283_v19  ;;  %v2645_v7 = vadd.f32 %v2644_v31, %v2476_v20  ;;  %v5540_v20 = vld [vmem:[#allocation4 + $0x68] sm:$0xf]  ;;  %v5892_v31 = vld [vmem:[#allocation4 + $0x74] sm:$0xf0] }
 0x541   : > { %v8300_v23 = vor.u32 %v5892_v31, %v5540_v20  ;;  %9614 = vst [vmem:[#allocation64_spill] sm:$0xff] %v8309_v52  ;;  %v9620_v31 = vld [vmem:[#allocation38_spill] sm:$0xff]  ;;  %v5598_v19 = vld [vmem:[#allocation4 + $0xf0] sm:$0xf0] }
 0x542   : > { %3838 = vmatmul.bf16.gmra.mxu0 %v8279_v17  ;;  %3887 = vmatmul.bf16.gmra.mxu1 %v8281_v8  ;;  %v3114_v17 = vmax.f32 %v2645_v7, 0.0 }
 0x543   : > { %9611 = vst [vmem:[#allocation35_spill] sm:$0xff] %v8300_v23  ;;  %v8325_v24 = vpop.permute.xlu2 %3322 }
 0x546   : > { %v2982_v13 = vpop.f32.mrf.mxu3 }
 0x547   : > { %v8294_v1 = vadd.f32 %v2982_v13, %v2814_v26  ;;  %v2646_v59 = vpop.f32.mrf.mxu1  ;;  %v8296_v9 = vpop.f32.mrf.mxu0  ;;  %v8307_v13 = vor.u32 %v5931_v41, %v5692_v3  ;;  %v2483_v3 = vadd.f32 %v8082_v16, %v9620_v31 }
 0x548   : > { %9609 = vst [vmem:[#allocation39_spill] sm:$0xff] %v8296_v9  ;;  %v2647_v11 = vadd.f32 %v2646_v59, %v2478_v51  ;;  %v8311_v59 = vpop.permute.xlu1 %3432 }
 0x549   : > { %9613 = vst [vmem:[#allocation63_spill] sm:$0xff] %v8307_v13 }
 0x54a   : > { %v3116_v8 = vmax.f32 %v2647_v11, 0.0  ;;  %9615 = vst [vmem:[#allocation65_spill] sm:$0xff] %v8311_v59  ;;  %v8313_v11 = vpop.f32.mrf.mxu2 }
 0x54c   : > { %v8304_v26 = vpack.c.bf16 %v3116_v8, %v3114_v17  ;;  %v8321_v17 = vpop.permute.xlu0 %3412  ;;  %v9618_v8 = vld [vmem:[#allocation27_spill] sm:$0xff] }
 0x54d   : > { %9617 = vst [vmem:[#allocation67_spill] sm:$0xff] %v8321_v17  ;;  %v2481_v41 = vadd.f32 %v8071_v14, %v9618_v8 }
 0x54e   : > { %3971 = vmatmul.bf16.gmra.mxu2 %v8300_v23  ;;  %v8317_v20 = vpop.f32.mrf.mxu3  ;;  %9619 = vst [vmem:[#allocation27_spill] sm:$0xff] %v8325_v24  ;;  %v5896_v23 = vld [vmem:[#allocation4 + $0x94] sm:$0xf0]  ;;  %v5614_v24 = vld [vmem:[#allocation4 + $0x110] sm:$0xf0] }
 0x54f   : > { %v2649_v51 = vpop.f32.mrf.mxu1  ;;  %v8315_v7 = vpop.f32.mrf.mxu0  ;;  %v8333_v17 = vor.u32 %v5896_v23, %v5556_v63 }
 0x550   : > { %9616 = vst [vmem:[#allocation66_spill] sm:$0xff] %v8315_v7  ;;  %v2650_v42 = vadd.f32 %v2649_v51, %v2481_v41  ;;  %v8329_v35 = vpop.permute.xlu1 %3347 }
 0x551   : > { %9621 = vst [vmem:[#allocation38_spill] sm:$0xff] %v8329_v35 }
 0x552   : > { %3843 = vmatmul.bf16.gmra.mxu0 %v8307_v13  ;;  %3892 = vmatmul.bf16.gmra.mxu1 %v8309_v52  ;;  %v8331_v13 = vpop.f32.mrf.mxu2  ;;  %v3118_v52 = vmax.f32 %v2650_v42, 0.0  ;;  %9622 = vst [vmem:[#allocation68_spill] sm:$0xff] %v8333_v17 }
 0x554   : > { %v8341_v41 = vpop.permute.xlu0 %3327 }
 0x555   : > { %9624 = vst [vmem:[#allocation70_spill] sm:$0xff] %v8341_v41 }
 0x556   : > { %v8337_v16 = vpop.f32.mrf.mxu3 }
 0x557   : > { %v2651_v59 = vpop.f32.mrf.mxu1  ;;  %v8335_v14 = vpop.f32.mrf.mxu0 }
 0x558   : > { %v2652_v56 = vadd.f32 %v2651_v59, %v2483_v3  ;;  %9623 = vst [vmem:[#allocation69_spill] sm:$0xff] %v8335_v14  ;;  %v8344_v59 = vor.u32 %v5935_v18, %v5708_v25  ;;  %v8346_v3 = vor.u32 %v5901_v39, %v5582_v28  ;;  %v8352_v63 = vpop.permute.xlu1 %3332  ;;  %v9632_v18 = vld [vmem:[#allocation21_spill] sm:$0xff]  ;;  %v9633_v25 = vld [vmem:[#allocation28_spill] sm:$0xff] }
 0x559   : > { %9628 = vst [vmem:[#allocation74_spill] sm:$0xff] %v8352_v63  ;;  %v2488_v39 = vadd.f32 %v9633_v25, %v9632_v18 }
 0x55a   : > { %v3120_v43 = vmax.f32 %v2652_v56, 0.0  ;;  %9625 = vst [vmem:[#allocation71_spill] sm:$0xff] %v8344_v59  ;;  %v8348_v56 = vpop.permute.xlu2 %3407  ;;  %v8354_v42 = vpop.f32.mrf.mxu2 }
 0x55b   : > { %9626 = vst [vmem:[#allocation72_spill] sm:$0xff] %v8346_v3 }
 0x55c   : > { %v8339_v51 = vpack.c.bf16 %v3120_v43, %v3118_v52  ;;  %9627 = vst [vmem:[#allocation73_spill] sm:$0xff] %v8348_v56  ;;  %v9629_v43 = vld [vmem:[#allocation32_spill] sm:$0xff]  ;;  %v8364_v56 = vpop.permute.xlu0 %3312 }
 0x55d   : > { %v9630_v52 = vld [vmem:[#allocation36_spill] sm:$0xff] }
 0x55e   : > { %3976 = vmatmul.bf16.gmra.mxu2 %v8333_v17  ;;  %v2486_v5 = vadd.f32 %v9630_v52, %v9629_v43  ;;  %v8362_v28 = vpop.f32.mrf.mxu3  ;;  %v5724_v52 = vld [vmem:[#allocation4 + $0x1e0] sm:$0xf] }
 0x55f   : > { %v2654_v23 = vpop.f32.mrf.mxu1  ;;  %v8358_v34 = vpop.f32.mrf.mxu0 }
 0x560   : > { %9631 = vst [vmem:[#allocation32_spill] sm:$0xff] %v8358_v34  ;;  %v2655_v17 = vadd.f32 %v2654_v23, %v2486_v5  ;;  %v5939_v34 = vld [vmem:[#allocation4 + $0x1ec] sm:$0xf0]  ;;  %v8370_v63 = vpop.permute.xlu1 %3417 }
 0x561   : > { %9636 = vst [vmem:[#allocation28_spill] sm:$0xff] %v8370_v63  ;;  %v8375_v23 = vor.u32 %v5939_v34, %v5724_v52  ;;  %v9643_v34 = vld [vmem:[#allocation18_spill] sm:$0xff]  ;;  %v5588_v63 = vld [vmem:[#allocation4 + $0xc8] sm:$0xf] }
 0x562   : > { %3848 = vmatmul.bf16.gmra.mxu0 %v8344_v59  ;;  %3897 = vmatmul.bf16.gmra.mxu1 %v8346_v3  ;;  %v5900_v3 = vld [vmem:[#allocation4 + $0xb4] sm:$0xf0]  ;;  %v8366_v35 = vpop.permute.xlu2 %3392  ;;  %v3122_v7 = vmax.f32 %v2655_v17, 0.0  ;;  %v8372_v5 = vpop.f32.mrf.mxu2 }
 0x563   : > { %9634 = vst [vmem:[#allocation36_spill] sm:$0xff] %v8366_v35  ;;  %v8368_v9 = vor.u32 %v5900_v3, %v5572_v32  ;;  %v9642_v3 = vld [vmem:[#allocation23_spill] sm:$0xff]  ;;  %v5904_v35 = vld [vmem:[#allocation4 + $0xd4] sm:$0xf0] }
 0x564   : > { %9637 = vst [vmem:[#allocation75_spill] sm:$0xff] %v8375_v23  ;;  %v8397_v54 = vor.u32 %v5904_v35, %v5588_v63  ;;  %v9649_v63 = vld [vmem:[#allocation54_spill] sm:$0xff] }
 0x565   : > { %9635 = vst [vmem:[#allocation21_spill] sm:$0xff] %v8368_v9 }
 0x566   : > { %v8381_v32 = vpop.f32.mrf.mxu3  ;;  %9645 = vst [vmem:[#allocation23_spill] sm:$0xff] %v8397_v54 }
 0x567   : > { %v2656_v59 = vpop.f32.mrf.mxu1 }
 0x568   : > { %v2657_v14 = vadd.f32 %v2656_v59, %v2488_v39  ;;  %v8377_v59 = vor.u32 %v5905_v29, %v5598_v19  ;;  %v8379_v39 = vpop.f32.mrf.mxu0  ;;  %v2493_v19 = vadd.f32 %v8128_v30, %v9643_v34  ;;  %v8393_v41 = vpop.permute.xlu1 %3402 }
 0x569   : > { %9639 = vst [vmem:[#allocation77_spill] sm:$0xff] %v8379_v39 }
 0x56a   : > { %v3124_v22 = vmax.f32 %v2657_v14, 0.0  ;;  %9638 = vst [vmem:[#allocation76_spill] sm:$0xff] %v8377_v59  ;;  %v8383_v14 = vpop.permute.xlu0 %3397  ;;  %v2825_v39 = vpop.f32.mrf.mxu2 }
 0x56b   : > { %9640 = vst [vmem:[#allocation78_spill] sm:$0xff] %v8383_v14 }
 0x56c   : > { %v3190_v25 = vpack.c.bf16 %v3124_v22, %v3122_v7  ;;  %v8387_v22 = vpop.permute.xlu2 %3307  ;;  %v9641_v7 = vld [vmem:[#allocation17_spill] sm:$0xff] }
 0x56d   : > { %9644 = vst [vmem:[#allocation17_spill] sm:$0xff] %v8393_v41 }
 0x56e   : > { %3981 = vmatmul.bf16.gmra.mxu2 %v8368_v9  ;;  %v2491_v9 = vadd.f32 %v9642_v3, %v9641_v7  ;;  %v5909_v3 = vld [vmem:[#allocation4 + $0x104] sm:$0xf] }
 0x56f   : > { %v2659_v17 = vpop.f32.mrf.mxu1 }
 0x570   : > { %v2660_v29 = vadd.f32 %v2659_v17, %v2491_v9  ;;  %v8395_v14 = vpop.f32.mrf.mxu0 }
 0x572   : > { %3853 = vmatmul.bf16.gmra.mxu0 %v8375_v23  ;;  %3902 = vmatmul.bf16.gmra.mxu1 %v8377_v59  ;;  %v2994_v23 = vpop.f32.mrf.mxu3  ;;  %v3126_v59 = vmax.f32 %v2660_v29, 0.0  ;;  %v8399_v15 = vpop.permute.xlu0 %3382 }
 0x573   : > { %9646 = vst [vmem:[#allocation18_spill] sm:$0xff] %v8399_v15  ;;  %v2828_v35 = vpop.f32.mrf.mxu2 }
 0x574   : > { %v8401_v9 = vpop.permute.xlu2 %3292 }
 0x575   : > { %9647 = vst [vmem:[#allocation79_spill] sm:$0xff] %v8401_v9  ;;  %v3780_v17 = vadd.f32 %v8138_v37, %v8401_v9 }
 0x577   : > { %v2661_v52 = vpop.f32.mrf.mxu1 }
 0x578   : > { %v2662_v4 = vadd.f32 %v2661_v52, %v2493_v19  ;;  %v8406_v19 = vor.u32 %v5909_v3, %v5614_v24 }
 0x57a   : > { %v3128_v50 = vmax.f32 %v2662_v4, 0.0  ;;  %9648 = vst [vmem:[#allocation80_spill] sm:$0xff] %v8406_v19  ;;  %v8411_v4 = vpop.permute.xlu1 %3317  ;;  %v8416_v37 = vpop.permute.xlu0 %3297 }
 0x57b   : > { %9650 = vst [vmem:[#allocation54_spill] sm:$0xff] %v8416_v37  ;;  %v3782_v24 = vadd.f32 %v8150_v53, %v8416_v37 }
 0x57c   : > { %v3192_v30 = vpack.c.bf16 %v3128_v50, %v3126_v59  ;;  %v8413_v50 = vpop.f32.mrf.mxu0  ;;  %v2997_v59 = vpop.f32.mrf.mxu3 }
 0x57e   : > { %3986 = vmatmul.bf16.gmra.mxu2 %v8397_v54  ;;  %4037 = vmatpush.bf16.msra.mxu3 %v3192_v30  ;;  %v5604_v30 = vld [vmem:[#allocation4 + $0xe8] sm:$0xf]  ;;  %v5630_v54 = vld [vmem:[#allocation4 + $0x130] sm:$0xf0] }
 0x57f   : > { %v3868_v52 = vpop.f32.mrf.mxu1 }
 0x580   : > { %v8408_v29 = vadd.f32 %v3868_v52, %v3780_v17  ;;  %v5908_v17 = vld [vmem:[#allocation4 + $0xf4] sm:$0xf0] }
 0x582   : > { %3907 = vmatmul.bf16.gmra.mxu1 %v8406_v19  ;;  %4038 = vmatpush.bf16.msra.mxu3 %v3190_v25  ;;  %v8424_v25 = vor.u32 %v5908_v17, %v5604_v30  ;;  %v5913_v19 = vld [vmem:[#allocation4 + $0x124] sm:$0xf]  ;;  %v8426_v9 = vpop.permute.xlu1 %3302  ;;  %v2829_v17 = vadd.f32 %v2828_v35, %v9641_v7  ;;  %v5878_v7 = vld [vmem:[#allocation4 + $0xc] sm:$0xf]  ;;  %v5494_v35 = vld [vmem:[#allocation4 + $0x18] sm:$0xf0] }
 0x583   : > { %4134 = vmatmul.bf16.vlgmr.msrb.gmra.mxu0 %v9649_v63  ;;  %v2830_v63 = vpop.f32.mrf.mxu2  ;;  %9652 = vst [vmem:[#allocation82_spill] sm:$0xff] %v8426_v9  ;;  %v3785_v53 = vadd.f32 %v8164_v21, %v8426_v9  ;;  %v2826_v21 = vadd.f32 %v2825_v39, %v9632_v18 }
 0x584   : > { %9651 = vst [vmem:[#allocation81_spill] sm:$0xff] %v8424_v25  ;;  %v8428_v41 = vpop.f32.mrf.mxu0  ;;  %v2998_v9 = vadd.f32 %v2997_v59, %v2829_v17 }
 0x586   : > { %4039 = vmatpush.bf16.msra.mxu3 %v8339_v51  ;;  %v2999_v51 = vpop.f32.mrf.mxu3  ;;  %v3127_v39 = vmax.f32 %v2998_v9, 0.0 }
 0x587   : > { %v3870_v3 = vpop.f32.mrf.mxu1 }
 0x588   : > { %v8421_v52 = vadd.f32 %v3870_v3, %v3782_v24  ;;  %v8434_v24 = vor.u32 %v5913_v19, %v5630_v54  ;;  %v2824_v54 = vadd.f32 %v8372_v5, %v9629_v43  ;;  %v3787_v19 = vadd.f32 %v8188_v60, %v8387_v22  ;;  %v5912_v43 = vld [vmem:[#allocation4 + $0x114] sm:$0xf0] }
 0x589   : > { %v2819_v5 = vadd.f32 %v8331_v13, %v9618_v8  ;;  %v5917_v13 = vld [vmem:[#allocation4 + $0x144] sm:$0xf]  ;;  %v5646_v8 = vld [vmem:[#allocation4 + $0x150] sm:$0xf0] }
 0x58a   : > { %4040 = vmatpush.bf16.msra.mxu3 %v8304_v26  ;;  %v2831_v26 = vadd.f32 %v2830_v63, %v9643_v34  ;;  %v2993_v18 = vadd.f32 %v8381_v32, %v2824_v54  ;;  %v5620_v63 = vld [vmem:[#allocation4 + $0x108] sm:$0xf] }
 0x58b   : > { %v2988_v32 = vadd.f32 %v8337_v16, %v2819_v5 }
 0x58c   : > { %v3000_v37 = vadd.f32 %v2999_v51, %v2831_v26  ;;  %v8452_v59 = vpop.f32.mrf.mxu0  ;;  %v3123_v9 = vmax.f32 %v2993_v18, 0.0  ;;  %v5882_v18 = vld [vmem:[#allocation4 + $0x2c] sm:$0xf] }
 0x58e   : > { %3991 = vmatmul.bf16.gmra.mxu2 %v8424_v25  ;;  %4041 = vmatpush.bf16.msra.mxu3 %v8270_v61  ;;  %v9653_v25 = vld [vmem:[#allocation46_spill] sm:$0xff]  ;;  %v2995_v61 = vadd.f32 %v2994_v23, %v2826_v21  ;;  %v3129_v34 = vmax.f32 %v3000_v37, 0.0 }
 0x58f   : > { %v3873_v3 = vpop.f32.mrf.mxu1 }
 0x590   : > { %v8437_v30 = vadd.f32 %v3873_v3, %v3785_v53  ;;  %v3193_v37 = vpack.c.bf16 %v3129_v34, %v3127_v39  ;;  %v8459_v53 = vor.u32 %v5878_v7, %v5494_v35  ;;  %v8472_v3 = vor.u32 %v5917_v13, %v5646_v8  ;;  %v9656_v8 = vld [vmem:[#allocation24_spill] sm:$0xff] }
 0x591   : > { %v2801_v39 = vadd.f32 %v8168_v47, %v9580_v49  ;;  %v2796_v47 = vadd.f32 %v8130_v6, %v8142_v55  ;;  %v3107_v49 = vmax.f32 %v8224_v27, 0.0  ;;  %v9657_v6 = vld [vmem:[#allocation55_spill] sm:$0xff] }
 0x592   : > { %3912 = vmatmul.bf16.gmra.mxu1 %v8434_v24  ;;  %4042 = vmatpush.bf16.msra.mxu3 %v8235_v45  ;;  %v2821_v45 = vadd.f32 %v8354_v42, %v9620_v31  ;;  %v8462_v31 = vor.u32 %v5912_v43, %v5620_v63  ;;  %v2816_v42 = vadd.f32 %v8313_v11, %v9608_v46  ;;  %v3119_v11 = vmax.f32 %v2988_v32, 0.0 }
 0x593   : > { %4139 = vmatmul.bf16.gmra.mxu0 %v9653_v25  ;;  %v2811_v46 = vadd.f32 %v8263_v57, %v9597_v10  ;;  %v2806_v10 = vadd.f32 %v8218_v2, %v9587_v48  ;;  %v3115_v57 = vmax.f32 %v8294_v1, 0.0  ;;  %v5636_v48 = vld [vmem:[#allocation4 + $0x128] sm:$0xf]  ;;  %v5916_v1 = vld [vmem:[#allocation4 + $0x134] sm:$0xf0]  ;;  %v2965_v32 = vadd.f32 %v8157_v0, %v2796_v47 }
 0x594   : > { %v2990_v60 = vadd.f32 %v8362_v28, %v2821_v45  ;;  %v2985_v51 = vadd.f32 %v8317_v20, %v2816_v42  ;;  %v8479_v54 = vpop.f32.mrf.mxu0  ;;  %v3792_v45 = vadd.f32 %v8226_v33, %v8411_v4  ;;  %v5921_v42 = vld [vmem:[#allocation4 + $0x164] sm:$0xf]  ;;  %v3103_v55 = vmax.f32 %v9657_v6, 0.0  ;;  %v5542_v6 = vld [vmem:[#allocation4 + $0x78] sm:$0xf0] }
 0x595   : > { %v2980_v20 = vadd.f32 %v8276_v40, %v2811_v46  ;;  %v2975_v40 = vadd.f32 %v8239_v38, %v2806_v10  ;;  %v2970_v38 = vadd.f32 %v8205_v44, %v2801_v39  ;;  %v5662_v44 = vld [vmem:[#allocation4 + $0x170] sm:$0xf0]  ;;  %v9660_v10 = vld [vmem:[#allocation70_spill] sm:$0xff] }
 0x596   : > { %4043 = vmatpush.bf16.msra.mxu3 %v8200_v62  ;;  %v3125_v62 = vmax.f32 %v2995_v61, 0.0  ;;  %v3121_v28 = vmax.f32 %v2990_v60, 0.0  ;;  %v3117_v21 = vmax.f32 %v2985_v51, 0.0 }
 0x597   : > { %v3875_v25 = vpop.f32.mrf.mxu1  ;;  %v3113_v7 = vmax.f32 %v2980_v20, 0.0  ;;  %v3109_v43 = vmax.f32 %v2975_v40, 0.0  ;;  %v5886_v40 = vld [vmem:[#allocation4 + $0x4c] sm:$0xf] }
 0x598   : > { %v8456_v23 = vadd.f32 %v3875_v25, %v3787_v19  ;;  %v3191_v26 = vpack.c.bf16 %v3125_v62, %v3123_v9  ;;  %v3189_v34 = vpack.c.bf16 %v3121_v28, %v3119_v11  ;;  %v9654_v19 = vld [vmem:[#allocation48_spill] sm:$0xff]  ;;  %v3187_v35 = vpack.c.bf16 %v3117_v21, %v3115_v57  ;;  %v9659_v21 = vld [vmem:[#allocation41_spill] sm:$0xff] }
 0x599   : > { %v3111_v25 = vmax.f32 %v8259_v12, 0.0  ;;  %v3105_v9 = vmax.f32 %v2970_v38, 0.0  ;;  %v3183_v13 = vpack.c.bf16 %v3109_v43, %v3107_v49  ;;  %v8515_v28 = vor.u32 %v5921_v42, %v5662_v44  ;;  %v9661_v57 = vld [vmem:[#allocation29_spill] sm:$0xff]  ;;  %v9663_v38 = vld [vmem:[#allocation74_spill] sm:$0xff] }
 0x59a   : > { %4044 = vmatpush.bf16.msra.mxu3 %v8153_v58  ;;  %v3790_v58 = vadd.f32 %v8212_v36, %v8364_v56  ;;  %v9664_v43 = vld [vmem:[#allocation45_spill] sm:$0xff] }
 0x59b   : > { %v3185_v60 = vpack.c.bf16 %v3113_v7, %v3111_v25  ;;  %v3181_v11 = vpack.c.bf16 %v3105_v9, %v3103_v55  ;;  %v5526_v7 = vld [vmem:[#allocation4 + $0x58] sm:$0xf0] }
 0x59c   : > { %v8508_v12 = vpop.f32.mrf.mxu0  ;;  %v8528_v39 = vor.u32 %v5886_v40, %v5526_v7  ;;  %v9667_v9 = vld [vmem:[#allocation62_spill] sm:$0xff] }
 0x59d   : > { %4045 = vmatmul.bf16.vlgmr.msra.gmra.mxu3 %v8459_v53  ;;  %v9672_v40 = vld [vmem:[#allocation66_spill] sm:$0xff] }
 0x59e   : > { %4393 = vmatpush.bf16.msrb.mxu3 %v3193_v37  ;;  %3996 = vmatmul.bf16.gmra.mxu2 %v8462_v31  ;;  %v8503_v37 = vor.u32 %v5916_v1, %v5636_v48  ;;  %v5925_v48 = vld [vmem:[#allocation4 + $0x184] sm:$0xf]  ;;  %v5678_v1 = vld [vmem:[#allocation4 + $0x190] sm:$0xf0] }
 0x59f   : > { %v3878_v16 = vpop.f32.mrf.mxu1 }
 0x5a0   : > { %v8476_v17 = vadd.f32 %v3878_v16, %v3790_v58  ;;  %v3101_v58 = vmax.f32 %v2965_v32, 0.0  ;;  %v9658_v16 = vld [vmem:[#allocation59_spill] sm:$0xff]  ;;  %v9666_v32 = vld [vmem:[#allocation52_spill] sm:$0xff] }
 0x5a1   : > { %v3957_v61 = vpop.f32.mrf.mxu2  ;;  %v3099_v20 = vmax.f32 %v9658_v16, 0.0 }
 0x5a2   : > { %4394 = vmatpush.bf16.msrb.mxu3 %v3191_v26  ;;  %v8482_v36 = vadd.f32 %v3957_v61, %v8408_v29  ;;  %3917 = vmatmul.bf16.gmra.mxu1 %v8472_v3  ;;  %v5510_v29 = vld [vmem:[#allocation4 + $0x38] sm:$0xf0] }
 0x5a3   : > { %4144 = vmatmul.bf16.gmra.mxu0 %v9654_v19  ;;  %v8498_v62 = vor.u32 %v5882_v18, %v5510_v29  ;;  %v3797_v19 = vadd.f32 %v9661_v57, %v9660_v10  ;;  %v5694_v57 = vld [vmem:[#allocation4 + $0x1b0] sm:$0xf0] }
 0x5a4   : > { %v8524_v61 = vpop.f32.mrf.mxu0 }
 0x5a6   : > { %4395 = vmatpush.bf16.msrb.mxu3 %v3189_v34  ;;  %v3179_v34 = vpack.c.bf16 %v3101_v58, %v3099_v20  ;;  %v5924_v58 = vld [vmem:[#allocation4 + $0x174] sm:$0xf0] }
 0x5a7   : > { %v3880_v2 = vpop.f32.mrf.mxu1 }
 0x5a8   : > { %v8495_v63 = vadd.f32 %v3880_v2, %v3792_v45  ;;  %v5652_v45 = vld [vmem:[#allocation4 + $0x148] sm:$0xf] }
 0x5a9   : > { %v3959_v5 = vpop.f32.mrf.mxu2 }
 0x5aa   : > { %4396 = vmatpush.bf16.msrb.mxu3 %v3187_v35  ;;  %v8501_v33 = vadd.f32 %v3959_v5, %v8421_v52  ;;  %v9655_v52 = vld [vmem:[#allocation27_spill] sm:$0xff]  ;;  %v3800_v5 = vadd.f32 %v9664_v43, %v9663_v38  ;;  %v9675_v43 = vld [vmem:[#allocation38_spill] sm:$0xff] }
 0x5ab   : > { %v3795_v51 = vadd.f32 %v9656_v8, %v9655_v52 }
 0x5ac   : > { %v8541_v47 = vpop.f32.mrf.mxu0 }
 0x5ad   : > { %4050 = vmatmul.bf16.gmra.mxu3 %v8498_v62 }
 0x5ae   : > { %4397 = vmatpush.bf16.msrb.mxu3 %v3185_v60  ;;  %4001 = vmatmul.bf16.gmra.mxu2 %v8503_v37  ;;  %v8539_v60 = vor.u32 %v5925_v48, %v5678_v1  ;;  %v9674_v1 = vld [vmem:[#allocation58_spill] sm:$0xff] }
 0x5af   : > { %v3883_v27 = vpop.f32.mrf.mxu1 }
 0x5b0   : > { %v3884_v26 = vadd.f32 %v3883_v27, %v3795_v51  ;;  %9665 = vst [vmem:[#allocation48_spill] sm:$0xff] %v8539_v60  ;;  %v5890_v51 = vld [vmem:[#allocation4 + $0x6c] sm:$0xf]  ;;  %v5668_v27 = vld [vmem:[#allocation4 + $0x168] sm:$0xf] }
 0x5b1   : > { %v3962_v46 = vpop.f32.mrf.mxu2  ;;  %v8552_v20 = vor.u32 %v5890_v51, %v5542_v6  ;;  %v5928_v51 = vld [vmem:[#allocation4 + $0x194] sm:$0xf0] }
 0x5b2   : > { %4398 = vmatpush.bf16.msrb.mxu3 %v3183_v13  ;;  %v8519_v0 = vadd.f32 %v3962_v46, %v8437_v30  ;;  %3922 = vmatmul.bf16.gmra.mxu1 %v8515_v28  ;;  %v5920_v30 = vld [vmem:[#allocation4 + $0x154] sm:$0xf0]  ;;  %v9668_v13 = vld [vmem:[#allocation39_spill] sm:$0xff] }
 0x5b3   : > { %4149 = vmatmul.bf16.gmra.mxu0 %v9659_v21  ;;  %v8533_v2 = vor.u32 %v5920_v30, %v5652_v45  ;;  %v3802_v8 = vadd.f32 %v9668_v13, %v9667_v9  ;;  %9669 = vst [vmem:[#allocation27_spill] sm:$0xff] %v8552_v20  ;;  %v8557_v21 = vor.u32 %v5924_v58, %v5668_v27 }
 0x5b5   : > { %9662 = vst [vmem:[#allocation46_spill] sm:$0xff] %v8533_v2 }
 0x5b6   : > { %4399 = vmatpush.bf16.msrb.mxu3 %v3181_v11  ;;  %v8550_v11 = vpop.f32.mrf.mxu0  ;;  %9670 = vst [vmem:[#allocation24_spill] sm:$0xff] %v8557_v21 }
 0x5b7   : > { %v3885_v35 = vpop.f32.mrf.mxu1 }
 0x5b8   : > { %v3886_v18 = vadd.f32 %v3885_v35, %v3797_v19  ;;  %v9671_v19 = vld [vmem:[#allocation61_spill] sm:$0xff] }
 0x5b9   : > { %v3964_v29 = vpop.f32.mrf.mxu2  ;;  %v3805_v7 = vadd.f32 %v9672_v40, %v9671_v19  ;;  %v9679_v40 = vld [vmem:[#allocation47_spill] sm:$0xff] }
 0x5ba   : > { %4400 = vmatpush.bf16.msrb.mxu3 %v3179_v34  ;;  %v8531_v25 = vadd.f32 %v3964_v29, %v8456_v23  ;;  %v5929_v34 = vld [vmem:[#allocation4 + $0x1a4] sm:$0xf] }
 0x5bb   : > { %v8563_v35 = vor.u32 %v5929_v34, %v5694_v57  ;;  %v5710_v34 = vld [vmem:[#allocation4 + $0x1d0] sm:$0xf0] }
 0x5bd   : > { %4055 = vmatmul.bf16.gmra.mxu3 %v8528_v39  ;;  %9673 = vst [vmem:[#allocation55_spill] sm:$0xff] %v8563_v35 }
 0x5be   : > { %4006 = vmatmul.bf16.gmra.mxu2 %v8533_v2 }
 0x5bf   : > { %v3888_v49 = vpop.f32.mrf.mxu1 }
 0x5c0   : > { %v3889_v42 = vadd.f32 %v3888_v49, %v3800_v5  ;;  %v9676_v5 = vld [vmem:[#allocation69_spill] sm:$0xff] }
 0x5c1   : > { %v3967_v44 = vpop.f32.mrf.mxu2  ;;  %v3807_v49 = vadd.f32 %v9676_v5, %v9675_v43  ;;  %v5700_v43 = vld [vmem:[#allocation4 + $0x1a8] sm:$0xf] }
 0x5c2   : > { %v8544_v23 = vadd.f32 %v3967_v44, %v8476_v17  ;;  %3927 = vmatmul.bf16.gmra.mxu1 %v8539_v60  ;;  %v5894_v44 = vld [vmem:[#allocation4 + $0x8c] sm:$0xf] }
 0x5c3   : > { %4154 = vmatmul.bf16.gmra.mxu0 %v9666_v32  ;;  %v5558_v32 = vld [vmem:[#allocation4 + $0x98] sm:$0xf0] }
 0x5c4   : > { %v8573_v27 = vor.u32 %v5894_v44, %v5558_v32  ;;  %v9682_v44 = vld [vmem:[#allocation44_spill] sm:$0xff]  ;;  %v9683_v32 = vld [vmem:[#allocation25_spill] sm:$0xff] }
 0x5c6   : > { %9677 = vst [vmem:[#allocation59_spill] sm:$0xff] %v8573_v27 }
 0x5c7   : > { %v3890_v55 = vpop.f32.mrf.mxu1 }
 0x5c8   : > { %v3891_v46 = vadd.f32 %v3890_v55, %v3802_v8  ;;  %v5684_v8 = vld [vmem:[#allocation4 + $0x188] sm:$0xf] }
 0x5c9   : > { %v3969_v16 = vpop.f32.mrf.mxu2  ;;  %v8577_v58 = vor.u32 %v5928_v51, %v5684_v8  ;;  %v5898_v51 = vld [vmem:[#allocation4 + $0xac] sm:$0xf] }
 0x5ca   : > { %v8555_v17 = vadd.f32 %v3969_v16, %v8495_v63  ;;  %v8568_v63 = vpop.f32.mrf.mxu0  ;;  %v5933_v16 = vld [vmem:[#allocation4 + $0x1c4] sm:$0xf] }
 0x5cb   : > { %9678 = vst [vmem:[#allocation41_spill] sm:$0xff] %v8577_v58 }
 0x5cd   : > { %4060 = vmatmul.bf16.gmra.mxu3 %v8552_v20 }
 0x5ce   : > { %4011 = vmatmul.bf16.gmra.mxu2 %v8557_v21 }
 0x5cf   : > { %v3893_v45 = vpop.f32.mrf.mxu1 }
 0x5d0   : > { %v3894_v30 = vadd.f32 %v3893_v45, %v3805_v7  ;;  %v9680_v7 = vld [vmem:[#allocation32_spill] sm:$0xff] }
 0x5d1   : > { %v3972_v29 = vpop.f32.mrf.mxu2  ;;  %v3810_v45 = vadd.f32 %v9680_v7, %v9679_v40 }
 0x5d2   : > { %v8565_v48 = vadd.f32 %v3972_v29, %v3884_v26  ;;  %3932 = vmatmul.bf16.gmra.mxu1 %v8563_v35  ;;  %v8579_v57 = vpop.f32.mrf.mxu0  ;;  %v8585_v29 = vor.u32 %v5933_v16, %v5710_v34  ;;  %v5932_v16 = vld [vmem:[#allocation4 + $0x1b4] sm:$0xf0] }
 0x5d3   : > { %4159 = vmatmul.bf16.gmra.mxu0 %v9674_v1 }
 0x5d4   : > { %9681 = vst [vmem:[#allocation70_spill] sm:$0xff] %v8585_v29 }
 0x5d7   : > { %v3895_v13 = vpop.f32.mrf.mxu1 }
 0x5d8   : > { %v3896_v6 = vadd.f32 %v3895_v13, %v3807_v49  ;;  %v9684_v13 = vld [vmem:[#allocation77_spill] sm:$0xff] }
 0x5d9   : > { %v3974_v55 = vpop.f32.mrf.mxu2  ;;  %v3812_v8 = vadd.f32 %v9684_v13, %v9683_v32  ;;  %v9687_v13 = vld [vmem:[#allocation15_spill] sm:$0xff] }
 0x5da   : > { %v8575_v26 = vadd.f32 %v3974_v55, %v3886_v18  ;;  %v5574_v55 = vld [vmem:[#allocation4 + $0xb8] sm:$0xf0]  ;;  %v8593_v9 = vpop.f32.mrf.mxu0  ;;  %v3815_v32 = vadd.f32 %v8395_v14, %v9687_v13  ;;  %v5936_v13 = vld [vmem:[#allocation4 + $0x1d4] sm:$0xf0] }
 0x5dd   : > { %4065 = vmatmul.bf16.gmra.mxu3 %v8573_v27 }
 0x5de   : > { %4016 = vmatmul.bf16.gmra.mxu2 %v8577_v58 }
 0x5df   : > { %v3898_v1 = vpop.f32.mrf.mxu1 }
 0x5e0   : > { %v3899_v5 = vadd.f32 %v3898_v1, %v3810_v45  ;;  %v8595_v45 = vor.u32 %v5898_v51, %v5574_v55  ;;  %v8599_v1 = vor.u32 %v5932_v16, %v5700_v43  ;;  %v8612_v43 = vpop.permute.xlu1 %3387  ;;  %v9691_v55 = vld [vmem:[#allocation42_spill] sm:$0xff]  ;;  %v5902_v16 = vld [vmem:[#allocation4 + $0xcc] sm:$0xf] }
 0x5e1   : > { %v3977_v49 = vpop.f32.mrf.mxu2  ;;  %9689 = vst [vmem:[#allocation52_spill] sm:$0xff] %v8612_v43  ;;  %v3817_v14 = vadd.f32 %v8413_v50, %v9691_v55  ;;  %v5906_v55 = vld [vmem:[#allocation4 + $0xec] sm:$0xf] }
 0x5e2   : > { %v8587_v18 = vadd.f32 %v3977_v49, %v3889_v42  ;;  %3937 = vmatmul.bf16.gmra.mxu1 %v8585_v29  ;;  %9685 = vst [vmem:[#allocation29_spill] sm:$0xff] %v8595_v45  ;;  %v5937_v49 = vld [vmem:[#allocation4 + $0x1e4] sm:$0xf] }
 0x5e3   : > { %4164 = vmatmul.bf16.gmra.mxu0 %v9682_v44  ;;  %9686 = vst [vmem:[#allocation74_spill] sm:$0xff] %v8599_v1  ;;  %v5726_v44 = vld [vmem:[#allocation4 + $0x1f0] sm:$0xf0] }
 0x5e4   : > { %v8605_v29 = vor.u32 %v5937_v49, %v5726_v44  ;;  %v5716_v44 = vld [vmem:[#allocation4 + $0x1c8] sm:$0xf] }
 0x5e6   : > { %9688 = vst [vmem:[#allocation45_spill] sm:$0xff] %v8605_v29 }
 0x5e7   : > { %v3900_v7 = vpop.f32.mrf.mxu1 }
 0x5e8   : > { %v3901_v34 = vadd.f32 %v3900_v7, %v3812_v8  ;;  %v8607_v7 = vpop.f32.mrf.mxu0  ;;  %v8625_v27 = vpop.permute.xlu1 %3372 }
 0x5e9   : > { %v3979_v58 = vpop.f32.mrf.mxu2  ;;  %9694 = vst [vmem:[#allocation58_spill] sm:$0xff] %v8625_v27  ;;  %v3820_v50 = vadd.f32 %v8428_v41, %v8625_v27  ;;  %v5606_v41 = vld [vmem:[#allocation4 + $0xf8] sm:$0xf0] }
 0x5ea   : > { %v8597_v42 = vadd.f32 %v3979_v58, %v3891_v46  ;;  %v9690_v58 = vld [vmem:[#allocation30_spill] sm:$0xff] }
 0x5ed   : > { %4070 = vmatmul.bf16.gmra.mxu3 %v8595_v45 }
 0x5ee   : > { %4021 = vmatmul.bf16.gmra.mxu2 %v8599_v1  ;;  %v5590_v1 = vld [vmem:[#allocation4 + $0xd8] sm:$0xf0] }
 0x5ef   : > { %v3903_v40 = vpop.f32.mrf.mxu1  ;;  %v8617_v45 = vor.u32 %v5902_v16, %v5590_v1  ;;  %v8635_v16 = vpop.permute.xlu2 %3377 }
 0x5f0   : > { %v3904_v8 = vadd.f32 %v3903_v40, %v3815_v32  ;;  %9697 = vst [vmem:[#allocation69_spill] sm:$0xff] %v8635_v16 }
 0x5f1   : > { %v3982_v51 = vpop.f32.mrf.mxu2  ;;  %9692 = vst [vmem:[#allocation39_spill] sm:$0xff] %v8617_v45 }
 0x5f2   : > { %v8609_v46 = vadd.f32 %v3982_v51, %v3894_v30  ;;  %3942 = vmatmul.bf16.gmra.mxu1 %v8605_v29  ;;  %v8621_v51 = vor.u32 %v5936_v13, %v5716_v44  ;;  %v8623_v29 = vpop.f32.mrf.mxu0  ;;  %v9696_v13 = vld [vmem:[#allocation34_spill] sm:$0xff] }
 0x5f3   : > { %4169 = vmatmul.bf16.gmra.mxu0 %v9690_v58 }
 0x5f4   : > { %9693 = vst [vmem:[#allocation66_spill] sm:$0xff] %v8621_v51 }
 0x5f7   : > { %v3905_v49 = vpop.f32.mrf.mxu1 }
 0x5f8   : > { %v3906_v40 = vadd.f32 %v3905_v49, %v3817_v14 }
 0x5f9   : > { %v3984_v32 = vpop.f32.mrf.mxu2 }
 0x5fa   : > { %v8619_v30 = vadd.f32 %v3984_v32, %v3896_v6  ;;  %v9695_v6 = vld [vmem:[#allocation26_spill] sm:$0xff]  ;;  %v8637_v44 = vpop.f32.mrf.mxu0  ;;  %v3822_v32 = vadd.f32 %v8452_v59, %v8635_v16 }
 0x5fd   : > { %4075 = vmatmul.bf16.gmra.mxu3 %v8617_v45  ;;  %v5940_v45 = vld [vmem:[#allocation4 + $0x1f4] sm:$0xf0] }
 0x5fe   : > { %4026 = vmatmul.bf16.gmra.mxu2 %v8621_v51  ;;  %v5732_v51 = vld [vmem:[#allocation4 + $0x1e8] sm:$0xf] }
 0x5ff   : > { %v3908_v58 = vpop.f32.mrf.mxu1 }
 0x600   : > { %v3909_v14 = vadd.f32 %v3908_v58, %v3820_v50 }
 0x601   : > { %v3987_v49 = vpop.f32.mrf.mxu2 }
 0x602   : > { %v8631_v1 = vadd.f32 %v3987_v49, %v3899_v5  ;;  %4223 = vmatmul.bf16.vlgmr.msrb.gmra.mxu1 %v9695_v6  ;;  %v8641_v5 = vor.u32 %v5906_v55, %v5606_v41  ;;  %v8645_v6 = vor.u32 %v5940_v45, %v5732_v51  ;;  %v8651_v59 = vpop.f32.mrf.mxu0  ;;  %v9700_v55 = vld [vmem:[#allocation16_spill] sm:$0xff]  ;;  %v3827_v45 = vadd.f32 %v8508_v12, %v8612_v43 }
 0x603   : > { %4174 = vmatmul.bf16.gmra.mxu0 %v9696_v13  ;;  %v3825_v13 = vadd.f32 %v8479_v54, %v8399_v15  ;;  %v5910_v51 = vld [vmem:[#allocation4 + $0x10c] sm:$0xf] }
 0x604   : > { %9698 = vst [vmem:[#allocation32_spill] sm:$0xff] %v8641_v5 }
 0x605   : > { %9699 = vst [vmem:[#allocation44_spill] sm:$0xff] %v8645_v6 }
 0x607   : > { %v3910_v27 = vpop.f32.mrf.mxu1 }
 0x608   : > { %v3911_v50 = vadd.f32 %v3910_v27, %v3822_v32  ;;  %v5622_v32 = vld [vmem:[#allocation4 + $0x118] sm:$0xf0] }
 0x609   : > { %v3989_v58 = vpop.f32.mrf.mxu2  ;;  %v8661_v15 = vor.u32 %v5910_v51, %v5622_v32 }
 0x60a   : > { %v8643_v49 = vadd.f32 %v3989_v58, %v3901_v34  ;;  %v9701_v34 = vld [vmem:[#allocation19_spill] sm:$0xff]  ;;  %v8659_v58 = vpop.f32.mrf.mxu0 }
 0x60b   : > { %9702 = vst [vmem:[#allocation77_spill] sm:$0xff] %v8661_v15 }
 0x60d   : > { %4080 = vmatmul.bf16.gmra.mxu3 %v8641_v5  ;;  %v9705_v5 = vld [vmem:[#allocation49_spill] sm:$0xff] }
 0x60e   : > { %4031 = vmatmul.bf16.gmra.mxu2 %v8645_v6 }
 0x60f   : > { %v3913_v16 = vpop.f32.mrf.mxu1 }
 0x610   : > { %v3914_v35 = vadd.f32 %v3913_v16, %v3825_v13  ;;  %v9704_v13 = vld [vmem:[#allocation60_spill] sm:$0xff] }
 0x611   : > { %v3992_v21 = vpop.f32.mrf.mxu2 }
 0x612   : > { %v8653_v27 = vadd.f32 %v3992_v21, %v3904_v8  ;;  %4228 = vmatmul.bf16.gmra.mxu1 %v9700_v55  ;;  %v9703_v21 = vld [vmem:[#allocation36_spill] sm:$0xff]  ;;  %v8673_v51 = vpop.f32.mrf.mxu0 }
 0x613   : > { %4179 = vmatmul.bf16.gmra.mxu0 %v9701_v34  ;;  %v3830_v8 = vadd.f32 %v8524_v61, %v9703_v21  ;;  %v5914_v61 = vld [vmem:[#allocation4 + $0x12c] sm:$0xf]  ;;  %v5638_v21 = vld [vmem:[#allocation4 + $0x138] sm:$0xf0] }
 0x617   : > { %v3915_v41 = vpop.f32.mrf.mxu1 }
 0x618   : > { %v3916_v54 = vadd.f32 %v3915_v41, %v3827_v45 }
 0x619   : > { %v3994_v6 = vpop.f32.mrf.mxu2 }
 0x61a   : > { %v8663_v16 = vadd.f32 %v3994_v6, %v3906_v40  ;;  %v9706_v40 = vld [vmem:[#allocation57_spill] sm:$0xff]  ;;  %v9707_v6 = vld [vmem:[#allocation78_spill] sm:$0xff] }
 0x61b   : > { %v3832_v32 = vadd.f32 %v8541_v47, %v9707_v6  ;;  %v9709_v47 = vld [vmem:[#allocation17_spill] sm:$0xff] }
 0x61c   : > { %v3835_v6 = vadd.f32 %v8550_v11, %v9709_v47 }
 0x61d   : > { %4085 = vmatmul.bf16.gmra.mxu3 %v8661_v15 }
 0x61e   : > { %4312 = vmatmul.bf16.vlgmr.msrb.gmra.mxu2 %v9704_v13 }
 0x61f   : > { %v3918_v55 = vpop.f32.mrf.mxu1 }
 0x620   : > { %v3919_v12 = vadd.f32 %v3918_v55, %v3830_v8  ;;  %v4046_v34 = vpop.f32.mrf.mxu3 }
 0x621   : > { %v3997_v43 = vpop.f32.mrf.mxu2  ;;  %v4047_v45 = vadd.f32 %v4046_v34, %v8482_v36  ;;  %v8679_v36 = vor.u32 %v5914_v61, %v5638_v21  ;;  %v8683_v34 = vpop.f32.mrf.mxu0 }
 0x622   : > { %v8670_v41 = vadd.f32 %v3997_v43, %v3909_v14  ;;  %4233 = vmatmul.bf16.gmra.mxu1 %v9705_v5 }
 0x623   : > { %4184 = vmatmul.bf16.gmra.mxu0 %v9706_v40  ;;  %9708 = vst [vmem:[#allocation30_spill] sm:$0xff] %v8679_v36  ;;  %v4482_v14 = vmax.f32 %v4047_v45, 0.0  ;;  %v9712_v45 = vld [vmem:[#allocation40_spill] sm:$0xff] }
 0x627   : > { %v3920_v13 = vpop.f32.mrf.mxu1 }
 0x628   : > { %v3921_v15 = vadd.f32 %v3920_v13, %v3832_v32  ;;  %v4048_v8 = vpop.f32.mrf.mxu3  ;;  %v9710_v32 = vld [vmem:[#allocation37_spill] sm:$0xff] }
 0x629   : > { %v3999_v55 = vpop.f32.mrf.mxu2  ;;  %v4049_v19 = vadd.f32 %v4048_v8, %v8501_v33  ;;  %v9713_v8 = vld [vmem:[#allocation73_spill] sm:$0xff]  ;;  %v8698_v11 = vpop.f32.mrf.mxu0 }
 0x62a   : > { %v8681_v43 = vadd.f32 %v3999_v55, %v3911_v50  ;;  %v3837_v55 = vadd.f32 %v8568_v63, %v9713_v8  ;;  %v9715_v63 = vld [vmem:[#allocation67_spill] sm:$0xff]  ;;  %v9716_v8 = vld [vmem:[#allocation22_spill] sm:$0xff] }
 0x62b   : > { %v4484_v5 = vmax.f32 %v4049_v19, 0.0  ;;  %v9711_v19 = vld [vmem:[#allocation31_spill] sm:$0xff] }
 0x62d   : > { %4090 = vmatmul.bf16.gmra.mxu3 %v8679_v36  ;;  %v8686_v40 = vpack.c.bf16 %v4484_v5, %v4482_v14  ;;  %v5918_v14 = vld [vmem:[#allocation4 + $0x14c] sm:$0xf]  ;;  %v5654_v5 = vld [vmem:[#allocation4 + $0x158] sm:$0xf0] }
 0x62e   : > { %4317 = vmatmul.bf16.gmra.mxu2 %v9710_v32 }
 0x62f   : > { %v3923_v13 = vpop.f32.mrf.mxu1 }
 0x630   : > { %v3924_v20 = vadd.f32 %v3923_v13, %v3835_v6  ;;  %v4051_v33 = vpop.f32.mrf.mxu3 }
 0x631   : > { %v4002_v21 = vpop.f32.mrf.mxu2  ;;  %v4052_v50 = vadd.f32 %v4051_v33, %v8519_v0  ;;  %v8701_v0 = vor.u32 %v5918_v14, %v5654_v5  ;;  %v8711_v2 = vpop.f32.mrf.mxu0  ;;  %v9719_v5 = vld [vmem:[#allocation28_spill] sm:$0xff] }
 0x632   : > { %v8692_v61 = vadd.f32 %v4002_v21, %v3914_v35  ;;  %4238 = vmatmul.bf16.gmra.mxu1 %v9711_v19 }
 0x633   : > { %4189 = vmatmul.bf16.gmra.mxu0 %v9712_v45  ;;  %9714 = vst [vmem:[#allocation26_spill] sm:$0xff] %v8701_v0  ;;  %v4486_v33 = vmax.f32 %v4052_v50, 0.0  ;;  %v3840_v45 = vadd.f32 %v8579_v57, %v9715_v63  ;;  %v9718_v50 = vld [vmem:[#allocation51_spill] sm:$0xff]  ;;  %v5922_v57 = vld [vmem:[#allocation4 + $0x16c] sm:$0xf] }
 0x637   : > { %v3925_v32 = vpop.f32.mrf.mxu1 }
 0x638   : > { %v3926_v47 = vadd.f32 %v3925_v32, %v3837_v55  ;;  %v4053_v6 = vpop.f32.mrf.mxu3 }
 0x639   : > { %v4004_v13 = vpop.f32.mrf.mxu2  ;;  %v4054_v36 = vadd.f32 %v4053_v6, %v8531_v25  ;;  %v3842_v6 = vadd.f32 %v8593_v9, %v9719_v5  ;;  %v9721_v9 = vld [vmem:[#allocation56_spill] sm:$0xff] }
 0x63a   : > { %v8703_v35 = vadd.f32 %v4004_v13, %v3916_v54  ;;  %v5670_v13 = vld [vmem:[#allocation4 + $0x178] sm:$0xf0] }
 0x63b   : > { %v4488_v21 = vmax.f32 %v4054_v36, 0.0  ;;  %v9717_v36 = vld [vmem:[#allocation53_spill] sm:$0xff]  ;;  %v8721_v63 = vor.u32 %v5922_v57, %v5670_v13 }
 0x63d   : > { %4095 = vmatmul.bf16.gmra.mxu3 %v8701_v0  ;;  %v8706_v19 = vpack.c.bf16 %v4488_v21, %v4486_v33  ;;  %9720 = vst [vmem:[#allocation34_spill] sm:$0xff] %v8721_v63 }
 0x63e   : > { %4322 = vmatmul.bf16.gmra.mxu2 %v9716_v8 }
 0x63f   : > { %v3928_v55 = vpop.f32.mrf.mxu1 }
 0x640   : > { %v3929_v32 = vadd.f32 %v3928_v55, %v3840_v45  ;;  %v4056_v60 = vpop.f32.mrf.mxu3 }
 0x641   : > { %v4007_v25 = vpop.f32.mrf.mxu2  ;;  %v4057_v54 = vadd.f32 %v4056_v60, %v8544_v23  ;;  %v8725_v23 = vpop.f32.mrf.mxu0 }
 0x642   : > { %v8714_v14 = vadd.f32 %v4007_v25, %v3919_v12  ;;  %4243 = vmatmul.bf16.gmra.mxu1 %v9717_v36 }
 0x643   : > { %4194 = vmatmul.bf16.gmra.mxu0 %v9718_v50  ;;  %v4490_v12 = vmax.f32 %v4057_v54, 0.0  ;;  %v3845_v50 = vadd.f32 %v8607_v7, %v9721_v9  ;;  %v9724_v54 = vld [vmem:[#allocation63_spill] sm:$0xff]  ;;  %v5926_v7 = vld [vmem:[#allocation4 + $0x18c] sm:$0xf] }
 0x647   : > { %v3930_v8 = vpop.f32.mrf.mxu1 }
 0x648   : > { %v3931_v33 = vadd.f32 %v3930_v8, %v3842_v6  ;;  %v4058_v21 = vpop.f32.mrf.mxu3  ;;  %v9722_v6 = vld [vmem:[#allocation35_spill] sm:$0xff] }
 0x649   : > { %v4009_v45 = vpop.f32.mrf.mxu2  ;;  %v4059_v55 = vadd.f32 %v4058_v21, %v8555_v17  ;;  %v9723_v21 = vld [vmem:[#allocation64_spill] sm:$0xff] }
 0x64a   : > { %v8723_v60 = vadd.f32 %v4009_v45, %v3921_v15  ;;  %v8738_v45 = vpop.f32.mrf.mxu0 }
 0x64b   : > { %v4492_v25 = vmax.f32 %v4059_v55, 0.0  ;;  %v9725_v55 = vld [vmem:[#allocation33_spill] sm:$0xff] }
 0x64d   : > { %4100 = vmatmul.bf16.gmra.mxu3 %v8721_v63  ;;  %v8728_v36 = vpack.c.bf16 %v4492_v25, %v4490_v12  ;;  %v3847_v12 = vadd.f32 %v8623_v29, %v9725_v55  ;;  %v5686_v25 = vld [vmem:[#allocation4 + $0x198] sm:$0xf0]  ;;  %v9729_v55 = vld [vmem:[#allocation68_spill] sm:$0xff] }
 0x64e   : > { %4327 = vmatmul.bf16.gmra.mxu2 %v9722_v6 }
 0x64f   : > { %v3933_v8 = vpop.f32.mrf.mxu1 }
 0x650   : > { %v3934_v5 = vadd.f32 %v3933_v8, %v3845_v50  ;;  %v4061_v17 = vpop.f32.mrf.mxu3 }
 0x651   : > { %v4012_v57 = vpop.f32.mrf.mxu2  ;;  %v4062_v15 = vadd.f32 %v4061_v17, %v8565_v48  ;;  %v8743_v48 = vor.u32 %v5926_v7, %v5686_v25 }
 0x652   : > { %v8734_v13 = vadd.f32 %v4012_v57, %v3924_v20  ;;  %4248 = vmatmul.bf16.gmra.mxu1 %v9723_v21 }
 0x653   : > { %4199 = vmatmul.bf16.gmra.mxu0 %v9724_v54  ;;  %9726 = vst [vmem:[#allocation16_spill] sm:$0xff] %v8743_v48  ;;  %v4494_v17 = vmax.f32 %v4062_v15, 0.0  ;;  %v9728_v54 = vld [vmem:[#allocation65_spill] sm:$0xff]  ;;  %v9732_v15 = vld [vmem:[#allocation71_spill] sm:$0xff] }
 0x654   : > { %v3850_v29 = vadd.f32 %v8637_v44, %v9728_v54  ;;  %v5930_v44 = vld [vmem:[#allocation4 + $0x1ac] sm:$0xf] }
 0x657   : > { %v3935_v6 = vpop.f32.mrf.mxu1 }
 0x658   : > { %v3936_v9 = vadd.f32 %v3935_v6, %v3847_v12  ;;  %v4063_v50 = vpop.f32.mrf.mxu3  ;;  %v8753_v12 = vpop.f32.mrf.mxu0 }
 0x659   : > { %v4014_v8 = vpop.f32.mrf.mxu2  ;;  %v4064_v63 = vadd.f32 %v4063_v50, %v8575_v26  ;;  %v9733_v50 = vld [vmem:[#allocation20_spill] sm:$0xff] }
 0x65a   : > { %v8745_v20 = vadd.f32 %v4014_v8, %v3926_v47  ;;  %v3852_v8 = vadd.f32 %v8651_v59, %v9733_v50  ;;  %v9735_v59 = vld [vmem:[#allocation43_spill] sm:$0xff] }
 0x65b   : > { %v4496_v57 = vmax.f32 %v4064_v63, 0.0  ;;  %v9731_v63 = vld [vmem:[#allocation72_spill] sm:$0xff] }
 0x65c   : > { %9727 = vst [vmem:[#allocation19_spill] sm:$0xff] %v8745_v20 }
 0x65d   : > { %4105 = vmatmul.bf16.gmra.mxu3 %v8743_v48  ;;  %v8748_v21 = vpack.c.bf16 %v4496_v57, %v4494_v17  ;;  %v5702_v17 = vld [vmem:[#allocation4 + $0x1b8] sm:$0xf0] }
 0x65e   : > { %4332 = vmatmul.bf16.gmra.mxu2 %v9729_v55 }
 0x65f   : > { %v3938_v6 = vpop.f32.mrf.mxu1 }
 0x660   : > { %v3939_v0 = vadd.f32 %v3938_v6, %v3850_v29  ;;  %v4066_v26 = vpop.f32.mrf.mxu3  ;;  %v8762_v48 = vpop.f32.mrf.mxu0 }
 0x661   : > { %v4017_v7 = vpop.f32.mrf.mxu2  ;;  %v4067_v47 = vadd.f32 %v4066_v26, %v8587_v18  ;;  %v8765_v18 = vor.u32 %v5930_v44, %v5702_v17  ;;  %v9740_v44 = vld [vmem:[#allocation50_spill] sm:$0xff] }
 0x662   : > { %v8756_v25 = vadd.f32 %v4017_v7, %v3929_v32  ;;  %4253 = vmatmul.bf16.gmra.mxu1 %v9731_v63  ;;  %v3857_v17 = vadd.f32 %v8673_v51, %v9740_v44  ;;  %v9741_v51 = vld [vmem:[#allocation79_spill] sm:$0xff] }
 0x663   : > { %4204 = vmatmul.bf16.gmra.mxu0 %v9732_v15  ;;  %9734 = vst [vmem:[#allocation49_spill] sm:$0xff] %v8765_v18  ;;  %v4498_v26 = vmax.f32 %v4067_v47, 0.0  ;;  %v3855_v15 = vadd.f32 %v8659_v58, %v9735_v59  ;;  %v9739_v47 = vld [vmem:[#allocation75_spill] sm:$0xff]  ;;  %v4136_v44 = vadd.f32 %v8683_v34, %v9741_v51 }
 0x664   : > { %9730 = vst [vmem:[#allocation60_spill] sm:$0xff] %v8756_v25 }
 0x667   : > { %v3940_v55 = vpop.f32.mrf.mxu1 }
 0x668   : > { %v3941_v57 = vadd.f32 %v3940_v55, %v3852_v8  ;;  %v4068_v54 = vpop.f32.mrf.mxu3  ;;  %v9736_v8 = vld [vmem:[#allocation21_spill] sm:$0xff] }
 0x669   : > { %v4019_v29 = vpop.f32.mrf.mxu2  ;;  %v4069_v6 = vadd.f32 %v4068_v54, %v8597_v42  ;;  %v9738_v54 = vld [vmem:[#allocation76_spill] sm:$0xff] }
 0x66a   : > { %v8767_v32 = vadd.f32 %v4019_v29, %v3931_v33  ;;  %v8778_v33 = vpop.f32.mrf.mxu0  ;;  %v5934_v29 = vld [vmem:[#allocation4 + $0x1cc] sm:$0xf] }
 0x66b   : > { %v4500_v7 = vmax.f32 %v4069_v6, 0.0  ;;  %v5718_v6 = vld [vmem:[#allocation4 + $0x1d8] sm:$0xf0] }
 0x66d   : > { %4110 = vmatmul.bf16.gmra.mxu3 %v8765_v18  ;;  %v8770_v63 = vpack.c.bf16 %v4500_v7, %v4498_v26  ;;  %v9742_v18 = vld [vmem:[#allocation23_spill] sm:$0xff] }
 0x66e   : > { %4337 = vmatmul.bf16.gmra.mxu2 %v9736_v8 }
 0x66f   : > { %v3943_v55 = vpop.f32.mrf.mxu1 }
 0x670   : > { %v3944_v50 = vadd.f32 %v3943_v55, %v3855_v15  ;;  %v4071_v25 = vpop.f32.mrf.mxu3 }
 0x671   : > { %v4022_v20 = vpop.f32.mrf.mxu2  ;;  %v4072_v58 = vadd.f32 %v4071_v25, %v8609_v46 }
 0x672   : > { %v8775_v42 = vadd.f32 %v4022_v20, %v3934_v5  ;;  %4258 = vmatmul.bf16.gmra.mxu1 %v9738_v54  ;;  %v8785_v20 = vor.u32 %v5934_v29, %v5718_v6  ;;  %v5938_v6 = vld [vmem:[#allocation4 + $0x1ec] sm:$0xf] }
 0x673   : > { %4209 = vmatmul.bf16.gmra.mxu0 %v9739_v47  ;;  %v4502_v54 = vmax.f32 %v4072_v58, 0.0  ;;  %v5734_v58 = vld [vmem:[#allocation4 + $0x1f8] sm:$0xf0] }
 0x674   : > { %9737 = vst [vmem:[#allocation57_spill] sm:$0xff] %v8775_v42 }
 0x677   : > { %v3945_v26 = vpop.f32.mrf.mxu1 }
 0x678   : > { %v3946_v7 = vadd.f32 %v3945_v26, %v3857_v17  ;;  %v4073_v15 = vpop.f32.mrf.mxu3 }
 0x679   : > { %v4024_v8 = vpop.f32.mrf.mxu2  ;;  %v4074_v5 = vadd.f32 %v4073_v15, %v8619_v30  ;;  %v9743_v30 = vld [vmem:[#allocation80_spill] sm:$0xff] }
 0x67a   : > { %v8787_v55 = vadd.f32 %v4024_v8, %v3936_v9  ;;  %v9744_v9 = vld [vmem:[#allocation54_spill] sm:$0xff] }
 0x67b   : > { %v4504_v59 = vmax.f32 %v4074_v5, 0.0  ;;  %v4138_v29 = vadd.f32 %v8698_v11, %v9744_v9  ;;  %v9745_v11 = vld [vmem:[#allocation82_spill] sm:$0xff] }
 0x67d   : > { %4115 = vmatmul.bf16.gmra.mxu3 %v8785_v20  ;;  %v4556_v47 = vpack.c.bf16 %v4504_v59, %v4502_v54 }
 0x67e   : > { %4342 = vmatmul.bf16.gmra.mxu2 %v9742_v18 }
 0x67f   : > { %v4224_v46 = vpop.f32.mrf.mxu1 }
 0x680   : > { %v4225_v25 = vadd.f32 %v4224_v46, %v4136_v44  ;;  %v4076_v17 = vpop.f32.mrf.mxu3  ;;  %v8800_v44 = vor.u32 %v5938_v6, %v5734_v58 }
 0x681   : > { %v4027_v26 = vpop.f32.mrf.mxu2  ;;  %v4077_v59 = vadd.f32 %v4076_v17, %v8631_v1  ;;  %v8808_v1 = vpop.f32.mrf.mxu0 }
 0x682   : > { %v8793_v42 = vadd.f32 %v4027_v26, %v3939_v0  ;;  %4263 = vmatmul.bf16.gmra.mxu1 %v9743_v30  ;;  %v4141_v26 = vadd.f32 %v8711_v2, %v9745_v11  ;;  %v9746_v30 = vld [vmem:[#allocation81_spill] sm:$0xff] }
 0x683   : > { %v4506_v0 = vmax.f32 %v4077_v59, 0.0 }
 0x687   : > { %v4226_v15 = vpop.f32.mrf.mxu1 }
 0x688   : > { %v4227_v8 = vadd.f32 %v4226_v15, %v4138_v29  ;;  %v4078_v34 = vpop.f32.mrf.mxu3 }
 0x689   : > { %v4029_v5 = vpop.f32.mrf.mxu2  ;;  %v4079_v18 = vadd.f32 %v4078_v34, %v8643_v49  ;;  %v8816_v34 = vpop.f32.mrf.mxu0 }
 0x68a   : > { %v8802_v54 = vadd.f32 %v4029_v5, %v3941_v57  ;;  %v4143_v57 = vadd.f32 %v8725_v23, %v8387_v22  ;;  %v4146_v22 = vadd.f32 %v8738_v45, %v8364_v56 }
 0x68b   : > { %v4508_v51 = vmax.f32 %v4079_v18, 0.0 }
 0x68d   : > { %4120 = vmatmul.bf16.gmra.mxu3 %v8800_v44  ;;  %v4558_v46 = vpack.c.bf16 %v4508_v51, %v4506_v0 }
 0x68e   : > { %4347 = vmatmul.bf16.gmra.mxu2 %v9746_v30 }
 0x68f   : > { %v4229_v17 = vpop.f32.mrf.mxu1 }
 0x690   : > { %v4230_v9 = vadd.f32 %v4229_v17, %v4141_v26  ;;  %v4081_v29 = vpop.f32.mrf.mxu3 }
 0x691   : > { %v4032_v49 = vpop.f32.mrf.mxu2  ;;  %v4082_v58 = vadd.f32 %v4081_v29, %v8653_v27 }
 0x692   : > { %v8810_v6 = vadd.f32 %v4032_v49, %v3944_v50  ;;  %4268 = vmatmul.bf16.gmra.mxu1 %v8434_v24 }
 0x693   : > { %v4510_v51 = vmax.f32 %v4082_v58, 0.0 }
 0x697   : > { %v4231_v59 = vpop.f32.mrf.mxu1 }
 0x698   : > { %v4232_v15 = vadd.f32 %v4231_v59, %v4143_v57  ;;  %v4083_v2 = vpop.f32.mrf.mxu3 }
 0x699   : > { %v4034_v5 = vpop.f32.mrf.mxu2  ;;  %v4084_v18 = vadd.f32 %v4083_v2, %v8663_v16  ;;  %v4156_v2 = vadd.f32 %v8808_v1, %v9663_v38  ;;  %v5748_v38 = vld [vmem:[%s9315_s9 + $0x10] sm:$0xf]  ;;  %v5944_v1 = vld [vmem:[%s9315_s9 + $0x14] sm:$0xf0] }
 0x69a   : > { %v8819_v0 = vadd.f32 %v4034_v5, %v3946_v7  ;;  %v8829_v7 = vpop.f32.mrf.mxu0  ;;  %v9747_v5 = vld [vmem:[#allocation46_spill] sm:$0xff] }
 0x69b   : > { %v4512_v50 = vmax.f32 %v4084_v18, 0.0 }
 0x69d   : > { %v4560_v11 = vpack.c.bf16 %v4512_v50, %v4510_v51  ;;  %4401 = vmatmul.bf16.vlgmr.msrb.gmra.mxu3 %v8459_v53  ;;  %v4148_v53 = vadd.f32 %v8753_v12, %v8411_v4  ;;  %v4151_v4 = vadd.f32 %v8762_v48, %v9655_v52  ;;  %v5740_v48 = vld [vmem:[%s9315_s9] sm:$0xf] }
 0x69e   : > { %4352 = vmatmul.bf16.gmra.mxu2 %v8462_v31 }
 0x69f   : > { %v4234_v24 = vpop.f32.mrf.mxu1  ;;  %4674 = vmatpush.bf16.msra.mxu0 %v4560_v11 }
 0x6a0   : > { %v4235_v27 = vadd.f32 %v4234_v24, %v4146_v22  ;;  %v4086_v23 = vpop.f32.mrf.mxu3 }
 0x6a1   : > { %v4087_v26 = vadd.f32 %v4086_v23, %v8670_v41  ;;  %v4313_v30 = vpop.f32.mrf.mxu2 }
 0x6a2   : > { %v8826_v16 = vadd.f32 %v4313_v30, %v4225_v25  ;;  %4273 = vmatmul.bf16.gmra.mxu1 %v8472_v3  ;;  %v8837_v3 = vpop.f32.mrf.mxu0 }
 0x6a3   : > { %4675 = vmatpush.bf16.msra.mxu0 %v4558_v46  ;;  %v4514_v41 = vmax.f32 %v4087_v26, 0.0 }
 0x6a7   : > { %v4236_v56 = vpop.f32.mrf.mxu1  ;;  %4676 = vmatpush.bf16.msra.mxu0 %v4556_v47 }
 0x6a8   : > { %v4237_v31 = vadd.f32 %v4236_v56, %v4148_v53  ;;  %v4088_v45 = vpop.f32.mrf.mxu3 }
 0x6a9   : > { %v4089_v17 = vadd.f32 %v4088_v45, %v8681_v43  ;;  %v4315_v29 = vpop.f32.mrf.mxu2  ;;  %v9749_v45 = vld [vmem:[#allocation27_spill] sm:$0xff] }
 0x6aa   : > { %v8834_v49 = vadd.f32 %v4315_v29, %v4227_v8  ;;  %v8853_v52 = vpop.f32.mrf.mxu0  ;;  %v9750_v29 = vld [vmem:[#allocation61_spill] sm:$0xff] }
 0x6ab   : > { %v4516_v25 = vmax.f32 %v4089_v17, 0.0  ;;  %4677 = vmatpush.bf16.msra.mxu0 %v8770_v63 }
 0x6ad   : > { %4406 = vmatmul.bf16.gmra.mxu3 %v8498_v62  ;;  %v8840_v46 = vpack.c.bf16 %v4516_v25, %v4514_v41  ;;  %v4153_v62 = vadd.f32 %v8778_v33, %v9660_v10  ;;  %v4161_v41 = vadd.f32 %v8829_v7, %v9750_v29  ;;  %v9751_v25 = vld [vmem:[#allocation24_spill] sm:$0xff]  ;;  %v5756_v7 = vld [vmem:[%s9315_s9 + $0x20] sm:$0xf] }
 0x6ae   : > { %4357 = vmatmul.bf16.gmra.mxu2 %v8503_v37 }
 0x6af   : > { %v4239_v12 = vpop.f32.mrf.mxu1  ;;  %4678 = vmatpush.bf16.msra.mxu0 %v8748_v21 }
 0x6b0   : > { %v4240_v43 = vadd.f32 %v4239_v12, %v4151_v4  ;;  %v4091_v47 = vpop.f32.mrf.mxu3 }
 0x6b1   : > { %v4092_v8 = vadd.f32 %v4091_v47, %v8692_v61  ;;  %v4318_v57 = vpop.f32.mrf.mxu2  ;;  %v5942_v61 = vld [vmem:[%s9315_s9 + $0x4] sm:$0xf0] }
 0x6b2   : > { %v8847_v63 = vadd.f32 %v4318_v57, %v4230_v9  ;;  %4278 = vmatmul.bf16.gmra.mxu1 %v8515_v28  ;;  %v8865_v10 = vor.u32 %v5942_v61, %v5740_v48  ;;  %v8875_v51 = vpop.f32.mrf.mxu0  ;;  %v9752_v57 = vld [vmem:[#allocation55_spill] sm:$0xff] }
 0x6b3   : > { %4679 = vmatpush.bf16.msra.mxu0 %v8728_v36  ;;  %v4518_v33 = vmax.f32 %v4092_v8, 0.0  ;;  %v5946_v48 = vld [vmem:[%s9315_s9 + $0x24] sm:$0xf0] }
 0x6b7   : > { %v4241_v37 = vpop.f32.mrf.mxu1  ;;  %4680 = vmatpush.bf16.msra.mxu0 %v8706_v19 }
 0x6b8   : > { %v4242_v21 = vadd.f32 %v4241_v37, %v4153_v62  ;;  %v4093_v28 = vpop.f32.mrf.mxu3 }
 0x6b9   : > { %v4094_v36 = vadd.f32 %v4093_v28, %v8703_v35  ;;  %v4320_v9 = vpop.f32.mrf.mxu2  ;;  %v9753_v28 = vld [vmem:[#allocation19_spill] sm:$0xff] }
 0x6ba   : > { %v8863_v58 = vadd.f32 %v4320_v9, %v4232_v15  ;;  %v4170_v30 = vpop.f32.mrf.mxu0  ;;  %v8920_v9 = vor.u32 %v5946_v48, %v5756_v7  ;;  %v9761_v7 = vld [vmem:[#allocation15_spill] sm:$0xff] }
 0x6bb   : > { %v4520_v59 = vmax.f32 %v4094_v36, 0.0  ;;  %4681 = vmatpush.bf16.msra.mxu0 %v8686_v40  ;;  %v4171_v48 = vadd.f32 %v4170_v30, %v9761_v7 }
 0x6bd   : > { %4411 = vmatmul.bf16.gmra.mxu3 %v8528_v39  ;;  %v8869_v19 = vpack.c.bf16 %v4520_v59, %v4518_v33  ;;  %v9748_v39 = vld [vmem:[#allocation48_spill] sm:$0xff] }
 0x6be   : > { %4362 = vmatmul.bf16.gmra.mxu2 %v9747_v5  ;;  %4682 = vmatmul.bf16.vlgmr.msra.gmra.mxu0 %v8865_v10 }
 0x6bf   : > { %v4244_v35 = vpop.f32.mrf.mxu1 }
 0x6c0   : > { %v4245_v15 = vadd.f32 %v4244_v35, %v4156_v2  ;;  %v4096_v18 = vpop.f32.mrf.mxu3  ;;  %v9754_v2 = vld [vmem:[#allocation59_spill] sm:$0xff] }
 0x6c1   : > { %v4097_v50 = vadd.f32 %v4096_v18, %v8714_v14  ;;  %v4323_v11 = vpop.f32.mrf.mxu2  ;;  %v9755_v35 = vld [vmem:[#allocation47_spill] sm:$0xff] }
 0x6c2   : > { %v8878_v40 = vadd.f32 %v4323_v11, %v4235_v27  ;;  %4283 = vmatmul.bf16.gmra.mxu1 %v9748_v39  ;;  %v8892_v27 = vor.u32 %v5944_v1, %v5748_v38  ;;  %v8907_v62 = vpop.f32.mrf.mxu0  ;;  %v4166_v18 = vadd.f32 %v8853_v52, %v9755_v35  ;;  %v9757_v1 = vld [vmem:[#allocation60_spill] sm:$0xff] }
 0x6c3   : > { %v4522_v53 = vmax.f32 %v4097_v50, 0.0  ;;  %v9756_v50 = vld [vmem:[#allocation41_spill] sm:$0xff]  ;;  %v5764_v52 = vld [vmem:[%s9315_s9 + $0x30] sm:$0xf] }
 0x6c7   : > { %v8881_v22 = vpop.f32.mrf.mxu1 }
 0x6c8   : > { %v4098_v24 = vpop.f32.mrf.mxu3 }
 0x6c9   : > { %v4099_v23 = vadd.f32 %v4098_v24, %v8723_v60  ;;  %v4325_v26 = vpop.f32.mrf.mxu2 }
 0x6ca   : > { %v8890_v14 = vadd.f32 %v4325_v26, %v4237_v31  ;;  %v4175_v11 = vpop.f32.mrf.mxu0 }
 0x6cb   : > { %v4524_v56 = vmax.f32 %v4099_v23, 0.0 }
 0x6cd   : > { %4416 = vmatmul.bf16.gmra.mxu3 %v9749_v45  ;;  %v8895_v17 = vpack.c.bf16 %v4524_v56, %v4522_v53  ;;  %v9758_v53 = vld [vmem:[#allocation70_spill] sm:$0xff]  ;;  %v5948_v45 = vld [vmem:[%s9315_s9 + $0x34] sm:$0xf0] }
 0x6ce   : > { %4367 = vmatmul.bf16.gmra.mxu2 %v9751_v25  ;;  %4687 = vmatmul.bf16.gmra.mxu0 %v8892_v27 }
 0x6cf   : > { %v4249_v60 = vpop.f32.mrf.mxu1 }
 0x6d0   : > { %v8901_v4 = vadd.f32 %v4249_v60, %v4161_v41  ;;  %v4101_v31 = vpop.f32.mrf.mxu3 }
 0x6d1   : > { %v4102_v12 = vadd.f32 %v4101_v31, %v8734_v13  ;;  %v4328_v47 = vpop.f32.mrf.mxu2 }
 0x6d2   : > { %v8904_v8 = vadd.f32 %v4328_v47, %v4240_v43  ;;  %4288 = vmatmul.bf16.gmra.mxu1 %v9752_v57  ;;  %v8943_v41 = vpop.f32.mrf.mxu0  ;;  %v9760_v47 = vld [vmem:[#allocation29_spill] sm:$0xff] }
 0x6d3   : > { %v4526_v33 = vmax.f32 %v4102_v12, 0.0 }
 0x6d7   : > { %v8909_v37 = vpop.f32.mrf.mxu1 }
 0x6d8   : > { %v4103_v61 = vpop.f32.mrf.mxu3 }
 0x6d9   : > { %v4104_v13 = vadd.f32 %v4103_v61, %v9753_v28  ;;  %v4330_v36 = vpop.f32.mrf.mxu2  ;;  %v9762_v61 = vld [vmem:[#allocation74_spill] sm:$0xff] }
 0x6da   : > { %v8918_v43 = vadd.f32 %v4330_v36, %v4242_v21 }
 0x6db   : > { %v4528_v59 = vmax.f32 %v4104_v13, 0.0 }
 0x6dd   : > { %4421 = vmatmul.bf16.gmra.mxu3 %v9754_v2  ;;  %v8923_v5 = vpack.c.bf16 %v4528_v59, %v4526_v33  ;;  %v9763_v33 = vld [vmem:[#allocation45_spill] sm:$0xff]  ;;  %v4180_v59 = vpop.f32.mrf.mxu0 }
 0x6de   : > { %4372 = vmatmul.bf16.gmra.mxu2 %v9756_v50  ;;  %4692 = vmatmul.bf16.gmra.mxu0 %v8920_v9  ;;  %v9764_v2 = vld [vmem:[#allocation57_spill] sm:$0xff] }
 0x6df   : > { %v4254_v39 = vpop.f32.mrf.mxu1 }
 0x6e0   : > { %v8929_v38 = vadd.f32 %v4254_v39, %v4166_v18  ;;  %v4106_v21 = vpop.f32.mrf.mxu3 }
 0x6e1   : > { %v4107_v24 = vadd.f32 %v4106_v21, %v9757_v1  ;;  %v4333_v23 = vpop.f32.mrf.mxu2 }
 0x6e2   : > { %v8932_v26 = vadd.f32 %v4333_v23, %v4245_v15  ;;  %4293 = vmatmul.bf16.gmra.mxu1 %v9758_v53  ;;  %v8948_v15 = vor.u32 %v5948_v45, %v5764_v52  ;;  %v9765_v23 = vld [vmem:[#allocation39_spill] sm:$0xff]  ;;  %v9766_v52 = vld [vmem:[#allocation58_spill] sm:$0xff] }
 0x6e3   : > { %v4530_v31 = vmax.f32 %v4107_v24, 0.0  ;;  %v4176_v45 = vadd.f32 %v4175_v11, %v9766_v52  ;;  %v9768_v11 = vld [vmem:[#allocation32_spill] sm:$0xff] }
 0x6e4   : > { %9759 = vst [vmem:[#allocation37_spill] sm:$0xff] %v8948_v15 }
 0x6e5   : > { %v8967_v24 = vpop.f32.mrf.mxu0 }
 0x6e7   : > { %v8935_v56 = vpop.f32.mrf.mxu1 }
 0x6e8   : > { %v4108_v29 = vpop.f32.mrf.mxu3 }
 0x6e9   : > { %v4109_v25 = vadd.f32 %v4108_v29, %v8767_v32  ;;  %v8946_v60 = vpop.f32.mrf.mxu2  ;;  %v9767_v29 = vld [vmem:[#allocation66_spill] sm:$0xff] }
 0x6eb   : > { %v4532_v12 = vmax.f32 %v4109_v25, 0.0 }
 0x6ed   : > { %4426 = vmatmul.bf16.gmra.mxu3 %v9760_v47  ;;  %v8951_v57 = vpack.c.bf16 %v4532_v12, %v4530_v31  ;;  %v4185_v7 = vpop.f32.mrf.mxu0 }
 0x6ee   : > { %4377 = vmatmul.bf16.gmra.mxu2 %v9762_v61  ;;  %4697 = vmatmul.bf16.gmra.mxu0 %v8948_v15 }
 0x6ef   : > { %v4259_v28 = vpop.f32.mrf.mxu1 }
 0x6f0   : > { %v8956_v13 = vadd.f32 %v4259_v28, %v4171_v48  ;;  %v4111_v32 = vpop.f32.mrf.mxu3 }
 0x6f1   : > { %v8958_v36 = vpop.f32.mrf.mxu2  ;;  %v4112_v35 = vadd.f32 %v4111_v32, %v9764_v2 }
 0x6f2   : > { %4298 = vmatmul.bf16.gmra.mxu1 %v9763_v33 }
 0x6f3   : > { %v4534_v21 = vmax.f32 %v4112_v35, 0.0 }
 0x6f7   : > { %v8962_v18 = vpop.f32.mrf.mxu1 }
 0x6f8   : > { %v4113_v50 = vpop.f32.mrf.mxu3 }
 0x6f9   : > { %v4114_v30 = vadd.f32 %v4113_v50, %v8787_v55  ;;  %v8965_v39 = vpop.f32.mrf.mxu2  ;;  %v9769_v50 = vld [vmem:[#allocation18_spill] sm:$0xff] }
 0x6fb   : > { %v4536_v1 = vmax.f32 %v4114_v30, 0.0  ;;  %v4181_v30 = vadd.f32 %v4180_v59, %v9769_v50 }
 0x6fd   : > { %4431 = vmatmul.bf16.gmra.mxu3 %v9765_v23  ;;  %v4572_v53 = vpack.c.bf16 %v4536_v1, %v4534_v21  ;;  %v9770_v21 = vld [vmem:[#allocation44_spill] sm:$0xff] }
 0x6fe   : > { %4382 = vmatmul.bf16.gmra.mxu2 %v9767_v29 }
 0x6ff   : > { %v4264_v25 = vpop.f32.mrf.mxu1 }
 0x700   : > { %v4265_v31 = vadd.f32 %v4264_v25, %v4176_v45  ;;  %v4116_v12 = vpop.f32.mrf.mxu3 }
 0x701   : > { %v8972_v47 = vpop.f32.mrf.mxu2  ;;  %v4117_v55 = vadd.f32 %v4116_v12, %v8793_v42  ;;  %v8983_v42 = vpop.f32.mrf.mxu0 }
 0x703   : > { %v4538_v33 = vmax.f32 %v4117_v55, 0.0 }
 0x707   : > { %v8975_v48 = vpop.f32.mrf.mxu1 }
 0x708   : > { %v4118_v61 = vpop.f32.mrf.mxu3 }
 0x709   : > { %v4119_v28 = vadd.f32 %v4118_v61, %v8802_v54  ;;  %v8978_v32 = vpop.f32.mrf.mxu2  ;;  %v4190_v61 = vpop.f32.mrf.mxu0 }
 0x70b   : > { %v4540_v2 = vmax.f32 %v4119_v28, 0.0 }
 0x70d   : > { %4436 = vmatmul.bf16.gmra.mxu3 %v9768_v11  ;;  %v4574_v35 = vpack.c.bf16 %v4540_v2, %v4538_v33  ;;  %v9771_v2 = vld [vmem:[#allocation77_spill] sm:$0xff]  ;;  %v9772_v11 = vld [vmem:[#allocation36_spill] sm:$0xff] }
 0x70e   : > { %4387 = vmatmul.bf16.gmra.mxu2 %v9770_v21  ;;  %v4186_v50 = vadd.f32 %v4185_v7, %v9772_v11 }
 0x70f   : > { %v4269_v1 = vpop.f32.mrf.mxu1 }
 0x710   : > { %v4270_v23 = vadd.f32 %v4269_v1, %v4181_v30  ;;  %v4121_v52 = vpop.f32.mrf.mxu3 }
 0x711   : > { %v8985_v45 = vpop.f32.mrf.mxu2  ;;  %v4122_v54 = vadd.f32 %v4121_v52, %v8810_v6 }
 0x713   : > { %v4542_v59 = vmax.f32 %v4122_v54, 0.0 }
 0x717   : > { %v8988_v29 = vpop.f32.mrf.mxu1 }
 0x718   : > { %v4123_v25 = vpop.f32.mrf.mxu3 }
 0x719   : > { %v4124_v12 = vadd.f32 %v4123_v25, %v8819_v0  ;;  %v8991_v55 = vpop.f32.mrf.mxu2  ;;  %v8998_v0 = vpop.f32.mrf.mxu0 }
 0x71b   : > { %v4544_v28 = vmax.f32 %v4124_v12, 0.0 }
 0x71d   : > { %v4576_v33 = vpack.c.bf16 %v4544_v28, %v4542_v59  ;;  %4441 = vmatmul.bf16.gmra.mxu3 %v9771_v2 }
 0x71f   : > { %v4274_v30 = vpop.f32.mrf.mxu1  ;;  %4703 = vmatpush.bf16.msra.mxu1 %v4576_v33  ;;  %v9773_v33 = vld [vmem:[#allocation30_spill] sm:$0xff] }
 0x720   : > { %v4275_v21 = vadd.f32 %v4274_v30, %v4186_v50  ;;  %v4402_v1 = vpop.f32.mrf.mxu3 }
 0x721   : > { %v4353_v6 = vpop.f32.mrf.mxu2  ;;  %v4403_v52 = vadd.f32 %v4402_v1, %v8826_v16  ;;  %v4195_v2 = vpop.f32.mrf.mxu0 }
 0x722   : > { %v8996_v15 = vadd.f32 %v4353_v6, %v4265_v31  ;;  %v9774_v31 = vld [vmem:[#allocation17_spill] sm:$0xff] }
 0x723   : > { %4704 = vmatpush.bf16.msra.mxu1 %v4574_v35  ;;  %v4483_v59 = vmax.f32 %v4403_v52, 0.0  ;;  %v4191_v35 = vadd.f32 %v4190_v61, %v9774_v31  ;;  %v5941_v61 = vld [vmem:[%s9315_s9 + $0x4] sm:$0xf] }
 0x727   : > { %v9000_v25 = vpop.f32.mrf.mxu1  ;;  %4705 = vmatpush.bf16.msra.mxu1 %v4572_v53 }
 0x728   : > { %v4404_v54 = vpop.f32.mrf.mxu3 }
 0x729   : > { %v9002_v12 = vpop.f32.mrf.mxu2  ;;  %v4405_v7 = vadd.f32 %v4404_v54, %v8834_v49  ;;  %v9024_v52 = vpop.f32.mrf.mxu0 }
 0x72a   : > { %9775 = vst [vmem:[#allocation31_spill] sm:$0xff] %v9024_v52 }
 0x72b   : > { %v4485_v28 = vmax.f32 %v4405_v7, 0.0  ;;  %4706 = vmatpush.bf16.msra.mxu1 %v8951_v57 }
 0x72d   : > { %4446 = vmatmul.bf16.gmra.mxu3 %v9773_v33  ;;  %v9007_v16 = vpack.c.bf16 %v4485_v28, %v4483_v59  ;;  %v9778_v28 = vld [vmem:[#allocation67_spill] sm:$0xff] }
 0x72e   : > { %v4196_v33 = vadd.f32 %v4195_v2, %v9778_v28  ;;  %v5750_v2 = vld [vmem:[%s9315_s9 + $0x18] sm:$0xf0] }
 0x72f   : > { %v4279_v11 = vpop.f32.mrf.mxu1  ;;  %4707 = vmatpush.bf16.msra.mxu1 %v8923_v5  ;;  %v5742_v5 = vld [vmem:[%s9315_s9 + $0x8] sm:$0xf0] }
 0x730   : > { %v4280_v53 = vadd.f32 %v4279_v11, %v4191_v35  ;;  %v4407_v50 = vpop.f32.mrf.mxu3 }
 0x731   : > { %v4358_v30 = vpop.f32.mrf.mxu2  ;;  %v4408_v1 = vadd.f32 %v4407_v50, %v8847_v63 }
 0x732   : > { %v9012_v49 = vadd.f32 %v4358_v30, %v4270_v23 }
 0x733   : > { %4708 = vmatpush.bf16.msra.mxu1 %v8895_v17  ;;  %v9029_v17 = vor.u32 %v5941_v61, %v5742_v5  ;;  %v4487_v54 = vmax.f32 %v4408_v1, 0.0  ;;  %v4200_v1 = vpop.f32.mrf.mxu0 }
 0x735   : > { %9776 = vst [vmem:[#allocation40_spill] sm:$0xff] %v9029_v17 }
 0x737   : > { %v9015_v57 = vpop.f32.mrf.mxu1  ;;  %4709 = vmatpush.bf16.msra.mxu1 %v8869_v19  ;;  %v9777_v19 = vld [vmem:[#allocation26_spill] sm:$0xff] }
 0x738   : > { %v4409_v6 = vpop.f32.mrf.mxu3 }
 0x739   : > { %v9026_v63 = vpop.f32.mrf.mxu2  ;;  %v4410_v23 = vadd.f32 %v4409_v6, %v8863_v58 }
 0x73b   : > { %v4489_v7 = vmax.f32 %v4410_v23, 0.0  ;;  %4710 = vmatpush.bf16.msra.mxu1 %v8840_v46  ;;  %v5943_v46 = vld [vmem:[%s9315_s9 + $0x14] sm:$0xf] }
 0x73d   : > { %4451 = vmatmul.bf16.gmra.mxu3 %v9777_v19  ;;  %v9033_v59 = vpack.c.bf16 %v4489_v7, %v4487_v54  ;;  %v9051_v54 = vor.u32 %v5943_v46, %v5750_v2  ;;  %v9053_v7 = vpop.f32.mrf.mxu0  ;;  %v9782_v19 = vld [vmem:[#allocation34_spill] sm:$0xff] }
 0x73e   : > { %4711 = vmatmul.bf16.vlgmr.msra.gmra.mxu1 %v9029_v17  ;;  %9781 = vst [vmem:[#allocation51_spill] sm:$0xff] %v9053_v7 }
 0x73f   : > { %v4284_v31 = vpop.f32.mrf.mxu1  ;;  %9780 = vst [vmem:[#allocation53_spill] sm:$0xff] %v9051_v54 }
 0x740   : > { %v4285_v35 = vadd.f32 %v4284_v31, %v4196_v33  ;;  %v4412_v11 = vpop.f32.mrf.mxu3  ;;  %v9783_v33 = vld [vmem:[#allocation56_spill] sm:$0xff] }
 0x741   : > { %v4363_v50 = vpop.f32.mrf.mxu2  ;;  %v4413_v58 = vadd.f32 %v4412_v11, %v8878_v40  ;;  %v4201_v31 = vadd.f32 %v4200_v1, %v9783_v33  ;;  %v5758_v1 = vld [vmem:[%s9315_s9 + $0x28] sm:$0xf0]  ;;  %v9788_v33 = vld [vmem:[#allocation65_spill] sm:$0xff] }
 0x742   : > { %v9038_v30 = vadd.f32 %v4363_v50, %v4275_v21 }
 0x743   : > { %v4491_v40 = vmax.f32 %v4413_v58, 0.0 }
 0x745   : > { %v4205_v58 = vpop.f32.mrf.mxu0 }
 0x747   : > { %v9040_v61 = vpop.f32.mrf.mxu1 }
 0x748   : > { %9779 = vst [vmem:[#allocation22_spill] sm:$0xff] %v9040_v61  ;;  %v4414_v5 = vpop.f32.mrf.mxu3 }
 0x749   : > { %v9048_v6 = vpop.f32.mrf.mxu2  ;;  %v4415_v23 = vadd.f32 %v4414_v5, %v8890_v14  ;;  %v5945_v5 = vld [vmem:[%s9315_s9 + $0x24] sm:$0xf] }
 0x74b   : > { %v4493_v21 = vmax.f32 %v4415_v23, 0.0 }
 0x74d   : > { %4456 = vmatmul.bf16.gmra.mxu3 %v9782_v19  ;;  %v9056_v28 = vpack.c.bf16 %v4493_v21, %v4491_v40  ;;  %v9076_v19 = vor.u32 %v5945_v5, %v5758_v1  ;;  %v4207_v52 = vpop.f32.mrf.mxu0 }
 0x74e   : > { %4716 = vmatmul.bf16.gmra.mxu1 %v9051_v54 }
 0x74f   : > { %v4289_v11 = vpop.f32.mrf.mxu1  ;;  %9786 = vst [vmem:[#allocation63_spill] sm:$0xff] %v9076_v19 }
 0x750   : > { %v9060_v50 = vadd.f32 %v4289_v11, %v4201_v31  ;;  %v4417_v17 = vpop.f32.mrf.mxu3  ;;  %v4206_v31 = vadd.f32 %v4205_v58, %v9788_v33  ;;  %v5947_v58 = vld [vmem:[%s9315_s9 + $0x34] sm:$0xf] }
 0x751   : > { %v4368_v61 = vpop.f32.mrf.mxu2  ;;  %v4418_v14 = vadd.f32 %v4417_v17, %v8904_v8  ;;  %v9787_v17 = vld [vmem:[#allocation16_spill] sm:$0xff] }
 0x752   : > { %9784 = vst [vmem:[#allocation35_spill] sm:$0xff] %v9060_v50  ;;  %v9063_v46 = vadd.f32 %v4368_v61, %v4280_v53 }
 0x753   : > { %v4495_v8 = vmax.f32 %v4418_v14, 0.0  ;;  %v9789_v14 = vld [vmem:[#allocation20_spill] sm:$0xff] }
 0x754   : > { %v4208_v1 = vadd.f32 %v4207_v52, %v9789_v14 }
 0x757   : > { %v9065_v2 = vpop.f32.mrf.mxu1 }
 0x758   : > { %9785 = vst [vmem:[#allocation64_spill] sm:$0xff] %v9065_v2  ;;  %v4419_v23 = vpop.f32.mrf.mxu3 }
 0x759   : > { %v9073_v40 = vpop.f32.mrf.mxu2  ;;  %v4420_v21 = vadd.f32 %v4419_v23, %v8918_v43 }
 0x75b   : > { %v4497_v53 = vmax.f32 %v4420_v21, 0.0  ;;  %v5766_v21 = vld [vmem:[%s9315_s9 + $0x38] sm:$0xf0] }
 0x75d   : > { %4461 = vmatmul.bf16.gmra.mxu3 %v9787_v17  ;;  %v9079_v61 = vpack.c.bf16 %v4497_v53, %v4495_v8  ;;  %v9099_v17 = vor.u32 %v5947_v58, %v5766_v21  ;;  %v9794_v58 = vld [vmem:[#allocation25_spill] sm:$0xff] }
 0x75e   : > { %4721 = vmatmul.bf16.gmra.mxu1 %v9076_v19  ;;  %v4168_v21 = vadd.f32 %v8875_v51, %v9794_v58 }
 0x75f   : > { %v4294_v11 = vpop.f32.mrf.mxu1  ;;  %9790 = vst [vmem:[#allocation68_spill] sm:$0xff] %v9099_v17 }
 0x760   : > { %v9083_v54 = vadd.f32 %v4294_v11, %v4206_v31  ;;  %v4422_v50 = vpop.f32.mrf.mxu3 }
 0x761   : > { %v4373_v2 = vpop.f32.mrf.mxu2  ;;  %v9086_v43 = vadd.f32 %v4422_v50, %v8932_v26  ;;  %v4210_v26 = vpop.f32.mrf.mxu0  ;;  %v9791_v50 = vld [vmem:[#allocation49_spill] sm:$0xff] }
 0x762   : > { %v9088_v5 = vadd.f32 %v4373_v2, %v4285_v35  ;;  %v9792_v35 = vld [vmem:[#allocation43_spill] sm:$0xff] }
 0x763   : > { %v4211_v2 = vadd.f32 %v4210_v26, %v9792_v35  ;;  %v4257_v35 = vadd.f32 %v8935_v56, %v4168_v21 }
 0x765   : > { %v4346_v19 = vadd.f32 %v8978_v32, %v4257_v35 }
 0x767   : > { %v4296_v23 = vpop.f32.mrf.mxu1 }
 0x768   : > { %v9097_v8 = vadd.f32 %v4296_v23, %v4208_v1  ;;  %v4424_v53 = vpop.f32.mrf.mxu3 }
 0x76d   : > { %4466 = vmatmul.bf16.gmra.mxu3 %v9791_v50  ;;  %v9795_v50 = vld [vmem:[#allocation42_spill] sm:$0xff] }
 0x76e   : > { %4726 = vmatmul.bf16.gmra.mxu1 %v9099_v17  ;;  %v4173_v26 = vadd.f32 %v8907_v62, %v9795_v50  ;;  %v9796_v17 = vld [vmem:[#allocation38_spill] sm:$0xff]  ;;  %v4344_v62 = vadd.f32 %v8972_v47, %v8929_v38 }
 0x76f   : > { %v4299_v52 = vpop.f32.mrf.mxu1 }
 0x770   : > { %v9104_v33 = vadd.f32 %v4299_v52, %v4211_v2  ;;  %v4427_v31 = vpop.f32.mrf.mxu3  ;;  %v4262_v2 = vadd.f32 %v8962_v18, %v4173_v26  ;;  %v4349_v52 = vadd.f32 %v8985_v45, %v8956_v13  ;;  %v9797_v18 = vld [vmem:[#allocation62_spill] sm:$0xff] }
 0x771   : > { %v4158_v21 = vadd.f32 %v8816_v34, %v9797_v18  ;;  %v9130_v34 = vpop.f32.mrf.mxu0 }
 0x772   : > { %9793 = vst [vmem:[#allocation72_spill] sm:$0xff] %v9104_v33 }
 0x773   : > { %v4247_v32 = vadd.f32 %v8881_v22, %v4158_v21  ;;  %v9798_v22 = vld [vmem:[#allocation69_spill] sm:$0xff] }
 0x774   : > { %v4178_v26 = vadd.f32 %v8943_v41, %v9798_v22  ;;  %v9801_v22 = vld [vmem:[#allocation73_spill] sm:$0xff] }
 0x775   : > { %v4336_v38 = vadd.f32 %v8946_v60, %v4247_v32 }
 0x776   : > { %v4267_v60 = vadd.f32 %v8975_v48, %v4178_v26  ;;  %v4193_v26 = vadd.f32 %v8998_v0, %v9801_v22 }
 0x777   : > { %v9150_v18 = vpop.f32.mrf.mxu1 }
 0x778   : > { %v4429_v11 = vpop.f32.mrf.mxu3  ;;  %v4356_v35 = vadd.f32 %v9002_v12, %v4267_v60  ;;  %v9799_v12 = vld [vmem:[#allocation52_spill] sm:$0xff]  ;;  %v9180_v60 = vpop.f32.mrf.mxu2 }
 0x77d   : > { %4471 = vmatmul.bf16.gmra.mxu3 %v8785_v20  ;;  %v4163_v20 = vadd.f32 %v8837_v3, %v9796_v17 }
 0x77f   : > { %v4252_v51 = vadd.f32 %v8909_v37, %v4163_v20 }
 0x780   : > { %v4432_v14 = vpop.f32.mrf.mxu3 }
 0x781   : > { %v4341_v13 = vadd.f32 %v8965_v39, %v4252_v51  ;;  %v4433_v45 = vadd.f32 %v4432_v14, %v4344_v62  ;;  %v4425_v39 = vadd.f32 %v4424_v53, %v4336_v38 }
 0x788   : > { %v4434_v1 = vpop.f32.mrf.mxu3 }
 0x789   : > { %v4435_v56 = vadd.f32 %v4434_v1, %v4346_v19  ;;  %v4507_v19 = vmax.f32 %v4433_v45, 0.0 }
 0x78b   : > { %v4509_v37 = vmax.f32 %v4435_v56, 0.0 }
 0x78d   : > { %4476 = vmatmul.bf16.gmra.mxu3 %v8800_v44  ;;  %v4351_v44 = vadd.f32 %v8991_v55, %v4262_v2  ;;  %v4339_v55 = vadd.f32 %v8958_v36, %v8901_v4  ;;  %v9135_v36 = vpop.permute.xlu0 %4626  ;;  %v4499_v2 = vmax.f32 %v9086_v43, 0.0  ;;  %v4183_v43 = vadd.f32 %v8967_v24, %v9799_v12  ;;  %v9802_v12 = vld [vmem:[#allocation37_spill] sm:$0xff] }
 0x78f   : > { %v4428_v47 = vadd.f32 %v4427_v31, %v4339_v55  ;;  %v4501_v31 = vmax.f32 %v4425_v39, 0.0  ;;  %v4272_v21 = vadd.f32 %v8988_v29, %v4183_v43 }
 0x790   : > { %v4437_v23 = vpop.f32.mrf.mxu3 }
 0x791   : > { %v4438_v7 = vadd.f32 %v4437_v23, %v4349_v52  ;;  %v4430_v23 = vadd.f32 %v4429_v11, %v4341_v13  ;;  %v4503_v4 = vmax.f32 %v4428_v47, 0.0  ;;  %v4683_v52 = vpop.f32.mrf.mxu0  ;;  %v4555_v20 = vpack.c.bf16 %v4501_v31, %v4499_v2 }
 0x792   : > { %v4361_v13 = vadd.f32 %v9026_v63, %v4272_v21 }
 0x793   : > { %v4511_v3 = vmax.f32 %v4438_v7, 0.0  ;;  %v4505_v14 = vmax.f32 %v4430_v23, 0.0  ;;  %v4559_v7 = vpack.c.bf16 %v4509_v37, %v4507_v19 }
 0x795   : > { %v4557_v11 = vpack.c.bf16 %v4505_v14, %v4503_v4  ;;  %v9142_v62 = vpop.permute.xlu0 %4621 }
 0x798   : > { %v4439_v33 = vpop.f32.mrf.mxu3 }
 0x799   : > { %v4440_v58 = vadd.f32 %v4439_v33, %v4351_v44 }
 0x79b   : > { %v4513_v17 = vmax.f32 %v4440_v58, 0.0  ;;  %v9148_v58 = vpop.f32.mrf.mxu0 }
 0x79d   : > { %v4561_v50 = vpack.c.bf16 %v4513_v17, %v4511_v3 }
 0x79f   : > { %4732 = vmatpush.bf16.msrb.mxu0 %v4561_v50 }
 0x7a0   : > { %v4442_v33 = vpop.f32.mrf.mxu3 }
 0x7a1   : > { %v4443_v1 = vadd.f32 %v4442_v33, %v8996_v15 }
 0x7a3   : > { %4733 = vmatpush.bf16.msrb.mxu0 %v4559_v7  ;;  %v4515_v44 = vmax.f32 %v4443_v1, 0.0 }
 0x7a7   : > { %4734 = vmatpush.bf16.msrb.mxu0 %v4557_v11 }
 0x7a8   : > { %v4444_v53 = vpop.f32.mrf.mxu3 }
 0x7a9   : > { %v4445_v15 = vadd.f32 %v4444_v53, %v4356_v35 }
 0x7ab   : > { %v4517_v51 = vmax.f32 %v4445_v15, 0.0  ;;  %4735 = vmatpush.bf16.msrb.mxu0 %v4555_v20  ;;  %v9188_v20 = vpop.f32.mrf.mxu2 }
 0x7ad   : > { %v9140_v41 = vpack.c.bf16 %v4517_v51, %v4515_v44  ;;  %v9194_v51 = vpop.permute.xlu2 %4616 }
 0x7af   : > { %4736 = vmatpush.bf16.msrb.mxu0 %v9079_v61  ;;  %v9156_v61 = vpop.permute.xlu0 %4596 }
 0x7b0   : > { %v4447_v48 = vpop.f32.mrf.mxu3 }
 0x7b1   : > { %v4448_v56 = vadd.f32 %v4447_v48, %v9012_v49  ;;  %v4684_v49 = vadd.f32 %v4683_v52, %v9156_v61 }
 0x7b3   : > { %4737 = vmatpush.bf16.msrb.mxu0 %v9056_v28  ;;  %v4519_v17 = vmax.f32 %v4448_v56, 0.0  ;;  %v4688_v28 = vpop.f32.mrf.mxu0  ;;  %v9196_v56 = vpop.f32.mrf.mxu2 }
 0x7b7   : > { %4738 = vmatpush.bf16.msrb.mxu0 %v9033_v59  ;;  %v9800_v59 = vld [vmem:[#allocation78_spill] sm:$0xff] }
 0x7b8   : > { %v4449_v45 = vpop.f32.mrf.mxu3  ;;  %v4188_v37 = vadd.f32 %v8983_v42, %v9800_v59 }
 0x7b9   : > { %v4450_v3 = vadd.f32 %v4449_v45, %v4361_v13 }
 0x7ba   : > { %v4277_v38 = vadd.f32 %v9000_v25, %v4188_v37 }
 0x7bb   : > { %v4521_v24 = vmax.f32 %v4450_v3, 0.0  ;;  %v4712_v32 = vpop.f32.mrf.mxu1  ;;  %4739 = vmatpush.bf16.msrb.mxu0 %v9007_v16  ;;  %v4690_v16 = vpop.f32.mrf.mxu0 }
 0x7bc   : > { %v9160_v55 = vadd.f32 %v4712_v32, %v4684_v49  ;;  %v4366_v47 = vadd.f32 %v9048_v6, %v4277_v38  ;;  %v4282_v6 = vadd.f32 %v9015_v57, %v4193_v26  ;;  %v4383_v59 = vpop.f32.mrf.mxu2 }
 0x7bd   : > { %v9162_v23 = vpack.c.bf16 %v4521_v24, %v4519_v17 }
 0x7be   : > { %4740 = vmatmul.bf16.vlgmr.msrb.gmra.mxu0 %v8865_v10  ;;  %v4371_v4 = vadd.f32 %v9073_v40, %v4282_v6  ;;  %v9190_v40 = vpop.permute.xlu1 %4631 }
 0x7c0   : > { %v4452_v29 = vpop.f32.mrf.mxu3 }
 0x7c1   : > { %v4453_v63 = vadd.f32 %v4452_v29, %v9038_v30  ;;  %v9207_v29 = vpop.permute.xlu2 %4611 }
 0x7c3   : > { %v9168_v50 = vpop.f32.mrf.mxu1  ;;  %v4523_v39 = vmax.f32 %v4453_v63, 0.0  ;;  %v4693_v30 = vpop.f32.mrf.mxu0  ;;  %v4691_v63 = vadd.f32 %v4690_v16, %v9207_v29 }
 0x7c4   : > { %v4694_v17 = vadd.f32 %v4693_v30, %v9194_v51 }
 0x7c8   : > { %v4454_v19 = vpop.f32.mrf.mxu3 }
 0x7c9   : > { %v4455_v33 = vadd.f32 %v4454_v19, %v4366_v47 }
 0x7cb   : > { %v4525_v14 = vmax.f32 %v4455_v33, 0.0  ;;  %v4717_v7 = vpop.f32.mrf.mxu1  ;;  %v4695_v35 = vpop.f32.mrf.mxu0 }
 0x7cc   : > { %v4696_v13 = vadd.f32 %v4695_v35, %v9142_v62 }
 0x7cd   : > { %v9172_v1 = vpack.c.bf16 %v4525_v14, %v4523_v39 }
 0x7ce   : > { %4745 = vmatmul.bf16.gmra.mxu0 %v8892_v27 }
 0x7d0   : > { %v4457_v10 = vpop.f32.mrf.mxu3 }
 0x7d1   : > { %v4458_v42 = vadd.f32 %v4457_v10, %v9063_v46 }
 0x7d3   : > { %v4719_v25 = vpop.f32.mrf.mxu1  ;;  %v4527_v2 = vmax.f32 %v4458_v42, 0.0  ;;  %v4698_v15 = vpop.f32.mrf.mxu0 }
 0x7d4   : > { %v4720_v33 = vadd.f32 %v4719_v25, %v4691_v63 }
 0x7d6   : > { %v4796_v6 = vmax.f32 %v4720_v33, 0.0  ;;  %v9809_v33 = vld [vmem:[#allocation31_spill] sm:$0xff] }
 0x7d8   : > { %v4459_v31 = vpop.f32.mrf.mxu3 }
 0x7d9   : > { %v4460_v11 = vadd.f32 %v4459_v31, %v4371_v4 }
 0x7db   : > { %v4529_v53 = vmax.f32 %v4460_v11, 0.0  ;;  %v4722_v27 = vpop.f32.mrf.mxu1  ;;  %v4700_v43 = vpop.f32.mrf.mxu0 }
 0x7dc   : > { %v4701_v45 = vadd.f32 %v4700_v43, %v9190_v40  ;;  %v4723_v37 = vadd.f32 %v4722_v27, %v4694_v17  ;;  %v4385_v11 = vpop.f32.mrf.mxu2  ;;  %v4384_v27 = vadd.f32 %v4383_v59, %v9083_v54  ;;  %v9803_v43 = vld [vmem:[#allocation50_spill] sm:$0xff]  ;;  %v9806_v17 = vld [vmem:[#allocation51_spill] sm:$0xff] }
 0x7dd   : > { %v9182_v52 = vpack.c.bf16 %v4529_v53, %v4527_v2  ;;  %v4790_v2 = vmax.f32 %v9160_v55, 0.0 }
 0x7de   : > { %4750 = vmatmul.bf16.gmra.mxu0 %v8920_v9  ;;  %v9199_v9 = vpop.permute.xlu1 %4606  ;;  %v4798_v26 = vmax.f32 %v4723_v37, 0.0  ;;  %v9807_v37 = vld [vmem:[#allocation64_spill] sm:$0xff] }
 0x7df   : > { %v4689_v19 = vadd.f32 %v4688_v28, %v9199_v9 }
 0x7e0   : > { %v4462_v46 = vpop.f32.mrf.mxu3 }
 0x7e1   : > { %v9186_v0 = vadd.f32 %v4462_v46, %v9088_v5  ;;  %v4699_v5 = vadd.f32 %v4698_v15, %v9135_v36  ;;  %v4718_v22 = vadd.f32 %v4717_v7, %v4689_v19  ;;  %v9808_v19 = vld [vmem:[#allocation28_spill] sm:$0xff] }
 0x7e3   : > { %v4724_v57 = vpop.f32.mrf.mxu1  ;;  %v4794_v31 = vmax.f32 %v4718_v22, 0.0  ;;  %v9810_v22 = vld [vmem:[#allocation22_spill] sm:$0xff] }
 0x7e4   : > { %v4725_v24 = vadd.f32 %v4724_v57, %v4696_v13  ;;  %v4388_v55 = vpop.f32.mrf.mxu2 }
 0x7e5   : > { %v4808_v25 = vpack.c.bf16 %v4796_v6, %v4794_v31 }
 0x7e6   : > { %v4800_v39 = vmax.f32 %v4725_v24, 0.0  ;;  %v9211_v42 = vpop.permute.xlu1 %4601 }
 0x7e7   : > { %v4686_v30 = vadd.f32 %v9148_v58, %v9211_v42  ;;  %v9221_v58 = vld [vmem:[%s9317_s11] sm:$0xff] }
 0x7e8   : > { %v9192_v44 = vpop.f32.mrf.mxu3  ;;  %v4810_v4 = vpack.c.bf16 %v4800_v39, %v4798_v26  ;;  %v4198_v39 = vadd.f32 %v9809_v33, %v9808_v19  ;;  %v9811_v26 = vld [vmem:[#allocation35_spill] sm:$0xff] }
 0x7e9   : > { %v4715_v16 = vadd.f32 %v9168_v50, %v4686_v30  ;;  %v4386_v50 = vadd.f32 %v4385_v11, %v9097_v8  ;;  %v9805_v8 = vld [vmem:[#allocation33_spill] sm:$0xff] }
 0x7ea   : > { %v4203_v24 = vadd.f32 %v9806_v17, %v9805_v8 }
 0x7eb   : > { %v4727_v48 = vpop.f32.mrf.mxu1  ;;  %v4792_v28 = vmax.f32 %v4715_v16, 0.0  ;;  %v4379_v16 = vadd.f32 %v9188_v20, %v9811_v26  ;;  %v9812_v20 = vld [vmem:[#allocation40_spill] sm:$0xff] }
 0x7ec   : > { %v4728_v3 = vadd.f32 %v4727_v48, %v4699_v5  ;;  %v4213_v5 = vadd.f32 %v9130_v34, %v9803_v43  ;;  %v4390_v13 = vpop.f32.mrf.mxu2 }
 0x7ed   : > { %v4806_v53 = vpack.c.bf16 %v4792_v28, %v4790_v2 }
 0x7ee   : > { %4755 = vmatmul.bf16.gmra.mxu0 %v9802_v12  ;;  %v4802_v38 = vmax.f32 %v4728_v3, 0.0  ;;  %v9804_v3 = vld [vmem:[#allocation72_spill] sm:$0xff] }
 0x7f0   : > { %v9202_v21 = vpop.f32.mrf.mxu3 }
 0x7f1   : > { %v4468_v11 = vadd.f32 %v9202_v21, %v4379_v16 }
 0x7f3   : > { %v4729_v49 = vpop.f32.mrf.mxu1 }
 0x7f4   : > { %v4730_v32 = vadd.f32 %v4729_v49, %v4701_v45  ;;  %v4302_v45 = vadd.f32 %v9150_v18, %v4213_v5  ;;  %v4389_v49 = vadd.f32 %v4388_v55, %v9804_v3  ;;  %v4287_v18 = vadd.f32 %v9810_v22, %v4198_v39 }
 0x7f6   : > { %v4804_v47 = vmax.f32 %v4730_v32, 0.0  ;;  %v4391_v32 = vadd.f32 %v4390_v13, %v4302_v45  ;;  %v4376_v31 = vadd.f32 %v9180_v60, %v4287_v18  ;;  %v4871_v13 = vld [vmem:[%s9319_s13] sm:$0x3] }
 0x7f8   : > { %v4812_v14 = vpack.c.bf16 %v4804_v47, %v4802_v38  ;;  %v4469_v10 = vpop.f32.mrf.mxu3  ;;  %v4292_v38 = vadd.f32 %v9807_v37, %v4203_v24  ;;  %v4465_v28 = vadd.f32 %v9192_v44, %v4376_v31 }
 0x7fa   : > { %4841 = vmatpush.bf16.msra.mxu0 %v4812_v14  ;;  %v4381_v14 = vadd.f32 %v9196_v56, %v4292_v38  ;;  %v4533_v56 = vmax.f32 %v4465_v28, 0.0 }
 0x7fc   : > { %v4470_v6 = vadd.f32 %v4469_v10, %v4381_v14  ;;  %v9813_v10 = vld [vmem:[#allocation53_spill] sm:$0xff] }
 0x7fe   : > { %4842 = vmatpush.bf16.msra.mxu0 %v4810_v4 }
 0x800   : > { %v4472_v35 = vpop.f32.mrf.mxu3 }
 0x801   : > { %v4473_v7 = vadd.f32 %v4472_v35, %v4384_v27  ;;  %v4535_v35 = vmax.f32 %v4468_v11, 0.0 }
 0x802   : > { %4843 = vmatpush.bf16.msra.mxu0 %v4808_v25  ;;  %v4537_v25 = vmax.f32 %v4470_v6, 0.0 }
 0x803   : > { %v4539_v15 = vmax.f32 %v4473_v7, 0.0 }
 0x804   : > { %v4573_v2 = vpack.c.bf16 %v4537_v25, %v4535_v35 }
 0x806   : > { %4844 = vmatpush.bf16.msra.mxu0 %v4806_v53  ;;  %v4531_v53 = vmax.f32 %v9186_v0, 0.0  ;;  %v9814_v0 = vld [vmem:[#allocation63_spill] sm:$0xff] }
 0x808   : > { %v4474_v46 = vpop.f32.mrf.mxu3  ;;  %v4571_v27 = vpack.c.bf16 %v4533_v56, %v4531_v53 }
 0x809   : > { %v4475_v57 = vadd.f32 %v4474_v46, %v4386_v50  ;;  %5774 = vmatmul.msk.bf16.vlgmr.msra.gmra.mxu0 %vm4833_vm1, %v9221_v58 }
 0x80b   : > { %v4541_v48 = vmax.f32 %v4475_v57, 0.0  ;;  %v9815_v57 = vld [vmem:[#allocation68_spill] sm:$0xff] }
 0x80d   : > { %v4575_v12 = vpack.c.bf16 %v4541_v48, %v4539_v15  ;;  %v4826_v48 = vpop.permute.xlu0 %4825 }
 0x810   : > { %v4477_v54 = vpop.f32.mrf.mxu3 }
 0x811   : > { %v4478_v63 = vadd.f32 %v4477_v54, %v4389_v49 }
 0x813   : > { %v4543_v34 = vmax.f32 %v4478_v63, 0.0 }
 0x818   : > { %v4479_v59 = vpop.f32.mrf.mxu3 }
 0x819   : > { %v4480_v47 = vadd.f32 %v4479_v59, %v4391_v32 }
 0x81b   : > { %v4545_v30 = vmax.f32 %v4480_v47, 0.0 }
 0x81d   : > { %v4577_v4 = vpack.c.bf16 %v4545_v30, %v4543_v34 }
 0x81f   : > { %4761 = vmatpush.bf16.msrb.mxu1 %v4577_v4 }
 0x823   : > { %4762 = vmatpush.bf16.msrb.mxu1 %v4575_v12 }
 0x827   : > { %4763 = vmatpush.bf16.msrb.mxu1 %v4573_v2 }
 0x82b   : > { %4764 = vmatpush.bf16.msrb.mxu1 %v4571_v27 }
 0x82f   : > { %4765 = vmatpush.bf16.msrb.mxu1 %v9182_v52 }
 0x833   : > { %4766 = vmatpush.bf16.msrb.mxu1 %v9172_v1 }
 0x837   : > { %4767 = vmatpush.bf16.msrb.mxu1 %v9162_v23  ;;  %v4821_v23 = vpop.permute.xlu2 %4820 }
 0x83b   : > { %v4741_v60 = vpop.f32.mrf.mxu0  ;;  %4768 = vmatpush.bf16.msrb.mxu1 %v9140_v41 }
 0x83c   : > { %v4742_v45 = vadd.f32 %v4741_v60, %v9156_v61 }
 0x83e   : > { %4769 = vmatmul.bf16.vlgmr.msrb.gmra.mxu1 %v9812_v20 }
 0x843   : > { %v4743_v44 = vpop.f32.mrf.mxu0 }
 0x844   : > { %v4744_v8 = vadd.f32 %v4743_v44, %v9211_v42 }
 0x84b   : > { %v4746_v21 = vpop.f32.mrf.mxu0 }
 0x84c   : > { %v4747_v38 = vadd.f32 %v4746_v21, %v9199_v9 }
 0x84e   : > { %4774 = vmatmul.bf16.gmra.mxu1 %v9813_v10  ;;  %v4876_v10 = vpop.permute.xlu1 %4875 }
 0x853   : > { %v4748_v50 = vpop.f32.mrf.mxu0 }
 0x854   : > { %v4749_v47 = vadd.f32 %v4748_v50, %v9207_v29 }
 0x85b   : > { %v4751_v7 = vpop.f32.mrf.mxu0 }
 0x85c   : > { %v4752_v22 = vadd.f32 %v4751_v7, %v9194_v51 }
 0x85e   : > { %4779 = vmatmul.bf16.gmra.mxu1 %v9814_v0 }
 0x863   : > { %v4753_v46 = vpop.f32.mrf.mxu0 }
 0x864   : > { %v4754_v42 = vadd.f32 %v4753_v46, %v9142_v62 }
 0x86b   : > { %v4756_v52 = vpop.f32.mrf.mxu0 }
 0x86c   : > { %v4757_v29 = vadd.f32 %v4756_v52, %v9135_v36 }
 0x86e   : > { %4784 = vmatmul.bf16.gmra.mxu1 %v9815_v57 }
 0x873   : > { %v4758_v1 = vpop.f32.mrf.mxu0 }
 0x874   : > { %v4759_v11 = vadd.f32 %v4758_v1, %v9190_v40 }
 0x886   : > { %v4846_v55 = vpop.f32.mrf.mxu0 }
 0x887   : > { %v4847_v15 = vadd.f32 %v4846_v55, %v4821_v23  ;;  %v4917_v55 = vpop.permute.xlu2 %4916 }
 0x889   : > { %v4865_v54 = vmax.f32 %v4847_v15, 0.0 }
 0x88e   : > { %v4848_v41 = vpop.f32.mrf.mxu0 }
 0x88f   : > { %v4849_v12 = vadd.f32 %v4848_v41, %v4826_v48 }
 0x891   : > { %v4867_v43 = vmax.f32 %v4849_v12, 0.0 }
 0x893   : > { %v4869_v5 = vpack.c.bf16 %v4867_v43, %v4865_v54 }
 0x895   : > { %4889 = vmatpush.bf16.msrb.mxu0 %v4869_v5 }
 0x898   : > { %5776 = vmatmul.msk.bf16.vlgmr.msrb.gmra.mxu0 %vm4878_vm2, %v4871_v13 }
 0x8bb   : > { %v4770_v3 = vpop.f32.mrf.mxu1 }
 0x8bc   : > { %v4771_v49 = vadd.f32 %v4770_v3, %v4742_v45 }
 0x8be   : > { %v4791_v32 = vmax.f32 %v4771_v49, 0.0 }
 0x8c3   : > { %v4772_v17 = vpop.f32.mrf.mxu1 }
 0x8c4   : > { %v4773_v24 = vadd.f32 %v4772_v17, %v4744_v8  ;;  %v4940_v17 = vpop.permute.xlu0 %4939 }
 0x8c6   : > { %v4793_v63 = vmax.f32 %v4773_v24, 0.0 }
 0x8c8   : > { %v4807_v59 = vpack.c.bf16 %v4793_v63, %v4791_v32  ;;  %v4942_v63 = vperm.slane %v4940_v17, 0 }
 0x8cb   : > { %v4775_v37 = vpop.f32.mrf.mxu1 }
 0x8cc   : > { %v4776_v19 = vadd.f32 %v4775_v37, %v4747_v38 }
 0x8ce   : > { %v4795_v14 = vmax.f32 %v4776_v19, 0.0 }
 0x8d3   : > { %v4777_v33 = vpop.f32.mrf.mxu1 }
 0x8d4   : > { %v4778_v39 = vadd.f32 %v4777_v33, %v4749_v47 }
 0x8d6   : > { %v4797_v34 = vmax.f32 %v4778_v39, 0.0 }
 0x8d8   : > { %v4809_v61 = vpack.c.bf16 %v4797_v34, %v4795_v14 }
 0x8db   : > { %v4780_v30 = vpop.f32.mrf.mxu1 }
 0x8dc   : > { %v4781_v18 = vadd.f32 %v4780_v30, %v4752_v22 }
 0x8de   : > { %v4799_v6 = vmax.f32 %v4781_v18, 0.0 }
 0x8e3   : > { %v4782_v26 = vpop.f32.mrf.mxu1 }
 0x8e4   : > { %v4783_v16 = vadd.f32 %v4782_v26, %v4754_v42 }
 0x8e6   : > { %v4801_v4 = vmax.f32 %v4783_v16, 0.0 }
 0x8e8   : > { %v4811_v31 = vpack.c.bf16 %v4801_v4, %v4799_v6 }
 0x8eb   : > { %v4785_v9 = vpop.f32.mrf.mxu1 }
 0x8ec   : > { %v4786_v28 = vadd.f32 %v4785_v9, %v4757_v29 }
 0x8ee   : > { %v4803_v56 = vmax.f32 %v4786_v28, 0.0 }
 0x8f3   : > { %v4787_v25 = vpop.f32.mrf.mxu1 }
 0x8f4   : > { %v4788_v35 = vadd.f32 %v4787_v25, %v4759_v11 }
 0x8f6   : > { %v4805_v2 = vmax.f32 %v4788_v35, 0.0 }
 0x8f8   : > { %v4813_v53 = vpack.c.bf16 %v4805_v2, %v4803_v56  ;;  %v4989_v56 = vlaneseq }
 0x8fa   : > { %4855 = vmatpush.bf16.msra.mxu1 %v4813_v53  ;;  %vm4991_vm13 = vcmp.lt.s32.totalorder %v4989_v56, 256 }
 0x8fe   : > { %4856 = vmatpush.bf16.msra.mxu1 %v4811_v31 }
 0x902   : > { %4857 = vmatpush.bf16.msra.mxu1 %v4809_v61 }
 0x906   : > { %4858 = vmatpush.bf16.msra.mxu1 %v4807_v59 }
 0x909   : > { %5775 = vmatmul.msk.bf16.vlgmr.msra.gmra.mxu1 %vm4833_vm1, %v9221_v58 }
 0x915   : > { %v4891_v62 = vpop.f32.mrf.mxu0 }
 0x916   : > { %v4892_v50 = vadd.f32 %v4891_v62, %v4876_v10 }
 0x918   : > { %v4908_v46 = vmax.f32 %v4892_v50, 0.0 }
 0x91d   : > { %v4893_v51 = vpop.f32.mrf.mxu0 }
 0x986   : > { %v4860_v27 = vpop.f32.mrf.mxu1 }
 0x987   : > { %v4861_v60 = vadd.f32 %v4860_v27, %v4821_v23 }
 0x989   : > { %v4866_v40 = vmax.f32 %v4861_v60, 0.0 }
 0x98e   : > { %v4862_v36 = vpop.f32.mrf.mxu1 }
 0x98f   : > { %v4863_v20 = vadd.f32 %v4862_v36, %v4826_v48 }
 0x991   : > { %v4868_v44 = vmax.f32 %v4863_v20, 0.0 }
 0x993   : > { %v4870_v21 = vpack.c.bf16 %v4868_v44, %v4866_v40 }
 0x995   : > { %4902 = vmatpush.bf16.msrb.mxu1 %v4870_v21 }
 0x998   : > { %5777 = vmatmul.msk.bf16.vlgmr.msrb.gmra.mxu1 %vm4878_vm2, %v4871_v13 }
 0xa15   : > { %v4904_v0 = vpop.f32.mrf.mxu1 }
 0xa16   : > { %v4905_v7 = vadd.f32 %v4904_v0, %v4876_v10 }
 0xa18   : > { %v4909_v57 = vmax.f32 %v4905_v7, 0.0 }
 0xa1a   : > { %v4910_v52 = vpack.c.bf16 %v4909_v57, %v4908_v46 }
 0xa1c   : > { %v4911_v58 = vunpack.c.l.bf16 %v4910_v52  ;;  %v4912_v1 = vunpack.c.h.bf16 %v4910_v52 }
 0xa1d   : > { %v4906_v23 = vpop.f32.mrf.mxu1 }
 0xa1e   : > { %v4919_v15 = vmul.f32 %v4917_v55, %v4911_v58  ;;  %v4920_v48 = vmul.f32 %v4917_v55, %v4912_v1 }
 0xa20   : > { %v4922_v41 = vsel %vm4921_vm3, %v4919_v15, 0.0  ;;  %v4929_v12 = vsel %vm4921_vm3, %v4920_v48, 0.0 }
 0xa21   : > { %v4923_v54 = vrot.slane %v4922_v41, 4  ;;  %v4930_v43 = vrot.slane %v4929_v12, 4 }
 0xa23   : > { %v4924_v5 = vadd.f32 %v4923_v54, %v4922_v41  ;;  %v4931_v13 = vadd.f32 %v4930_v43, %v4929_v12 }
 0xa25   : > { %v4925_v45 = vrot.slane %v4924_v5, 2  ;;  %v4932_v3 = vrot.slane %v4931_v13, 2 }
 0xa27   : > { %v4926_v49 = vadd.f32 %v4925_v45, %v4924_v5  ;;  %v4933_v8 = vadd.f32 %v4932_v3, %v4931_v13 }
 0xa29   : > { %v4927_v24 = vrot.slane %v4926_v49, 1  ;;  %v4934_v32 = vrot.slane %v4933_v8, 1 }
 0xa2b   : > { %v4928_v59 = vadd.f32 %v4927_v24, %v4926_v49  ;;  %v4935_v37 = vadd.f32 %v4934_v32, %v4933_v8 }
 0xa2d   : > { %v4943_v38 = vadd.f32 %v4942_v63, %v4928_v59  ;;  %v4944_v47 = vadd.f32 %v4942_v63, %v4935_v37 }
 0xa2f   : > { %v5778_v19 = vmul.f32 -1.442695, %v4943_v38  ;;  %v5779_v33 = vmul.f32 -1.442695, %v4944_v47 }
 0xa31   : > { %6006 = vpow2.f32 %v5778_v19 }
 0xa32   : > { %6008 = vpow2.f32 %v5779_v33 }
 0xa37   : > { %v6007_v39 = vpop.eup %6006 }
 0xa38   : > { %v6009_v14 = vpop.eup %6008  ;;  %v4951_v34 = vadd.f32 1.0, %v6007_v39 }
 0xa39   : > { %v4952_v61 = vadd.f32 1.0, %v6009_v14 }
 0xa3a   : > { %6010 = vrcp.f32 %v4951_v34  ;;  %vm4958_vm6 = vweird.f32 %v4951_v34  ;;  %v4964_v11 = vand.u32 2147483648, %v4951_v34  ;;  %v4962_v25 = vand.u32 2147483647, %v4951_v34 }
 0xa3b   : > { %6012 = vrcp.f32 %v4952_v61  ;;  %v4979_v4 = vand.u32 2147483648, %v4952_v61  ;;  %v4977_v9 = vand.u32 2147483647, %v4952_v61  ;;  %vm4973_vm8 = vweird.f32 %v4952_v61 }
 0xa3c   : > { %v4965_v51 = vor.u32 1.1754944e-38, %v4964_v11  ;;  %vm4963_vm12 = vcmp.eq.f32.partialorder %v4962_v25, 8.507059e+37 }
 0xa3d   : > { %v4980_v2 = vor.u32 1.1754944e-38, %v4979_v4  ;;  %vm4978_vm10 = vcmp.eq.f32.partialorder %v4977_v9, 8.507059e+37 }
 0xa40   : > { %v6011_v30 = vpop.eup %6010 }
 0xa41   : > { %v6013_v22 = vpop.eup %6012  ;;  %v4954_v42 = vmul.f32 %v6011_v30, %v4951_v34  ;;  %vm4959_vm4 = vweird.f32 %v6011_v30 }
 0xa42   : > { %v4969_v18 = vmul.f32 %v6013_v22, %v4952_v61  ;;  %vm4974_vm5 = vweird.f32 %v6013_v22  ;;  %vm9271_vm7 = vmor %vm4958_vm6, %vm4959_vm4 }
 0xa43   : > { %v4955_v26 = vsub.f32 1.0, %v4954_v42  ;;  %vm4975_vm9 = vmor %vm4973_vm8, %vm4974_vm5 }
 0xa44   : > { %v4970_v16 = vsub.f32 1.0, %v4969_v18 }
 0xa45   : > { %v4956_v6 = vmul.f32 %v6011_v30, %v4955_v26 }
 0xa46   : > { %v4971_v31 = vmul.f32 %v6013_v22, %v4970_v16 }
 0xa47   : > { %v4957_v29 = vadd.f32 %v6011_v30, %v4956_v6 }
 0xa48   : > { %v4972_v35 = vadd.f32 %v6013_v22, %v4971_v31 }
 0xa49   : > { %v4961_v53 = vsel %vm9271_vm7, %v6011_v30, %v4957_v29 }
 0xa4a   : > { %v4976_v62 = vsel %vm4975_vm9, %v6013_v22, %v4972_v35  ;;  %v4966_v36 = vsel %vm4963_vm12, %v4965_v51, %v4961_v53 }
 0xa4b   : > { %v4981_v27 = vsel %vm4978_vm10, %v4980_v2, %v4976_v62 }
 0xa4c   : > { %v4985_v60 = vrot.slane %v4981_v27, 7 }
 0xa4e   : > { %v4987_v20 = vsel %vm4986_vm11, %v4966_v36, %v4985_v60 }
 0xa4f   : > { %4993 = vst.msk [vmem:[%s613_s16] sm:$0x3] %vm4991_vm13, %v4987_v20 }
 0xa50   : > { %6071 = shalt.err (!%p6068_p9)
}
 0xa51   : > { %5954 = dma.vmem_to_hbm [thread:$0]  (%p6252_p6), %s5008_s0, 32, %s5010_s30, %s4995_s7  }
 0xa52 PF: > { %s9819_s1 = sld [smem:[#allocation10_spill]]  ;;  %p5961_p11 = pnand %p5090_p1, %p6258_p10 }
 0xa54   : > { %p5962_p12 = pneg %p5961_p11 }
 0xa58   : > { %s5021_s2 = sand.u32 1, %s9819_s1  }
 0xa59   : > { %s5022_s20 = scalar_lea.sflag [#allocation6], %s5021_s2 }
 0xa5a   : > { %6093 = dma.done.wait (%p5962_p12), %s5022_s20, 32  }
 0xa5b   : > { %6095 = vsyncadd (%p5962_p12), %s5022_s20, 4294967264  ;;  %s9821_s29 = sld [smem:[#allocation11_spill]]  ;;  %s9823_s26 = smov %s6102_s27 }
 0xa5c   : > { %s9822_s21 = sld [smem:[#allocation12_spill]]  ;;  %s9824_s27 = smov %s6106_s28 }
 0xa61   : > { %p30_p13 = scmp.ge.s32.totalorder %s9821_s29, 4  }
 0xa62   : > { %s9825_s28 = smov %s9822_s21 }
 0xa63   :  { %32 = sbr.rel (!%p30_p13) target bundleno = 9 (0x9), region = 171 }
 0xa68   :  { %5028 = vsyncpa [#allocation5], 1 }
 0xa69   :  { %5030 = vsyncpa [#allocation5 + $0x1], 1 }
 0xa6a   :  { %5031 = vsyncpa [#allocation6], 1 }
 0xa6b   :  { %5033 = vsyncpa [#allocation6 + $0x1], 1 }

</bundles_post_ra>
